<compile_context>
chip_gen: v5e
topology: v5e:2x2
jax: 0.10.0
libtpu: 0.0.40
codegen_flags: <defaults>
</compile_context>

<pallas_src>
import functools
import math

import jax
import jax.numpy as jnp
from jax.experimental import pallas as pl
from jax.experimental.pallas import tpu as pltpu


# ---------------------------------------------------------------------------
# Pallas kernel 1: fused dual-stream masked bidirectional LSTM.
#   * grid=(2,) over the two independent streams (ctx, asp) -> on v7x the two
#     TensorCores can run one stream each ("parallel" semantics).
#   * input projection x @ [Wih_f | Wih_b] (+ bias) hoisted out of the
#     recurrence: one M = T*B MXU call instead of 2*T tiny M=B matmuls.
#   * forward and backward recurrences fused into one fully-unrolled loop so
#     the two independent MXU/EUP chains overlap (T is a trace-time constant).
#   * lane-full (B, H) mask per step (no last-dim-1 broadcast in the loop),
#     emulating pack_padded_sequence / pad_packed_sequence: state freezes on
#     padded steps and padded outputs are zeroed.
#   * single (B, T, 2H) output per stream -> no XLA concat/transpose between
#     the LSTM and attention kernels.
# ---------------------------------------------------------------------------
def _dual_bilstm_kernel(x_ref, mask_ref, wih_ref, whh_f_ref, whh_b_ref, b_ref,
                        out_ref, *, hidden, seq_len, batch):
    H, T, B = hidden, seq_len, batch

    # Hoist all weight / bias / activation loads out of the recurrence.
    x = x_ref[0]            # (T*B, E)   time-major, flattened
    mask = mask_ref[0]      # (T*B, H)   lane-full validity mask
    wih = wih_ref[0]        # (E, 8H)    [fwd i,f,g,o | bwd i,f,g,o]
    whh_f = whh_f_ref[0]    # (H, 4H)
    whh_b = whh_b_ref[0]    # (H, 4H)
    b = b_ref[0]            # (1, 8H)    (b_ih + b_hh folded, fwd | bwd)

    # Hoisted input projection for both directions, bias pre-added.
    xp = jnp.dot(x, wih, preferred_element_type=jnp.float32) + b    # (T*B, 8H)

    def cell(gates, c):
        # PyTorch LSTM gate order: i, f, g, o
        i = jax.nn.sigmoid(gates[:, 0 * H:1 * H])
        f = jax.nn.sigmoid(gates[:, 1 * H:2 * H])
        g = jnp.tanh(gates[:, 2 * H:3 * H])
        o = jax.nn.sigmoid(gates[:, 3 * H:4 * H])
        c_new = f * c + i * g
        h_new = o * jnp.tanh(c_new)
        return h_new, c_new

    zero = jnp.zeros((B, H), jnp.float32)
    h_f, c_f, h_b, c_b = zero, zero, zero, zero

    # Fused fwd/bwd recurrence, fully unrolled (static Python loop: all slice
    # starts are compile-time constants, state lives in vregs, no scratch).
    for t in range(T):
        tb = T - 1 - t
        m_f = mask[t * B:(t + 1) * B, :]          # (B, H)
        m_b = mask[tb * B:(tb + 1) * B, :]
        gates_f = xp[t * B:(t + 1) * B, 0:4 * H] + jnp.dot(
            h_f, whh_f, preferred_element_type=jnp.float32)
        gates_b = xp[tb * B:(tb + 1) * B, 4 * H:8 * H] + jnp.dot(
            h_b, whh_b, preferred_element_type=jnp.float32)
        hf_new, cf_new = cell(gates_f, c_f)
        hb_new, cb_new = cell(gates_b, c_b)
        # packed-sequence semantics: freeze state on padded steps
        h_f = m_f * hf_new + (1.0 - m_f) * h_f
        c_f = m_f * cf_new + (1.0 - m_f) * c_f
        h_b = m_b * hb_new + (1.0 - m_b) * h_b
        c_b = m_b * cb_new + (1.0 - m_b) * c_b
        # padded positions -> 0 (pad_packed_sequence semantics)
        out_ref[0, :, t:t + 1, 0:H] = (h_f * m_f)[:, None, :]
        out_ref[0, :, tb:tb + 1, H:2 * H] = (h_b * m_b)[:, None, :]


def dual_bilstm(x_s, mask_s, wih_s, whh_f_s, whh_b_s, b_s, hidden, seq_len, batch):
    """x_s: (2, T*B, E), mask_s: (2, T*B, H) -> (2, B, T, 2H)."""
    _, TB, E = x_s.shape
    H, T, B = hidden, seq_len, batch
    kernel = functools.partial(_dual_bilstm_kernel,
                               hidden=H, seq_len=T, batch=B)
    return pl.pallas_call(
        kernel,
        out_shape=jax.ShapeDtypeStruct((2, B, T, 2 * H), jnp.float32),
        grid=(2,),
        in_specs=[
            pl.BlockSpec((1, TB, E), lambda s: (s, 0, 0)),
            pl.BlockSpec((1, TB, H), lambda s: (s, 0, 0)),
            pl.BlockSpec((1, E, 8 * H), lambda s: (s, 0, 0)),
            pl.BlockSpec((1, H, 4 * H), lambda s: (s, 0, 0)),
            pl.BlockSpec((1, H, 4 * H), lambda s: (s, 0, 0)),
            pl.BlockSpec((1, 1, 8 * H), lambda s: (s, 0, 0)),
        ],
        out_specs=pl.BlockSpec((1, B, T, 2 * H), lambda s: (s, 0, 0, 0)),
        compiler_params=pltpu.CompilerParams(
            dimension_semantics=("parallel",)),
    )(x_s, mask_s, wih_s, whh_f_s, whh_b_s, b_s)


# ---------------------------------------------------------------------------
# Pallas kernel 2: AOA attention (interaction matmul, dual softmax, weighted
# sum) fused with the final dense projection.  gamma uses a VPU reduce instead
# of an N=1 MXU matmul; softmax denominators use the EUP approx reciprocal.
# ---------------------------------------------------------------------------
def _softmax(x, axis):
    m = jnp.max(x, axis=axis, keepdims=True)
    e = jnp.exp(x - m)
    return e * pl.reciprocal(jnp.sum(e, axis=axis, keepdims=True), approx=True)


def _aoa_kernel(ctx_ref, asp_ref, w_ref, b_ref, out_ref):
    ctx = ctx_ref[...]                                        # (B, Tc, 2H)
    asp = asp_ref[...]                                        # (B, Ta, 2H)
    inter = jnp.einsum("bqd,bkd->bqk", ctx, asp,
                       preferred_element_type=jnp.float32)    # (B, Tc, Ta)
    alpha = _softmax(inter, axis=1)                           # softmax over ctx axis
    beta = _softmax(inter, axis=2)                            # softmax over asp axis
    beta_avg = jnp.mean(beta, axis=1, keepdims=True)          # (B, 1, Ta)
    gamma = jnp.sum(alpha * beta_avg, axis=2, keepdims=True)  # (B, Tc, 1) (VPU)
    weighted = jnp.sum(ctx * gamma, axis=1)                   # (B, 2H)
    out_ref[...] = (jnp.dot(weighted, w_ref[...],
                            preferred_element_type=jnp.float32)
                    + b_ref[...])


def aoa_attention(ctx_out, asp_out, dense_w, dense_b):
    B, Tc, D2 = ctx_out.shape
    _, Ta, _ = asp_out.shape
    P = dense_w.shape[1]
    return pl.pallas_call(
        _aoa_kernel,
        out_shape=jax.ShapeDtypeStruct((B, P), jnp.float32),
        grid=(1,),
        in_specs=[
            pl.BlockSpec((B, Tc, D2), lambda i: (0, 0, 0)),
            pl.BlockSpec((B, Ta, D2), lambda i: (0, 0, 0)),
            pl.BlockSpec((D2, P), lambda i: (0, 0)),
            pl.BlockSpec((1, P), lambda i: (0, 0)),
        ],
        out_specs=pl.BlockSpec((B, P), lambda i: (0, 0)),
    )(ctx_out, asp_out, dense_w, dense_b)


# ---------------------------------------------------------------------------
# Full forward (glue: embedding gather, length counting, mask build, stream
# stacking).  Two pallas_calls total.
# ---------------------------------------------------------------------------
def aoa_forward(text_indices, aspect_indices, params, embed_dim, hidden_dim):
    B, Tc = text_indices.shape
    _, Ta = aspect_indices.shape
    H = hidden_dim
    Tm = max(Tc, Ta)                     # pad both streams to a common length

    ctx_len = jnp.sum(text_indices != 0, axis=1)
    asp_len = jnp.sum(aspect_indices != 0, axis=1)

    # NB: the reference multiplies the text indices by embed_dim before the
    # embedding lookup; reproduced verbatim.
    ctx_idx = jnp.pad(text_indices * embed_dim, ((0, 0), (0, Tm - Tc)))
    asp_idx = jnp.pad(aspect_indices, ((0, 0), (0, Tm - Ta)))

    emb = params["embedding"]
    # gather time-major and flatten to (Tm*B, E): the kernel's hoisted input
    # projection is then one contiguous matmul, no in-kernel reshape.
    ctx_x = emb[ctx_idx.T].reshape(Tm * B, embed_dim)
    asp_x = emb[asp_idx.T].reshape(Tm * B, embed_dim)

    # lane-full validity masks, time-major (Tm*B, H)
    t_iota = jnp.arange(Tm)[:, None]
    ctx_mask = jnp.broadcast_to(
        (t_iota < ctx_len[None, :]).astype(jnp.float32)[:, :, None],
        (Tm, B, H)).reshape(Tm * B, H)
    asp_mask = jnp.broadcast_to(
        (t_iota < asp_len[None, :]).astype(jnp.float32)[:, :, None],
        (Tm, B, H)).reshape(Tm * B, H)

    x_s = jnp.stack([ctx_x, asp_x], axis=0)            # (2, Tm*B, E)
    mask_s = jnp.stack([ctx_mask, asp_mask], axis=0)   # (2, Tm*B, H)

    cl, al = params["ctx_lstm"], params["asp_lstm"]
    wih_s = jnp.stack([jnp.concatenate([cl["wih_f"], cl["wih_b"]], axis=1),
                       jnp.concatenate([al["wih_f"], al["wih_b"]], axis=1)], 0)
    whh_f_s = jnp.stack([cl["whh_f"], al["whh_f"]], axis=0)
    whh_b_s = jnp.stack([cl["whh_b"], al["whh_b"]], axis=0)
    b_s = jnp.stack([jnp.concatenate([cl["b_f"], cl["b_b"]], axis=1),
                     jnp.concatenate([al["b_f"], al["b_b"]], axis=1)], axis=0)

    lstm_out = dual_bilstm(x_s, mask_s, wih_s, whh_f_s, whh_b_s, b_s,
                           H, Tm, B)                    # (2, B, Tm, 2H)
    ctx_out = lstm_out[0, :, :Tc, :]                    # (B, Tc, 2H)
    asp_out = lstm_out[1, :, :Ta, :]                    # (B, Ta, 2H)

    return aoa_attention(ctx_out, asp_out, params["dense_w"], params["dense_b"])


def init_params(key, vocab, embed_dim, hidden_dim, polarities_dim):
    ks = jax.random.split(key, 16)
    k_lstm = 1.0 / math.sqrt(hidden_dim)
    k_dense = 1.0 / math.sqrt(2 * hidden_dim)

    def u(k, shape, bound):
        return jax.random.uniform(k, shape, jnp.float32, -bound, bound)

    def lstm(ksub):
        return dict(
            wih_f=u(ksub[0], (embed_dim, 4 * hidden_dim), k_lstm),
            whh_f=u(ksub[1], (hidden_dim, 4 * hidden_dim), k_lstm),
            b_f=u(ksub[2], (1, 4 * hidden_dim), k_lstm),   # b_ih + b_hh folded
            wih_b=u(ksub[3], (embed_dim, 4 * hidden_dim), k_lstm),
            whh_b=u(ksub[4], (hidden_dim, 4 * hidden_dim), k_lstm),
            b_b=u(ksub[5], (1, 4 * hidden_dim), k_lstm),
        )

    embedding = 0.1 * jax.random.normal(ks[0], (vocab, embed_dim), jnp.float32)
    embedding = embedding.at[0].set(0.0)   # padding row
    return dict(
        embedding=embedding,
        ctx_lstm=lstm(ks[1:7]),
        asp_lstm=lstm(ks[7:13]),
        dense_w=u(ks[13], (2 * hidden_dim, polarities_dim), k_dense),
        dense_b=u(ks[14], (1, polarities_dim), k_dense),
    )


if __name__ == "__main__":
    B, Tc, Ta = 2, 8, 4
    embed_dim, hidden_dim, polarities_dim = 32, 32, 3
    max_tok = 10
    # vocab sized so that text_indices * embed_dim stays in range (as required
    # by the verbatim `embed(text_indices * embed_dim)` lookup).
    vocab = max_tok * embed_dim

    key = jax.random.PRNGKey(0)
    k_param, k_text, k_asp = jax.random.split(key, 3)
    params = init_params(k_param, vocab, embed_dim, hidden_dim, polarities_dim)

    text_indices = jax.random.randint(k_text, (B, Tc), 1, max_tok, dtype=jnp.int32)
    text_indices = text_indices.at[1, 6:].set(0)       # row 1 has length 6, row 0 full
    aspect_indices = jax.random.randint(k_asp, (B, Ta), 1, max_tok, dtype=jnp.int32)
    aspect_indices = aspect_indices.at[1, 3:].set(0)   # row 1 has length 3, row 0 full

    fwd = jax.jit(functools.partial(aoa_forward,
                                    embed_dim=embed_dim, hidden_dim=hidden_dim))
    out = fwd(text_indices, aspect_indices, params)
    out = jax.block_until_ready(out)
    assert out.shape == (B, polarities_dim)
    print("KERNEL_OK")
</pallas_src>

<mosaic_0001>
module attributes {stable_mosaic.version = 11 : i64} {
  func.func @_aoa_kernel(%arg0: i32, %arg1: memref<2x8x64xf32, #tpu.memory_space<vmem>>, %arg2: memref<2x4x64xf32, #tpu.memory_space<vmem>>, %arg3: memref<64x3xf32, #tpu.memory_space<vmem>>, %arg4: memref<1x3xf32, #tpu.memory_space<vmem>>, %arg5: memref<2x3xf32, #tpu.memory_space<vmem>>) attributes {dimension_semantics = [#tpu.dimension_semantics<arbitrary>], iteration_bounds = array<i64: 1>, scalar_prefetch = 0 : i64, scratch_operands = 0 : i64, tpu.core_type = #tpu.core_type<tc>, window_params = [{pipeline_mode = #tpu.pipeline_mode<synchronous>, transform_indices = @transform_0, window_bounds = array<i64: 2, 8, 64>}, {pipeline_mode = #tpu.pipeline_mode<synchronous>, transform_indices = @transform_1, window_bounds = array<i64: 2, 4, 64>}, {pipeline_mode = #tpu.pipeline_mode<synchronous>, transform_indices = @transform_2, window_bounds = array<i64: 64, 3>}, {pipeline_mode = #tpu.pipeline_mode<synchronous>, transform_indices = @transform_3, window_bounds = array<i64: 1, 3>}, {pipeline_mode = #tpu.pipeline_mode<synchronous>, transform_indices = @transform_4, window_bounds = array<i64: 2, 3>}]} {
    %c0 = arith.constant 0 : index
    %c0_0 = arith.constant 0 : index
    %c0_1 = arith.constant 0 : index
    %0 = vector.load %arg1[%c0, %c0_0, %c0_1] : memref<2x8x64xf32, #tpu.memory_space<vmem>>, vector<2x8x64xf32>
    %c0_2 = arith.constant 0 : index
    %c0_3 = arith.constant 0 : index
    %c0_4 = arith.constant 0 : index
    %1 = vector.load %arg2[%c0_2, %c0_3, %c0_4] : memref<2x4x64xf32, #tpu.memory_space<vmem>>, vector<2x4x64xf32>
    "tpu.trace_start"() <{level = 10 : i32, message = "bqd,bkd->bqk"}> : () -> ()
    %cst = arith.constant dense<0.000000e+00> : vector<2x8x4xf32>
    %2 = tpu.matmul %0, %1, %cst {dimension_numbers = #tpu.dot_dimension_numbers<[2], [2], [1], [1], [0, 0, 0, 1, 1, 1], [0], [0]>} : vector<2x8x64xf32>, vector<2x4x64xf32>, vector<2x8x4xf32> -> vector<2x8x4xf32>
    "tpu.trace_stop"() : () -> ()
    %cst_5 = arith.constant dense<0xFF800000> : vector<2x4xf32>
    %3 = vector.multi_reduction <maximumf>, %2, %cst_5 [1] : vector<2x8x4xf32> to vector<2x4xf32>
    %4 = vector.shape_cast %3 : vector<2x4xf32> to vector<2x1x4xf32>
    %5 = vector.broadcast %4 : vector<2x1x4xf32> to vector<2x8x4xf32>
    %6 = arith.subf %2, %5 : vector<2x8x4xf32>
    %7 = math.exp %6 : vector<2x8x4xf32>
    %cst_6 = arith.constant dense<0.000000e+00> : vector<2x4xf32>
    %8 = vector.multi_reduction <add>, %7, %cst_6 [1] : vector<2x8x4xf32> to vector<2x4xf32>
    %9 = vector.shape_cast %8 : vector<2x4xf32> to vector<2x1x4xf32>
    %10 = tpu.reciprocal %9 {approx = true} : vector<2x1x4xf32> -> vector<2x1x4xf32>
    %11 = vector.broadcast %10 : vector<2x1x4xf32> to vector<2x8x4xf32>
    %12 = arith.mulf %7, %11 : vector<2x8x4xf32>
    %cst_7 = arith.constant dense<0xFF800000> : vector<2x8xf32>
    %13 = vector.multi_reduction <maximumf>, %2, %cst_7 [2] : vector<2x8x4xf32> to vector<2x8xf32>
    %14 = vector.shape_cast %13 : vector<2x8xf32> to vector<2x8x1xf32>
    %15 = vector.broadcast %14 : vector<2x8x1xf32> to vector<2x8x4xf32>
    %16 = arith.subf %2, %15 : vector<2x8x4xf32>
    %17 = math.exp %16 : vector<2x8x4xf32>
    %cst_8 = arith.constant dense<0.000000e+00> : vector<2x8xf32>
    %18 = vector.multi_reduction <add>, %17, %cst_8 [2] : vector<2x8x4xf32> to vector<2x8xf32>
    %19 = vector.shape_cast %18 : vector<2x8xf32> to vector<2x8x1xf32>
    %20 = tpu.reciprocal %19 {approx = true} : vector<2x8x1xf32> -> vector<2x8x1xf32>
    %21 = vector.broadcast %20 : vector<2x8x1xf32> to vector<2x8x4xf32>
    %22 = arith.mulf %17, %21 : vector<2x8x4xf32>
    %cst_9 = arith.constant dense<0.000000e+00> : vector<2x4xf32>
    %23 = vector.multi_reduction <add>, %22, %cst_9 [1] : vector<2x8x4xf32> to vector<2x4xf32>
    %24 = vector.shape_cast %23 : vector<2x4xf32> to vector<2x1x4xf32>
    %cst_10 = arith.constant 8.000000e+00 : f32
    %25 = vector.broadcast %cst_10 : f32 to vector<2x1x4xf32>
    %26 = arith.divf %24, %25 : vector<2x1x4xf32>
    %27 = vector.broadcast %26 : vector<2x1x4xf32> to vector<2x8x4xf32>
    %28 = arith.mulf %12, %27 : vector<2x8x4xf32>
    %cst_11 = arith.constant dense<0.000000e+00> : vector<2x8xf32>
    %29 = vector.multi_reduction <add>, %28, %cst_11 [2] : vector<2x8x4xf32> to vector<2x8xf32>
    %30 = vector.shape_cast %29 : vector<2x8xf32> to vector<2x8x1xf32>
    %31 = vector.broadcast %30 : vector<2x8x1xf32> to vector<2x8x64xf32>
    %32 = arith.mulf %0, %31 : vector<2x8x64xf32>
    %cst_12 = arith.constant dense<0.000000e+00> : vector<2x64xf32>
    %33 = vector.multi_reduction <add>, %32, %cst_12 [1] : vector<2x8x64xf32> to vector<2x64xf32>
    %c0_13 = arith.constant 0 : index
    %c0_14 = arith.constant 0 : index
    %34 = vector.load %arg3[%c0_13, %c0_14] : memref<64x3xf32, #tpu.memory_space<vmem>>, vector<64x3xf32>
    %cst_15 = arith.constant dense<0.000000e+00> : vector<2x3xf32>
    %35 = tpu.matmul %33, %34, %cst_15 {dimension_numbers = #tpu.dot_dimension_numbers<[1], [0], [0], [1], [0, 0, 1, 1], [], []>} : vector<2x64xf32>, vector<64x3xf32>, vector<2x3xf32> -> vector<2x3xf32>
    %c0_16 = arith.constant 0 : index
    %c0_17 = arith.constant 0 : index
    %36 = vector.load %arg4[%c0_16, %c0_17] : memref<1x3xf32, #tpu.memory_space<vmem>>, vector<1x3xf32>
    %37 = vector.broadcast %36 : vector<1x3xf32> to vector<2x3xf32>
    %38 = arith.addf %35, %37 : vector<2x3xf32>
    %c0_18 = arith.constant 0 : index
    %c0_19 = arith.constant 0 : index
    %39 = vector.load %arg5[%c0_18, %c0_19] : memref<2x3xf32, #tpu.memory_space<vmem>>, vector<2x3xf32>
    tpu.vector_store %arg5[%c0_18, %c0_19], %38 {strides = array<i32>} : memref<2x3xf32, #tpu.memory_space<vmem>>, vector<2x3xf32>,
    return
  }
  func.func @transform_0(%arg0: i32) -> (i32, i32, i32) {
    %c0_i32 = arith.constant 0 : i32
    %c0_i32_0 = arith.constant 0 : i32
    %c0_i32_1 = arith.constant 0 : i32
    %c0_i32_2 = arith.constant 0 : i32
    return %c0_i32, %c0_i32_0, %c0_i32_1 : i32, i32, i32
  }
  func.func @transform_1(%arg0: i32) -> (i32, i32, i32) {
    %c0_i32 = arith.constant 0 : i32
    %c0_i32_0 = arith.constant 0 : i32
    %c0_i32_1 = arith.constant 0 : i32
    %c0_i32_2 = arith.constant 0 : i32
    return %c0_i32, %c0_i32_0, %c0_i32_1 : i32, i32, i32
  }
  func.func @transform_2(%arg0: i32) -> (i32, i32) {
    %c0_i32 = arith.constant 0 : i32
    %c0_i32_0 = arith.constant 0 : i32
    %c0_i32_1 = arith.constant 0 : i32
    return %c0_i32, %c0_i32_0 : i32, i32
  }
  func.func @transform_3(%arg0: i32) -> (i32, i32) {
    %c0_i32 = arith.constant 0 : i32
    %c0_i32_0 = arith.constant 0 : i32
    %c0_i32_1 = arith.constant 0 : i32
    return %c0_i32, %c0_i32_0 : i32, i32
  }
  func.func @transform_4(%arg0: i32) -> (i32, i32) {
    %c0_i32 = arith.constant 0 : i32
    %c0_i32_0 = arith.constant 0 : i32
    %c0_i32_1 = arith.constant 0 : i32
    return %c0_i32, %c0_i32_0 : i32, i32
  }
}

module attributes {stable_mosaic.version = 11 : i64} {
  func.func @_dual_bilstm_kernel(%arg0: i32, %arg1: memref<1x16x32xf32, #tpu.memory_space<vmem>>, %arg2: memref<1x16x32xf32, #tpu.memory_space<vmem>>, %arg3: memref<1x32x256xf32, #tpu.memory_space<vmem>>, %arg4: memref<1x32x128xf32, #tpu.memory_space<vmem>>, %arg5: memref<1x32x128xf32, #tpu.memory_space<vmem>>, %arg6: memref<1x1x256xf32, #tpu.memory_space<vmem>>, %arg7: memref<1x2x8x64xf32, #tpu.memory_space<vmem>>) attributes {dimension_semantics = [#tpu.dimension_semantics<parallel>], iteration_bounds = array<i64: 2>, scalar_prefetch = 0 : i64, scratch_operands = 0 : i64, tpu.core_type = #tpu.core_type<tc>, window_params = [{transform_indices = @transform_0, window_bounds = array<i64: 1, 16, 32>}, {transform_indices = @transform_1, window_bounds = array<i64: 1, 16, 32>}, {transform_indices = @transform_2, window_bounds = array<i64: 1, 32, 256>}, {transform_indices = @transform_3, window_bounds = array<i64: 1, 32, 128>}, {transform_indices = @transform_4, window_bounds = array<i64: 1, 32, 128>}, {transform_indices = @transform_5, window_bounds = array<i64: 1, 1, 256>}, {transform_indices = @transform_6, window_bounds = array<i64: 1, 2, 8, 64>}]} {
    %c0 = arith.constant 0 : index
    %c0_0 = arith.constant 0 : index
    %c0_1 = arith.constant 0 : index
    %0 = vector.load %arg1[%c0, %c0_0, %c0_1] : memref<1x16x32xf32, #tpu.memory_space<vmem>>, vector<1x16x32xf32>
    %1 = vector.shape_cast %0 : vector<1x16x32xf32> to vector<16x32xf32>
    %c0_2 = arith.constant 0 : index
    %c0_3 = arith.constant 0 : index
    %c0_4 = arith.constant 0 : index
    %2 = vector.load %arg2[%c0_2, %c0_3, %c0_4] : memref<1x16x32xf32, #tpu.memory_space<vmem>>, vector<1x16x32xf32>
    %3 = vector.shape_cast %2 : vector<1x16x32xf32> to vector<16x32xf32>
    %c0_5 = arith.constant 0 : index
    %c0_6 = arith.constant 0 : index
    %c0_7 = arith.constant 0 : index
    %4 = vector.load %arg3[%c0_5, %c0_6, %c0_7] : memref<1x32x256xf32, #tpu.memory_space<vmem>>, vector<1x32x256xf32>
    %5 = vector.shape_cast %4 : vector<1x32x256xf32> to vector<32x256xf32>
    %c0_8 = arith.constant 0 : index
    %c0_9 = arith.constant 0 : index
    %c0_10 = arith.constant 0 : index
    %6 = vector.load %arg4[%c0_8, %c0_9, %c0_10] : memref<1x32x128xf32, #tpu.memory_space<vmem>>, vector<1x32x128xf32>
    %7 = vector.shape_cast %6 : vector<1x32x128xf32> to vector<32x128xf32>
    %c0_11 = arith.constant 0 : index
    %c0_12 = arith.constant 0 : index
    %c0_13 = arith.constant 0 : index
    %8 = vector.load %arg5[%c0_11, %c0_12, %c0_13] : memref<1x32x128xf32, #tpu.memory_space<vmem>>, vector<1x32x128xf32>
    %9 = vector.shape_cast %8 : vector<1x32x128xf32> to vector<32x128xf32>
    %c0_14 = arith.constant 0 : index
    %c0_15 = arith.constant 0 : index
    %c0_16 = arith.constant 0 : index
    %10 = vector.load %arg6[%c0_14, %c0_15, %c0_16] : memref<1x1x256xf32, #tpu.memory_space<vmem>>, vector<1x1x256xf32>
    %11 = vector.shape_cast %10 : vector<1x1x256xf32> to vector<1x256xf32>
    %cst = arith.constant dense<0.000000e+00> : vector<16x256xf32>
    %12 = tpu.matmul %1, %5, %cst {dimension_numbers = #tpu.dot_dimension_numbers<[1], [0], [0], [1], [0, 0, 1, 1], [], []>} : vector<16x32xf32>, vector<32x256xf32>, vector<16x256xf32> -> vector<16x256xf32>
    %13 = vector.broadcast %11 : vector<1x256xf32> to vector<16x256xf32>
    %14 = arith.addf %12, %13 : vector<16x256xf32>
    %cst_17 = arith.constant 0.000000e+00 : f32
    %15 = vector.broadcast %cst_17 : f32 to vector<2x32xf32>
    %16 = vector.extract_strided_slice %3 {offsets = [0, 0], sizes = [2, 32], strides = [1, 1]} : vector<16x32xf32> to vector<2x32xf32>
    %17 = vector.extract_strided_slice %3 {offsets = [14, 0], sizes = [2, 32], strides = [1, 1]} : vector<16x32xf32> to vector<2x32xf32>
    %18 = vector.extract_strided_slice %14 {offsets = [0, 0], sizes = [2, 128], strides = [1, 1]} : vector<16x256xf32> to vector<2x128xf32>
    %cst_18 = arith.constant dense<0.000000e+00> : vector<2x128xf32>
    %19 = tpu.matmul %15, %7, %cst_18 {dimension_numbers = #tpu.dot_dimension_numbers<[1], [0], [0], [1], [0, 0, 1, 1], [], []>} : vector<2x32xf32>, vector<32x128xf32>, vector<2x128xf32> -> vector<2x128xf32>
    %20 = arith.addf %18, %19 : vector<2x128xf32>
    %21 = vector.extract_strided_slice %14 {offsets = [14, 128], sizes = [2, 128], strides = [1, 1]} : vector<16x256xf32> to vector<2x128xf32>
    %cst_19 = arith.constant dense<0.000000e+00> : vector<2x128xf32>
    %22 = tpu.matmul %15, %9, %cst_19 {dimension_numbers = #tpu.dot_dimension_numbers<[1], [0], [0], [1], [0, 0, 1, 1], [], []>} : vector<2x32xf32>, vector<32x128xf32>, vector<2x128xf32> -> vector<2x128xf32>
    %23 = arith.addf %21, %22 : vector<2x128xf32>
    %24 = vector.extract_strided_slice %20 {offsets = [0, 0], sizes = [2, 32], strides = [1, 1]} : vector<2x128xf32> to vector<2x32xf32>
    %25 = arith.negf %24 : vector<2x32xf32>
    %26 = math.exp %25 : vector<2x32xf32>
    %cst_20 = arith.constant 1.000000e+00 : f32
    %27 = vector.broadcast %cst_20 : f32 to vector<2x32xf32>
    %28 = arith.addf %27, %26 : vector<2x32xf32>
    %29 = arith.divf %27, %28 : vector<2x32xf32>
    %30 = vector.extract_strided_slice %20 {offsets = [0, 32], sizes = [2, 32], strides = [1, 1]} : vector<2x128xf32> to vector<2x32xf32>
    %31 = arith.negf %30 : vector<2x32xf32>
    %32 = math.exp %31 : vector<2x32xf32>
    %cst_21 = arith.constant 1.000000e+00 : f32
    %33 = vector.broadcast %cst_21 : f32 to vector<2x32xf32>
    %34 = arith.addf %33, %32 : vector<2x32xf32>
    %35 = arith.divf %33, %34 : vector<2x32xf32>
    %36 = vector.extract_strided_slice %20 {offsets = [0, 64], sizes = [2, 32], strides = [1, 1]} : vector<2x128xf32> to vector<2x32xf32>
    %37 = math.tanh %36 : vector<2x32xf32>
    %38 = vector.extract_strided_slice %20 {offsets = [0, 96], sizes = [2, 32], strides = [1, 1]} : vector<2x128xf32> to vector<2x32xf32>
    %39 = arith.negf %38 : vector<2x32xf32>
    %40 = math.exp %39 : vector<2x32xf32>
    %cst_22 = arith.constant 1.000000e+00 : f32
    %41 = vector.broadcast %cst_22 : f32 to vector<2x32xf32>
    %42 = arith.addf %41, %40 : vector<2x32xf32>
    %43 = arith.divf %41, %42 : vector<2x32xf32>
    %44 = arith.mulf %35, %15 : vector<2x32xf32>
    %45 = arith.mulf %29, %37 : vector<2x32xf32>
    %46 = arith.addf %44, %45 : vector<2x32xf32>
    %47 = math.tanh %46 : vector<2x32xf32>
    %48 = arith.mulf %43, %47 : vector<2x32xf32>
    %49 = vector.extract_strided_slice %23 {offsets = [0, 0], sizes = [2, 32], strides = [1, 1]} : vector<2x128xf32> to vector<2x32xf32>
    %50 = arith.negf %49 : vector<2x32xf32>
    %51 = math.exp %50 : vector<2x32xf32>
    %cst_23 = arith.constant 1.000000e+00 : f32
    %52 = vector.broadcast %cst_23 : f32 to vector<2x32xf32>
    %53 = arith.addf %52, %51 : vector<2x32xf32>
    %54 = arith.divf %52, %53 : vector<2x32xf32>
    %55 = vector.extract_strided_slice %23 {offsets = [0, 32], sizes = [2, 32], strides = [1, 1]} : vector<2x128xf32> to vector<2x32xf32>
    %56 = arith.negf %55 : vector<2x32xf32>
    %57 = math.exp %56 : vector<2x32xf32>
    %cst_24 = arith.constant 1.000000e+00 : f32
    %58 = vector.broadcast %cst_24 : f32 to vector<2x32xf32>
    %59 = arith.addf %58, %57 : vector<2x32xf32>
    %60 = arith.divf %58, %59 : vector<2x32xf32>
    %61 = vector.extract_strided_slice %23 {offsets = [0, 64], sizes = [2, 32], strides = [1, 1]} : vector<2x128xf32> to vector<2x32xf32>
    %62 = math.tanh %61 : vector<2x32xf32>
    %63 = vector.extract_strided_slice %23 {offsets = [0, 96], sizes = [2, 32], strides = [1, 1]} : vector<2x128xf32> to vector<2x32xf32>
    %64 = arith.negf %63 : vector<2x32xf32>
    %65 = math.exp %64 : vector<2x32xf32>
    %cst_25 = arith.constant 1.000000e+00 : f32
    %66 = vector.broadcast %cst_25 : f32 to vector<2x32xf32>
    %67 = arith.addf %66, %65 : vector<2x32xf32>
    %68 = arith.divf %66, %67 : vector<2x32xf32>
    %69 = arith.mulf %60, %15 : vector<2x32xf32>
    %70 = arith.mulf %54, %62 : vector<2x32xf32>
    %71 = arith.addf %69, %70 : vector<2x32xf32>
    %72 = math.tanh %71 : vector<2x32xf32>
    %73 = arith.mulf %68, %72 : vector<2x32xf32>
    %74 = arith.mulf %16, %48 : vector<2x32xf32>
    %cst_26 = arith.constant 1.000000e+00 : f32
    %75 = vector.broadcast %cst_26 : f32 to vector<2x32xf32>
    %76 = arith.subf %75, %16 : vector<2x32xf32>
    %77 = arith.mulf %76, %15 : vector<2x32xf32>
    %78 = arith.addf %74, %77 : vector<2x32xf32>
    %79 = arith.mulf %16, %46 : vector<2x32xf32>
    %cst_27 = arith.constant 1.000000e+00 : f32
    %80 = vector.broadcast %cst_27 : f32 to vector<2x32xf32>
    %81 = arith.subf %80, %16 : vector<2x32xf32>
    %82 = arith.mulf %81, %15 : vector<2x32xf32>
    %83 = arith.addf %79, %82 : vector<2x32xf32>
    %84 = arith.mulf %17, %73 : vector<2x32xf32>
    %cst_28 = arith.constant 1.000000e+00 : f32
    %85 = vector.broadcast %cst_28 : f32 to vector<2x32xf32>
    %86 = arith.subf %85, %17 : vector<2x32xf32>
    %87 = arith.mulf %86, %15 : vector<2x32xf32>
    %88 = arith.addf %84, %87 : vector<2x32xf32>
    %89 = arith.mulf %17, %71 : vector<2x32xf32>
    %cst_29 = arith.constant 1.000000e+00 : f32
    %90 = vector.broadcast %cst_29 : f32 to vector<2x32xf32>
    %91 = arith.subf %90, %17 : vector<2x32xf32>
    %92 = arith.mulf %91, %15 : vector<2x32xf32>
    %93 = arith.addf %89, %92 : vector<2x32xf32>
    %94 = arith.mulf %78, %16 : vector<2x32xf32>
    %95 = vector.shape_cast %94 : vector<2x32xf32> to vector<2x1x32xf32>
    %c0_30 = arith.constant 0 : index
    %c0_31 = arith.constant 0 : index
    %c0_32 = arith.constant 0 : index
    %c0_33 = arith.constant 0 : index
    %96 = vector.load %arg7[%c0_30, %c0_31, %c0_32, %c0_33] : memref<1x2x8x64xf32, #tpu.memory_space<vmem>>, vector<1x2x1x32xf32>
    %97 = vector.shape_cast %96 : vector<1x2x1x32xf32> to vector<2x1x32xf32>
    %98 = vector.shape_cast %95 : vector<2x1x32xf32> to vector<1x2x1x32xf32>
    tpu.vector_store %arg7[%c0_30, %c0_31, %c0_32, %c0_33], %98 {strides = array<i32>} : memref<1x2x8x64xf32, #tpu.memory_space<vmem>>, vector<1x2x1x32xf32>,
    %99 = arith.mulf %88, %17 : vector<2x32xf32>
    %100 = vector.shape_cast %99 : vector<2x32xf32> to vector<2x1x32xf32>
    %c0_34 = arith.constant 0 : index
    %c0_35 = arith.constant 0 : index
    %c7 = arith.constant 7 : index
    %c32 = arith.constant 32 : index
    %101 = vector.load %arg7[%c0_34, %c0_35, %c7, %c32] : memref<1x2x8x64xf32, #tpu.memory_space<vmem>>, vector<1x2x1x32xf32>
    %102 = vector.shape_cast %101 : vector<1x2x1x32xf32> to vector<2x1x32xf32>
    %103 = vector.shape_cast %100 : vector<2x1x32xf32> to vector<1x2x1x32xf32>
    tpu.vector_store %arg7[%c0_34, %c0_35, %c7, %c32], %103 {strides = array<i32>} : memref<1x2x8x64xf32, #tpu.memory_space<vmem>>, vector<1x2x1x32xf32>,
    %104 = vector.extract_strided_slice %3 {offsets = [2, 0], sizes = [2, 32], strides = [1, 1]} : vector<16x32xf32> to vector<2x32xf32>
    %105 = vector.extract_strided_slice %3 {offsets = [12, 0], sizes = [2, 32], strides = [1, 1]} : vector<16x32xf32> to vector<2x32xf32>
    %106 = vector.extract_strided_slice %14 {offsets = [2, 0], sizes = [2, 128], strides = [1, 1]} : vector<16x256xf32> to vector<2x128xf32>
    %cst_36 = arith.constant dense<0.000000e+00> : vector<2x128xf32>
    %107 = tpu.matmul %78, %7, %cst_36 {dimension_numbers = #tpu.dot_dimension_numbers<[1], [0], [0], [1], [0, 0, 1, 1], [], []>} : vector<2x32xf32>, vector<32x128xf32>, vector<2x128xf32> -> vector<2x128xf32>
    %108 = arith.addf %106, %107 : vector<2x128xf32>
    %109 = vector.extract_strided_slice %14 {offsets = [12, 128], sizes = [2, 128], strides = [1, 1]} : vector<16x256xf32> to vector<2x128xf32>
    %cst_37 = arith.constant dense<0.000000e+00> : vector<2x128xf32>
    %110 = tpu.matmul %88, %9, %cst_37 {dimension_numbers = #tpu.dot_dimension_numbers<[1], [0], [0], [1], [0, 0, 1, 1], [], []>} : vector<2x32xf32>, vector<32x128xf32>, vector<2x128xf32> -> vector<2x128xf32>
    %111 = arith.addf %109, %110 : vector<2x128xf32>
    %112 = vector.extract_strided_slice %108 {offsets = [0, 0], sizes = [2, 32], strides = [1, 1]} : vector<2x128xf32> to vector<2x32xf32>
    %113 = arith.negf %112 : vector<2x32xf32>
    %114 = math.exp %113 : vector<2x32xf32>
    %cst_38 = arith.constant 1.000000e+00 : f32
    %115 = vector.broadcast %cst_38 : f32 to vector<2x32xf32>
    %116 = arith.addf %115, %114 : vector<2x32xf32>
    %117 = arith.divf %115, %116 : vector<2x32xf32>
    %118 = vector.extract_strided_slice %108 {offsets = [0, 32], sizes = [2, 32], strides = [1, 1]} : vector<2x128xf32> to vector<2x32xf32>
    %119 = arith.negf %118 : vector<2x32xf32>
    %120 = math.exp %119 : vector<2x32xf32>
    %cst_39 = arith.constant 1.000000e+00 : f32
    %121 = vector.broadcast %cst_39 : f32 to vector<2x32xf32>
    %122 = arith.addf %121, %120 : vector<2x32xf32>
    %123 = arith.divf %121, %122 : vector<2x32xf32>
    %124 = vector.extract_strided_slice %108 {offsets = [0, 64], sizes = [2, 32], strides = [1, 1]} : vector<2x128xf32> to vector<2x32xf32>
    %125 = math.tanh %124 : vector<2x32xf32>
    %126 = vector.extract_strided_slice %108 {offsets = [0, 96], sizes = [2, 32], strides = [1, 1]} : vector<2x128xf32> to vector<2x32xf32>
    %127 = arith.negf %126 : vector<2x32xf32>
    %128 = math.exp %127 : vector<2x32xf32>
    %cst_40 = arith.constant 1.000000e+00 : f32
    %129 = vector.broadcast %cst_40 : f32 to vector<2x32xf32>
    %130 = arith.addf %129, %128 : vector<2x32xf32>
    %131 = arith.divf %129, %130 : vector<2x32xf32>
    %132 = arith.mulf %123, %83 : vector<2x32xf32>
    %133 = arith.mulf %117, %125 : vector<2x32xf32>
    %134 = arith.addf %132, %133 : vector<2x32xf32>
    %135 = math.tanh %134 : vector<2x32xf32>
    %136 = arith.mulf %131, %135 : vector<2x32xf32>
    %137 = vector.extract_strided_slice %111 {offsets = [0, 0], sizes = [2, 32], strides = [1, 1]} : vector<2x128xf32> to vector<2x32xf32>
    %138 = arith.negf %137 : vector<2x32xf32>
    %139 = math.exp %138 : vector<2x32xf32>
    %cst_41 = arith.constant 1.000000e+00 : f32
    %140 = vector.broadcast %cst_41 : f32 to vector<2x32xf32>
    %141 = arith.addf %140, %139 : vector<2x32xf32>
    %142 = arith.divf %140, %141 : vector<2x32xf32>
    %143 = vector.extract_strided_slice %111 {offsets = [0, 32], sizes = [2, 32], strides = [1, 1]} : vector<2x128xf32> to vector<2x32xf32>
    %144 = arith.negf %143 : vector<2x32xf32>
    %145 = math.exp %144 : vector<2x32xf32>
    %cst_42 = arith.constant 1.000000e+00 : f32
    %146 = vector.broadcast %cst_42 : f32 to vector<2x32xf32>
    %147 = arith.addf %146, %145 : vector<2x32xf32>
    %148 = arith.divf %146, %147 : vector<2x32xf32>
    %149 = vector.extract_strided_slice %111 {offsets = [0, 64], sizes = [2, 32], strides = [1, 1]} : vector<2x128xf32> to vector<2x32xf32>
    %150 = math.tanh %149 : vector<2x32xf32>
    %151 = vector.extract_strided_slice %111 {offsets = [0, 96], sizes = [2, 32], strides = [1, 1]} : vector<2x128xf32> to vector<2x32xf32>
    %152 = arith.negf %151 : vector<2x32xf32>
    %153 = math.exp %152 : vector<2x32xf32>
    %cst_43 = arith.constant 1.000000e+00 : f32
    %154 = vector.broadcast %cst_43 : f32 to vector<2x32xf32>
    %155 = arith.addf %154, %153 : vector<2x32xf32>
    %156 = arith.divf %154, %155 : vector<2x32xf32>
    %157 = arith.mulf %148, %93 : vector<2x32xf32>
    %158 = arith.mulf %142, %150 : vector<2x32xf32>
    %159 = arith.addf %157, %158 : vector<2x32xf32>
    %160 = math.tanh %159 : vector<2x32xf32>
    %161 = arith.mulf %156, %160 : vector<2x32xf32>
    %162 = arith.mulf %104, %136 : vector<2x32xf32>
    %cst_44 = arith.constant 1.000000e+00 : f32
    %163 = vector.broadcast %cst_44 : f32 to vector<2x32xf32>
    %164 = arith.subf %163, %104 : vector<2x32xf32>
    %165 = arith.mulf %164, %78 : vector<2x32xf32>
    %166 = arith.addf %162, %165 : vector<2x32xf32>
    %167 = arith.mulf %104, %134 : vector<2x32xf32>
    %cst_45 = arith.constant 1.000000e+00 : f32
    %168 = vector.broadcast %cst_45 : f32 to vector<2x32xf32>
    %169 = arith.subf %168, %104 : vector<2x32xf32>
    %170 = arith.mulf %169, %83 : vector<2x32xf32>
    %171 = arith.addf %167, %170 : vector<2x32xf32>
    %172 = arith.mulf %105, %161 : vector<2x32xf32>
    %cst_46 = arith.constant 1.000000e+00 : f32
    %173 = vector.broadcast %cst_46 : f32 to vector<2x32xf32>
    %174 = arith.subf %173, %105 : vector<2x32xf32>
    %175 = arith.mulf %174, %88 : vector<2x32xf32>
    %176 = arith.addf %172, %175 : vector<2x32xf32>
    %177 = arith.mulf %105, %159 : vector<2x32xf32>
    %cst_47 = arith.constant 1.000000e+00 : f32
    %178 = vector.broadcast %cst_47 : f32 to vector<2x32xf32>
    %179 = arith.subf %178, %105 : vector<2x32xf32>
    %180 = arith.mulf %179, %93 : vector<2x32xf32>
    %181 = arith.addf %177, %180 : vector<2x32xf32>
    %182 = arith.mulf %166, %104 : vector<2x32xf32>
    %183 = vector.shape_cast %182 : vector<2x32xf32> to vector<2x1x32xf32>
    %c0_48 = arith.constant 0 : index
    %c0_49 = arith.constant 0 : index
    %c1 = arith.constant 1 : index
    %c0_50 = arith.constant 0 : index
    %184 = vector.load %arg7[%c0_48, %c0_49, %c1, %c0_50] : memref<1x2x8x64xf32, #tpu.memory_space<vmem>>, vector<1x2x1x32xf32>
    %185 = vector.shape_cast %184 : vector<1x2x1x32xf32> to vector<2x1x32xf32>
    %186 = vector.shape_cast %183 : vector<2x1x32xf32> to vector<1x2x1x32xf32>
    tpu.vector_store %arg7[%c0_48, %c0_49, %c1, %c0_50], %186 {strides = array<i32>} : memref<1x2x8x64xf32, #tpu.memory_space<vmem>>, vector<1x2x1x32xf32>,
    %187 = arith.mulf %176, %105 : vector<2x32xf32>
    %188 = vector.shape_cast %187 : vector<2x32xf32> to vector<2x1x32xf32>
    %c0_51 = arith.constant 0 : index
    %c0_52 = arith.constant 0 : index
    %c6 = arith.constant 6 : index
    %c32_53 = arith.constant 32 : index
    %189 = vector.load %arg7[%c0_51, %c0_52, %c6, %c32_53] : memref<1x2x8x64xf32, #tpu.memory_space<vmem>>, vector<1x2x1x32xf32>
    %190 = vector.shape_cast %189 : vector<1x2x1x32xf32> to vector<2x1x32xf32>
    %191 = vector.shape_cast %188 : vector<2x1x32xf32> to vector<1x2x1x32xf32>
    tpu.vector_store %arg7[%c0_51, %c0_52, %c6, %c32_53], %191 {strides = array<i32>} : memref<1x2x8x64xf32, #tpu.memory_space<vmem>>, vector<1x2x1x32xf32>,
    %192 = vector.extract_strided_slice %3 {offsets = [4, 0], sizes = [2, 32], strides = [1, 1]} : vector<16x32xf32> to vector<2x32xf32>
    %193 = vector.extract_strided_slice %3 {offsets = [10, 0], sizes = [2, 32], strides = [1, 1]} : vector<16x32xf32> to vector<2x32xf32>
    %194 = vector.extract_strided_slice %14 {offsets = [4, 0], sizes = [2, 128], strides = [1, 1]} : vector<16x256xf32> to vector<2x128xf32>
    %cst_54 = arith.constant dense<0.000000e+00> : vector<2x128xf32>
    %195 = tpu.matmul %166, %7, %cst_54 {dimension_numbers = #tpu.dot_dimension_numbers<[1], [0], [0], [1], [0, 0, 1, 1], [], []>} : vector<2x32xf32>, vector<32x128xf32>, vector<2x128xf32> -> vector<2x128xf32>
    %196 = arith.addf %194, %195 : vector<2x128xf32>
    %197 = vector.extract_strided_slice %14 {offsets = [10, 128], sizes = [2, 128], strides = [1, 1]} : vector<16x256xf32> to vector<2x128xf32>
    %cst_55 = arith.constant dense<0.000000e+00> : vector<2x128xf32>
    %198 = tpu.matmul %176, %9, %cst_55 {dimension_numbers = #tpu.dot_dimension_numbers<[1], [0], [0], [1], [0, 0, 1, 1], [], []>} : vector<2x32xf32>, vector<32x128xf32>, vector<2x128xf32> -> vector<2x128xf32>
    %199 = arith.addf %197, %198 : vector<2x128xf32>
    %200 = vector.extract_strided_slice %196 {offsets = [0, 0], sizes = [2, 32], strides = [1, 1]} : vector<2x128xf32> to vector<2x32xf32>
    %201 = arith.negf %200 : vector<2x32xf32>
    %202 = math.exp %201 : vector<2x32xf32>
    %cst_56 = arith.constant 1.000000e+00 : f32
    %203 = vector.broadcast %cst_56 : f32 to vector<2x32xf32>
    %204 = arith.addf %203, %202 : vector<2x32xf32>
    %205 = arith.divf %203, %204 : vector<2x32xf32>
    %206 = vector.extract_strided_slice %196 {offsets = [0, 32], sizes = [2, 32], strides = [1, 1]} : vector<2x128xf32> to vector<2x32xf32>
    %207 = arith.negf %206 : vector<2x32xf32>
    %208 = math.exp %207 : vector<2x32xf32>
    %cst_57 = arith.constant 1.000000e+00 : f32
    %209 = vector.broadcast %cst_57 : f32 to vector<2x32xf32>
    %210 = arith.addf %209, %208 : vector<2x32xf32>
    %211 = arith.divf %209, %210 : vector<2x32xf32>
    %212 = vector.extract_strided_slice %196 {offsets = [0, 64], sizes = [2, 32], strides = [1, 1]} : vector<2x128xf32> to vector<2x32xf32>
    %213 = math.tanh %212 : vector<2x32xf32>
    %214 = vector.extract_strided_slice %196 {offsets = [0, 96], sizes = [2, 32], strides = [1, 1]} : vector<2x128xf32> to vector<2x32xf32>
    %215 = arith.negf %214 : vector<2x32xf32>
    %216 = math.exp %215 : vector<2x32xf32>
    %cst_58 = arith.constant 1.000000e+00 : f32
    %217 = vector.broadcast %cst_58 : f32 to vector<2x32xf32>
    %218 = arith.addf %217, %216 : vector<2x32xf32>
    %219 = arith.divf %217, %218 : vector<2x32xf32>
    %220 = arith.mulf %211, %171 : vector<2x32xf32>
    %221 = arith.mulf %205, %213 : vector<2x32xf32>
    %222 = arith.addf %220, %221 : vector<2x32xf32>
    %223 = math.tanh %222 : vector<2x32xf32>
    %224 = arith.mulf %219, %223 : vector<2x32xf32>
    %225 = vector.extract_strided_slice %199 {offsets = [0, 0], sizes = [2, 32], strides = [1, 1]} : vector<2x128xf32> to vector<2x32xf32>
    %226 = arith.negf %225 : vector<2x32xf32>
    %227 = math.exp %226 : vector<2x32xf32>
    %cst_59 = arith.constant 1.000000e+00 : f32
    %228 = vector.broadcast %cst_59 : f32 to vector<2x32xf32>
    %229 = arith.addf %228, %227 : vector<2x32xf32>
    %230 = arith.divf %228, %229 : vector<2x32xf32>
    %231 = vector.extract_strided_slice %199 {offsets = [0, 32], sizes = [2, 32], strides = [1, 1]} : vector<2x128xf32> to vector<2x32xf32>
    %232 = arith.negf %231 : vector<2x32xf32>
    %233 = math.exp %232 : vector<2x32xf32>
    %cst_60 = arith.constant 1.000000e+00 : f32
    %234 = vector.broadcast %cst_60 : f32 to vector<2x32xf32>
    %235 = arith.addf %234, %233 : vector<2x32xf32>
    %236 = arith.divf %234, %235 : vector<2x32xf32>
    %237 = vector.extract_strided_slice %199 {offsets = [0, 64], sizes = [2, 32], strides = [1, 1]} : vector<2x128xf32> to vector<2x32xf32>
    %238 = math.tanh %237 : vector<2x32xf32>
    %239 = vector.extract_strided_slice %199 {offsets = [0, 96], sizes = [2, 32], strides = [1, 1]} : vector<2x128xf32> to vector<2x32xf32>
    %240 = arith.negf %239 : vector<2x32xf32>
    %241 = math.exp %240 : vector<2x32xf32>
    %cst_61 = arith.constant 1.000000e+00 : f32
    %242 = vector.broadcast %cst_61 : f32 to vector<2x32xf32>
    %243 = arith.addf %242, %241 : vector<2x32xf32>
    %244 = arith.divf %242, %243 : vector<2x32xf32>
    %245 = arith.mulf %236, %181 : vector<2x32xf32>
    %246 = arith.mulf %230, %238 : vector<2x32xf32>
    %247 = arith.addf %245, %246 : vector<2x32xf32>
    %248 = math.tanh %247 : vector<2x32xf32>
    %249 = arith.mulf %244, %248 : vector<2x32xf32>
    %250 = arith.mulf %192, %224 : vector<2x32xf32>
    %cst_62 = arith.constant 1.000000e+00 : f32
    %251 = vector.broadcast %cst_62 : f32 to vector<2x32xf32>
    %252 = arith.subf %251, %192 : vector<2x32xf32>
    %253 = arith.mulf %252, %166 : vector<2x32xf32>
    %254 = arith.addf %250, %253 : vector<2x32xf32>
    %255 = arith.mulf %192, %222 : vector<2x32xf32>
    %cst_63 = arith.constant 1.000000e+00 : f32
    %256 = vector.broadcast %cst_63 : f32 to vector<2x32xf32>
    %257 = arith.subf %256, %192 : vector<2x32xf32>
    %258 = arith.mulf %257, %171 : vector<2x32xf32>
    %259 = arith.addf %255, %258 : vector<2x32xf32>
    %260 = arith.mulf %193, %249 : vector<2x32xf32>
    %cst_64 = arith.constant 1.000000e+00 : f32
    %261 = vector.broadcast %cst_64 : f32 to vector<2x32xf32>
    %262 = arith.subf %261, %193 : vector<2x32xf32>
    %263 = arith.mulf %262, %176 : vector<2x32xf32>
    %264 = arith.addf %260, %263 : vector<2x32xf32>
    %265 = arith.mulf %193, %247 : vector<2x32xf32>
    %cst_65 = arith.constant 1.000000e+00 : f32
    %266 = vector.broadcast %cst_65 : f32 to vector<2x32xf32>
    %267 = arith.subf %266, %193 : vector<2x32xf32>
    %268 = arith.mulf %267, %181 : vector<2x32xf32>
    %269 = arith.addf %265, %268 : vector<2x32xf32>
    %270 = arith.mulf %254, %192 : vector<2x32xf32>
    %271 = vector.shape_cast %270 : vector<2x32xf32> to vector<2x1x32xf32>
    %c0_66 = arith.constant 0 : index
    %c0_67 = arith.constant 0 : index
    %c2 = arith.constant 2 : index
    %c0_68 = arith.constant 0 : index
    %272 = vector.load %arg7[%c0_66, %c0_67, %c2, %c0_68] : memref<1x2x8x64xf32, #tpu.memory_space<vmem>>, vector<1x2x1x32xf32>
    %273 = vector.shape_cast %272 : vector<1x2x1x32xf32> to vector<2x1x32xf32>
    %274 = vector.shape_cast %271 : vector<2x1x32xf32> to vector<1x2x1x32xf32>
    tpu.vector_store %arg7[%c0_66, %c0_67, %c2, %c0_68], %274 {strides = array<i32>} : memref<1x2x8x64xf32, #tpu.memory_space<vmem>>, vector<1x2x1x32xf32>,
    %275 = arith.mulf %264, %193 : vector<2x32xf32>
    %276 = vector.shape_cast %275 : vector<2x32xf32> to vector<2x1x32xf32>
    %c0_69 = arith.constant 0 : index
    %c0_70 = arith.constant 0 : index
    %c5 = arith.constant 5 : index
    %c32_71 = arith.constant 32 : index
    %277 = vector.load %arg7[%c0_69, %c0_70, %c5, %c32_71] : memref<1x2x8x64xf32, #tpu.memory_space<vmem>>, vector<1x2x1x32xf32>
    %278 = vector.shape_cast %277 : vector<1x2x1x32xf32> to vector<2x1x32xf32>
    %279 = vector.shape_cast %276 : vector<2x1x32xf32> to vector<1x2x1x32xf32>
    tpu.vector_store %arg7[%c0_69, %c0_70, %c5, %c32_71], %279 {strides = array<i32>} : memref<1x2x8x64xf32, #tpu.memory_space<vmem>>, vector<1x2x1x32xf32>,
    %280 = vector.extract_strided_slice %3 {offsets = [6, 0], sizes = [2, 32], strides = [1, 1]} : vector<16x32xf32> to vector<2x32xf32>
    %281 = vector.extract_strided_slice %3 {offsets = [8, 0], sizes = [2, 32], strides = [1, 1]} : vector<16x32xf32> to vector<2x32xf32>
    %282 = vector.extract_strided_slice %14 {offsets = [6, 0], sizes = [2, 128], strides = [1, 1]} : vector<16x256xf32> to vector<2x128xf32>
    %cst_72 = arith.constant dense<0.000000e+00> : vector<2x128xf32>
    %283 = tpu.matmul %254, %7, %cst_72 {dimension_numbers = #tpu.dot_dimension_numbers<[1], [0], [0], [1], [0, 0, 1, 1], [], []>} : vector<2x32xf32>, vector<32x128xf32>, vector<2x128xf32> -> vector<2x128xf32>
    %284 = arith.addf %282, %283 : vector<2x128xf32>
    %285 = vector.extract_strided_slice %14 {offsets = [8, 128], sizes = [2, 128], strides = [1, 1]} : vector<16x256xf32> to vector<2x128xf32>
    %cst_73 = arith.constant dense<0.000000e+00> : vector<2x128xf32>
    %286 = tpu.matmul %264, %9, %cst_73 {dimension_numbers = #tpu.dot_dimension_numbers<[1], [0], [0], [1], [0, 0, 1, 1], [], []>} : vector<2x32xf32>, vector<32x128xf32>, vector<2x128xf32> -> vector<2x128xf32>
    %287 = arith.addf %285, %286 : vector<2x128xf32>
    %288 = vector.extract_strided_slice %284 {offsets = [0, 0], sizes = [2, 32], strides = [1, 1]} : vector<2x128xf32> to vector<2x32xf32>
    %289 = arith.negf %288 : vector<2x32xf32>
    %290 = math.exp %289 : vector<2x32xf32>
    %cst_74 = arith.constant 1.000000e+00 : f32
    %291 = vector.broadcast %cst_74 : f32 to vector<2x32xf32>
    %292 = arith.addf %291, %290 : vector<2x32xf32>
    %293 = arith.divf %291, %292 : vector<2x32xf32>
    %294 = vector.extract_strided_slice %284 {offsets = [0, 32], sizes = [2, 32], strides = [1, 1]} : vector<2x128xf32> to vector<2x32xf32>
    %295 = arith.negf %294 : vector<2x32xf32>
    %296 = math.exp %295 : vector<2x32xf32>
    %cst_75 = arith.constant 1.000000e+00 : f32
    %297 = vector.broadcast %cst_75 : f32 to vector<2x32xf32>
    %298 = arith.addf %297, %296 : vector<2x32xf32>
    %299 = arith.divf %297, %298 : vector<2x32xf32>
    %300 = vector.extract_strided_slice %284 {offsets = [0, 64], sizes = [2, 32], strides = [1, 1]} : vector<2x128xf32> to vector<2x32xf32>
    %301 = math.tanh %300 : vector<2x32xf32>
    %302 = vector.extract_strided_slice %284 {offsets = [0, 96], sizes = [2, 32], strides = [1, 1]} : vector<2x128xf32> to vector<2x32xf32>
    %303 = arith.negf %302 : vector<2x32xf32>
    %304 = math.exp %303 : vector<2x32xf32>
    %cst_76 = arith.constant 1.000000e+00 : f32
    %305 = vector.broadcast %cst_76 : f32 to vector<2x32xf32>
    %306 = arith.addf %305, %304 : vector<2x32xf32>
    %307 = arith.divf %305, %306 : vector<2x32xf32>
    %308 = arith.mulf %299, %259 : vector<2x32xf32>
    %309 = arith.mulf %293, %301 : vector<2x32xf32>
    %310 = arith.addf %308, %309 : vector<2x32xf32>
    %311 = math.tanh %310 : vector<2x32xf32>
    %312 = arith.mulf %307, %311 : vector<2x32xf32>
    %313 = vector.extract_strided_slice %287 {offsets = [0, 0], sizes = [2, 32], strides = [1, 1]} : vector<2x128xf32> to vector<2x32xf32>
    %314 = arith.negf %313 : vector<2x32xf32>
    %315 = math.exp %314 : vector<2x32xf32>
    %cst_77 = arith.constant 1.000000e+00 : f32
    %316 = vector.broadcast %cst_77 : f32 to vector<2x32xf32>
    %317 = arith.addf %316, %315 : vector<2x32xf32>
    %318 = arith.divf %316, %317 : vector<2x32xf32>
    %319 = vector.extract_strided_slice %287 {offsets = [0, 32], sizes = [2, 32], strides = [1, 1]} : vector<2x128xf32> to vector<2x32xf32>
    %320 = arith.negf %319 : vector<2x32xf32>
    %321 = math.exp %320 : vector<2x32xf32>
    %cst_78 = arith.constant 1.000000e+00 : f32
    %322 = vector.broadcast %cst_78 : f32 to vector<2x32xf32>
    %323 = arith.addf %322, %321 : vector<2x32xf32>
    %324 = arith.divf %322, %323 : vector<2x32xf32>
    %325 = vector.extract_strided_slice %287 {offsets = [0, 64], sizes = [2, 32], strides = [1, 1]} : vector<2x128xf32> to vector<2x32xf32>
    %326 = math.tanh %325 : vector<2x32xf32>
    %327 = vector.extract_strided_slice %287 {offsets = [0, 96], sizes = [2, 32], strides = [1, 1]} : vector<2x128xf32> to vector<2x32xf32>
    %328 = arith.negf %327 : vector<2x32xf32>
    %329 = math.exp %328 : vector<2x32xf32>
    %cst_79 = arith.constant 1.000000e+00 : f32
    %330 = vector.broadcast %cst_79 : f32 to vector<2x32xf32>
    %331 = arith.addf %330, %329 : vector<2x32xf32>
    %332 = arith.divf %330, %331 : vector<2x32xf32>
    %333 = arith.mulf %324, %269 : vector<2x32xf32>
    %334 = arith.mulf %318, %326 : vector<2x32xf32>
    %335 = arith.addf %333, %334 : vector<2x32xf32>
    %336 = math.tanh %335 : vector<2x32xf32>
    %337 = arith.mulf %332, %336 : vector<2x32xf32>
    %338 = arith.mulf %280, %312 : vector<2x32xf32>
    %cst_80 = arith.constant 1.000000e+00 : f32
    %339 = vector.broadcast %cst_80 : f32 to vector<2x32xf32>
    %340 = arith.subf %339, %280 : vector<2x32xf32>
    %341 = arith.mulf %340, %254 : vector<2x32xf32>
    %342 = arith.addf %338, %341 : vector<2x32xf32>
    %343 = arith.mulf %280, %310 : vector<2x32xf32>
    %cst_81 = arith.constant 1.000000e+00 : f32
    %344 = vector.broadcast %cst_81 : f32 to vector<2x32xf32>
    %345 = arith.subf %344, %280 : vector<2x32xf32>
    %346 = arith.mulf %345, %259 : vector<2x32xf32>
    %347 = arith.addf %343, %346 : vector<2x32xf32>
    %348 = arith.mulf %281, %337 : vector<2x32xf32>
    %cst_82 = arith.constant 1.000000e+00 : f32
    %349 = vector.broadcast %cst_82 : f32 to vector<2x32xf32>
    %350 = arith.subf %349, %281 : vector<2x32xf32>
    %351 = arith.mulf %350, %264 : vector<2x32xf32>
    %352 = arith.addf %348, %351 : vector<2x32xf32>
    %353 = arith.mulf %281, %335 : vector<2x32xf32>
    %cst_83 = arith.constant 1.000000e+00 : f32
    %354 = vector.broadcast %cst_83 : f32 to vector<2x32xf32>
    %355 = arith.subf %354, %281 : vector<2x32xf32>
    %356 = arith.mulf %355, %269 : vector<2x32xf32>
    %357 = arith.addf %353, %356 : vector<2x32xf32>
    %358 = arith.mulf %342, %280 : vector<2x32xf32>
    %359 = vector.shape_cast %358 : vector<2x32xf32> to vector<2x1x32xf32>
    %c0_84 = arith.constant 0 : index
    %c0_85 = arith.constant 0 : index
    %c3 = arith.constant 3 : index
    %c0_86 = arith.constant 0 : index
    %360 = vector.load %arg7[%c0_84, %c0_85, %c3, %c0_86] : memref<1x2x8x64xf32, #tpu.memory_space<vmem>>, vector<1x2x1x32xf32>
    %361 = vector.shape_cast %360 : vector<1x2x1x32xf32> to vector<2x1x32xf32>
    %362 = vector.shape_cast %359 : vector<2x1x32xf32> to vector<1x2x1x32xf32>
    tpu.vector_store %arg7[%c0_84, %c0_85, %c3, %c0_86], %362 {strides = array<i32>} : memref<1x2x8x64xf32, #tpu.memory_space<vmem>>, vector<1x2x1x32xf32>,
    %363 = arith.mulf %352, %281 : vector<2x32xf32>
    %364 = vector.shape_cast %363 : vector<2x32xf32> to vector<2x1x32xf32>
    %c0_87 = arith.constant 0 : index
    %c0_88 = arith.constant 0 : index
    %c4 = arith.constant 4 : index
    %c32_89 = arith.constant 32 : index
    %365 = vector.load %arg7[%c0_87, %c0_88, %c4, %c32_89] : memref<1x2x8x64xf32, #tpu.memory_space<vmem>>, vector<1x2x1x32xf32>
    %366 = vector.shape_cast %365 : vector<1x2x1x32xf32> to vector<2x1x32xf32>
    %367 = vector.shape_cast %364 : vector<2x1x32xf32> to vector<1x2x1x32xf32>
    tpu.vector_store %arg7[%c0_87, %c0_88, %c4, %c32_89], %367 {strides = array<i32>} : memref<1x2x8x64xf32, #tpu.memory_space<vmem>>, vector<1x2x1x32xf32>,
    %368 = vector.extract_strided_slice %3 {offsets = [8, 0], sizes = [2, 32], strides = [1, 1]} : vector<16x32xf32> to vector<2x32xf32>
    %369 = vector.extract_strided_slice %3 {offsets = [6, 0], sizes = [2, 32], strides = [1, 1]} : vector<16x32xf32> to vector<2x32xf32>
    %370 = vector.extract_strided_slice %14 {offsets = [8, 0], sizes = [2, 128], strides = [1, 1]} : vector<16x256xf32> to vector<2x128xf32>
    %cst_90 = arith.constant dense<0.000000e+00> : vector<2x128xf32>
    %371 = tpu.matmul %342, %7, %cst_90 {dimension_numbers = #tpu.dot_dimension_numbers<[1], [0], [0], [1], [0, 0, 1, 1], [], []>} : vector<2x32xf32>, vector<32x128xf32>, vector<2x128xf32> -> vector<2x128xf32>
    %372 = arith.addf %370, %371 : vector<2x128xf32>
    %373 = vector.extract_strided_slice %14 {offsets = [6, 128], sizes = [2, 128], strides = [1, 1]} : vector<16x256xf32> to vector<2x128xf32>
    %cst_91 = arith.constant dense<0.000000e+00> : vector<2x128xf32>
    %374 = tpu.matmul %352, %9, %cst_91 {dimension_numbers = #tpu.dot_dimension_numbers<[1], [0], [0], [1], [0, 0, 1, 1], [], []>} : vector<2x32xf32>, vector<32x128xf32>, vector<2x128xf32> -> vector<2x128xf32>
    %375 = arith.addf %373, %374 : vector<2x128xf32>
    %376 = vector.extract_strided_slice %372 {offsets = [0, 0], sizes = [2, 32], strides = [1, 1]} : vector<2x128xf32> to vector<2x32xf32>
    %377 = arith.negf %376 : vector<2x32xf32>
    %378 = math.exp %377 : vector<2x32xf32>
    %cst_92 = arith.constant 1.000000e+00 : f32
    %379 = vector.broadcast %cst_92 : f32 to vector<2x32xf32>
    %380 = arith.addf %379, %378 : vector<2x32xf32>
    %381 = arith.divf %379, %380 : vector<2x32xf32>
    %382 = vector.extract_strided_slice %372 {offsets = [0, 32], sizes = [2, 32], strides = [1, 1]} : vector<2x128xf32> to vector<2x32xf32>
    %383 = arith.negf %382 : vector<2x32xf32>
    %384 = math.exp %383 : vector<2x32xf32>
    %cst_93 = arith.constant 1.000000e+00 : f32
    %385 = vector.broadcast %cst_93 : f32 to vector<2x32xf32>
    %386 = arith.addf %385, %384 : vector<2x32xf32>
    %387 = arith.divf %385, %386 : vector<2x32xf32>
    %388 = vector.extract_strided_slice %372 {offsets = [0, 64], sizes = [2, 32], strides = [1, 1]} : vector<2x128xf32> to vector<2x32xf32>
    %389 = math.tanh %388 : vector<2x32xf32>
    %390 = vector.extract_strided_slice %372 {offsets = [0, 96], sizes = [2, 32], strides = [1, 1]} : vector<2x128xf32> to vector<2x32xf32>
    %391 = arith.negf %390 : vector<2x32xf32>
    %392 = math.exp %391 : vector<2x32xf32>
    %cst_94 = arith.constant 1.000000e+00 : f32
    %393 = vector.broadcast %cst_94 : f32 to vector<2x32xf32>
    %394 = arith.addf %393, %392 : vector<2x32xf32>
    %395 = arith.divf %393, %394 : vector<2x32xf32>
    %396 = arith.mulf %387, %347 : vector<2x32xf32>
    %397 = arith.mulf %381, %389 : vector<2x32xf32>
    %398 = arith.addf %396, %397 : vector<2x32xf32>
    %399 = math.tanh %398 : vector<2x32xf32>
    %400 = arith.mulf %395, %399 : vector<2x32xf32>
    %401 = vector.extract_strided_slice %375 {offsets = [0, 0], sizes = [2, 32], strides = [1, 1]} : vector<2x128xf32> to vector<2x32xf32>
    %402 = arith.negf %401 : vector<2x32xf32>
    %403 = math.exp %402 : vector<2x32xf32>
    %cst_95 = arith.constant 1.000000e+00 : f32
    %404 = vector.broadcast %cst_95 : f32 to vector<2x32xf32>
    %405 = arith.addf %404, %403 : vector<2x32xf32>
    %406 = arith.divf %404, %405 : vector<2x32xf32>
    %407 = vector.extract_strided_slice %375 {offsets = [0, 32], sizes = [2, 32], strides = [1, 1]} : vector<2x128xf32> to vector<2x32xf32>
    %408 = arith.negf %407 : vector<2x32xf32>
    %409 = math.exp %408 : vector<2x32xf32>
    %cst_96 = arith.constant 1.000000e+00 : f32
    %410 = vector.broadcast %cst_96 : f32 to vector<2x32xf32>
    %411 = arith.addf %410, %409 : vector<2x32xf32>
    %412 = arith.divf %410, %411 : vector<2x32xf32>
    %413 = vector.extract_strided_slice %375 {offsets = [0, 64], sizes = [2, 32], strides = [1, 1]} : vector<2x128xf32> to vector<2x32xf32>
    %414 = math.tanh %413 : vector<2x32xf32>
    %415 = vector.extract_strided_slice %375 {offsets = [0, 96], sizes = [2, 32], strides = [1, 1]} : vector<2x128xf32> to vector<2x32xf32>
    %416 = arith.negf %415 : vector<2x32xf32>
    %417 = math.exp %416 : vector<2x32xf32>
    %cst_97 = arith.constant 1.000000e+00 : f32
    %418 = vector.broadcast %cst_97 : f32 to vector<2x32xf32>
    %419 = arith.addf %418, %417 : vector<2x32xf32>
    %420 = arith.divf %418, %419 : vector<2x32xf32>
    %421 = arith.mulf %412, %357 : vector<2x32xf32>
    %422 = arith.mulf %406, %414 : vector<2x32xf32>
    %423 = arith.addf %421, %422 : vector<2x32xf32>
    %424 = math.tanh %423 : vector<2x32xf32>
    %425 = arith.mulf %420, %424 : vector<2x32xf32>
    %426 = arith.mulf %368, %400 : vector<2x32xf32>
    %cst_98 = arith.constant 1.000000e+00 : f32
    %427 = vector.broadcast %cst_98 : f32 to vector<2x32xf32>
    %428 = arith.subf %427, %368 : vector<2x32xf32>
    %429 = arith.mulf %428, %342 : vector<2x32xf32>
    %430 = arith.addf %426, %429 : vector<2x32xf32>
    %431 = arith.mulf %368, %398 : vector<2x32xf32>
    %cst_99 = arith.constant 1.000000e+00 : f32
    %432 = vector.broadcast %cst_99 : f32 to vector<2x32xf32>
    %433 = arith.subf %432, %368 : vector<2x32xf32>
    %434 = arith.mulf %433, %347 : vector<2x32xf32>
    %435 = arith.addf %431, %434 : vector<2x32xf32>
    %436 = arith.mulf %369, %425 : vector<2x32xf32>
    %cst_100 = arith.constant 1.000000e+00 : f32
    %437 = vector.broadcast %cst_100 : f32 to vector<2x32xf32>
    %438 = arith.subf %437, %369 : vector<2x32xf32>
    %439 = arith.mulf %438, %352 : vector<2x32xf32>
    %440 = arith.addf %436, %439 : vector<2x32xf32>
    %441 = arith.mulf %369, %423 : vector<2x32xf32>
    %cst_101 = arith.constant 1.000000e+00 : f32
    %442 = vector.broadcast %cst_101 : f32 to vector<2x32xf32>
    %443 = arith.subf %442, %369 : vector<2x32xf32>
    %444 = arith.mulf %443, %357 : vector<2x32xf32>
    %445 = arith.addf %441, %444 : vector<2x32xf32>
    %446 = arith.mulf %430, %368 : vector<2x32xf32>
    %447 = vector.shape_cast %446 : vector<2x32xf32> to vector<2x1x32xf32>
    %c0_102 = arith.constant 0 : index
    %c0_103 = arith.constant 0 : index
    %c4_104 = arith.constant 4 : index
    %c0_105 = arith.constant 0 : index
    %448 = vector.load %arg7[%c0_102, %c0_103, %c4_104, %c0_105] : memref<1x2x8x64xf32, #tpu.memory_space<vmem>>, vector<1x2x1x32xf32>
    %449 = vector.shape_cast %448 : vector<1x2x1x32xf32> to vector<2x1x32xf32>
    %450 = vector.shape_cast %447 : vector<2x1x32xf32> to vector<1x2x1x32xf32>
    tpu.vector_store %arg7[%c0_102, %c0_103, %c4_104, %c0_105], %450 {strides = array<i32>} : memref<1x2x8x64xf32, #tpu.memory_space<vmem>>, vector<1x2x1x32xf32>,
    %451 = arith.mulf %440, %369 : vector<2x32xf32>
    %452 = vector.shape_cast %451 : vector<2x32xf32> to vector<2x1x32xf32>
    %c0_106 = arith.constant 0 : index
    %c0_107 = arith.constant 0 : index
    %c3_108 = arith.constant 3 : index
    %c32_109 = arith.constant 32 : index
    %453 = vector.load %arg7[%c0_106, %c0_107, %c3_108, %c32_109] : memref<1x2x8x64xf32, #tpu.memory_space<vmem>>, vector<1x2x1x32xf32>
    %454 = vector.shape_cast %453 : vector<1x2x1x32xf32> to vector<2x1x32xf32>
    %455 = vector.shape_cast %452 : vector<2x1x32xf32> to vector<1x2x1x32xf32>
    tpu.vector_store %arg7[%c0_106, %c0_107, %c3_108, %c32_109], %455 {strides = array<i32>} : memref<1x2x8x64xf32, #tpu.memory_space<vmem>>, vector<1x2x1x32xf32>,
    %456 = vector.extract_strided_slice %3 {offsets = [10, 0], sizes = [2, 32], strides = [1, 1]} : vector<16x32xf32> to vector<2x32xf32>
    %457 = vector.extract_strided_slice %3 {offsets = [4, 0], sizes = [2, 32], strides = [1, 1]} : vector<16x32xf32> to vector<2x32xf32>
    %458 = vector.extract_strided_slice %14 {offsets = [10, 0], sizes = [2, 128], strides = [1, 1]} : vector<16x256xf32> to vector<2x128xf32>
    %cst_110 = arith.constant dense<0.000000e+00> : vector<2x128xf32>
    %459 = tpu.matmul %430, %7, %cst_110 {dimension_numbers = #tpu.dot_dimension_numbers<[1], [0], [0], [1], [0, 0, 1, 1], [], []>} : vector<2x32xf32>, vector<32x128xf32>, vector<2x128xf32> -> vector<2x128xf32>
    %460 = arith.addf %458, %459 : vector<2x128xf32>
    %461 = vector.extract_strided_slice %14 {offsets = [4, 128], sizes = [2, 128], strides = [1, 1]} : vector<16x256xf32> to vector<2x128xf32>
    %cst_111 = arith.constant dense<0.000000e+00> : vector<2x128xf32>
    %462 = tpu.matmul %440, %9, %cst_111 {dimension_numbers = #tpu.dot_dimension_numbers<[1], [0], [0], [1], [0, 0, 1, 1], [], []>} : vector<2x32xf32>, vector<32x128xf32>, vector<2x128xf32> -> vector<2x128xf32>
    %463 = arith.addf %461, %462 : vector<2x128xf32>
    %464 = vector.extract_strided_slice %460 {offsets = [0, 0], sizes = [2, 32], strides = [1, 1]} : vector<2x128xf32> to vector<2x32xf32>
    %465 = arith.negf %464 : vector<2x32xf32>
    %466 = math.exp %465 : vector<2x32xf32>
    %cst_112 = arith.constant 1.000000e+00 : f32
    %467 = vector.broadcast %cst_112 : f32 to vector<2x32xf32>
    %468 = arith.addf %467, %466 : vector<2x32xf32>
    %469 = arith.divf %467, %468 : vector<2x32xf32>
    %470 = vector.extract_strided_slice %460 {offsets = [0, 32], sizes = [2, 32], strides = [1, 1]} : vector<2x128xf32> to vector<2x32xf32>
    %471 = arith.negf %470 : vector<2x32xf32>
    %472 = math.exp %471 : vector<2x32xf32>
    %cst_113 = arith.constant 1.000000e+00 : f32
    %473 = vector.broadcast %cst_113 : f32 to vector<2x32xf32>
    %474 = arith.addf %473, %472 : vector<2x32xf32>
    %475 = arith.divf %473, %474 : vector<2x32xf32>
    %476 = vector.extract_strided_slice %460 {offsets = [0, 64], sizes = [2, 32], strides = [1, 1]} : vector<2x128xf32> to vector<2x32xf32>
    %477 = math.tanh %476 : vector<2x32xf32>
    %478 = vector.extract_strided_slice %460 {offsets = [0, 96], sizes = [2, 32], strides = [1, 1]} : vector<2x128xf32> to vector<2x32xf32>
    %479 = arith.negf %478 : vector<2x32xf32>
    %480 = math.exp %479 : vector<2x32xf32>
    %cst_114 = arith.constant 1.000000e+00 : f32
    %481 = vector.broadcast %cst_114 : f32 to vector<2x32xf32>
    %482 = arith.addf %481, %480 : vector<2x32xf32>
    %483 = arith.divf %481, %482 : vector<2x32xf32>
    %484 = arith.mulf %475, %435 : vector<2x32xf32>
    %485 = arith.mulf %469, %477 : vector<2x32xf32>
    %486 = arith.addf %484, %485 : vector<2x32xf32>
    %487 = math.tanh %486 : vector<2x32xf32>
    %488 = arith.mulf %483, %487 : vector<2x32xf32>
    %489 = vector.extract_strided_slice %463 {offsets = [0, 0], sizes = [2, 32], strides = [1, 1]} : vector<2x128xf32> to vector<2x32xf32>
    %490 = arith.negf %489 : vector<2x32xf32>
    %491 = math.exp %490 : vector<2x32xf32>
    %cst_115 = arith.constant 1.000000e+00 : f32
    %492 = vector.broadcast %cst_115 : f32 to vector<2x32xf32>
    %493 = arith.addf %492, %491 : vector<2x32xf32>
    %494 = arith.divf %492, %493 : vector<2x32xf32>
    %495 = vector.extract_strided_slice %463 {offsets = [0, 32], sizes = [2, 32], strides = [1, 1]} : vector<2x128xf32> to vector<2x32xf32>
    %496 = arith.negf %495 : vector<2x32xf32>
    %497 = math.exp %496 : vector<2x32xf32>
    %cst_116 = arith.constant 1.000000e+00 : f32
    %498 = vector.broadcast %cst_116 : f32 to vector<2x32xf32>
    %499 = arith.addf %498, %497 : vector<2x32xf32>
    %500 = arith.divf %498, %499 : vector<2x32xf32>
    %501 = vector.extract_strided_slice %463 {offsets = [0, 64], sizes = [2, 32], strides = [1, 1]} : vector<2x128xf32> to vector<2x32xf32>
    %502 = math.tanh %501 : vector<2x32xf32>
    %503 = vector.extract_strided_slice %463 {offsets = [0, 96], sizes = [2, 32], strides = [1, 1]} : vector<2x128xf32> to vector<2x32xf32>
    %504 = arith.negf %503 : vector<2x32xf32>
    %505 = math.exp %504 : vector<2x32xf32>
    %cst_117 = arith.constant 1.000000e+00 : f32
    %506 = vector.broadcast %cst_117 : f32 to vector<2x32xf32>
    %507 = arith.addf %506, %505 : vector<2x32xf32>
    %508 = arith.divf %506, %507 : vector<2x32xf32>
    %509 = arith.mulf %500, %445 : vector<2x32xf32>
    %510 = arith.mulf %494, %502 : vector<2x32xf32>
    %511 = arith.addf %509, %510 : vector<2x32xf32>
    %512 = math.tanh %511 : vector<2x32xf32>
    %513 = arith.mulf %508, %512 : vector<2x32xf32>
    %514 = arith.mulf %456, %488 : vector<2x32xf32>
    %cst_118 = arith.constant 1.000000e+00 : f32
    %515 = vector.broadcast %cst_118 : f32 to vector<2x32xf32>
    %516 = arith.subf %515, %456 : vector<2x32xf32>
    %517 = arith.mulf %516, %430 : vector<2x32xf32>
    %518 = arith.addf %514, %517 : vector<2x32xf32>
    %519 = arith.mulf %456, %486 : vector<2x32xf32>
    %cst_119 = arith.constant 1.000000e+00 : f32
    %520 = vector.broadcast %cst_119 : f32 to vector<2x32xf32>
    %521 = arith.subf %520, %456 : vector<2x32xf32>
    %522 = arith.mulf %521, %435 : vector<2x32xf32>
    %523 = arith.addf %519, %522 : vector<2x32xf32>
    %524 = arith.mulf %457, %513 : vector<2x32xf32>
    %cst_120 = arith.constant 1.000000e+00 : f32
    %525 = vector.broadcast %cst_120 : f32 to vector<2x32xf32>
    %526 = arith.subf %525, %457 : vector<2x32xf32>
    %527 = arith.mulf %526, %440 : vector<2x32xf32>
    %528 = arith.addf %524, %527 : vector<2x32xf32>
    %529 = arith.mulf %457, %511 : vector<2x32xf32>
    %cst_121 = arith.constant 1.000000e+00 : f32
    %530 = vector.broadcast %cst_121 : f32 to vector<2x32xf32>
    %531 = arith.subf %530, %457 : vector<2x32xf32>
    %532 = arith.mulf %531, %445 : vector<2x32xf32>
    %533 = arith.addf %529, %532 : vector<2x32xf32>
    %534 = arith.mulf %518, %456 : vector<2x32xf32>
    %535 = vector.shape_cast %534 : vector<2x32xf32> to vector<2x1x32xf32>
    %c0_122 = arith.constant 0 : index
    %c0_123 = arith.constant 0 : index
    %c5_124 = arith.constant 5 : index
    %c0_125 = arith.constant 0 : index
    %536 = vector.load %arg7[%c0_122, %c0_123, %c5_124, %c0_125] : memref<1x2x8x64xf32, #tpu.memory_space<vmem>>, vector<1x2x1x32xf32>
    %537 = vector.shape_cast %536 : vector<1x2x1x32xf32> to vector<2x1x32xf32>
    %538 = vector.shape_cast %535 : vector<2x1x32xf32> to vector<1x2x1x32xf32>
    tpu.vector_store %arg7[%c0_122, %c0_123, %c5_124, %c0_125], %538 {strides = array<i32>} : memref<1x2x8x64xf32, #tpu.memory_space<vmem>>, vector<1x2x1x32xf32>,
    %539 = arith.mulf %528, %457 : vector<2x32xf32>
    %540 = vector.shape_cast %539 : vector<2x32xf32> to vector<2x1x32xf32>
    %c0_126 = arith.constant 0 : index
    %c0_127 = arith.constant 0 : index
    %c2_128 = arith.constant 2 : index
    %c32_129 = arith.constant 32 : index
    %541 = vector.load %arg7[%c0_126, %c0_127, %c2_128, %c32_129] : memref<1x2x8x64xf32, #tpu.memory_space<vmem>>, vector<1x2x1x32xf32>
    %542 = vector.shape_cast %541 : vector<1x2x1x32xf32> to vector<2x1x32xf32>
    %543 = vector.shape_cast %540 : vector<2x1x32xf32> to vector<1x2x1x32xf32>
    tpu.vector_store %arg7[%c0_126, %c0_127, %c2_128, %c32_129], %543 {strides = array<i32>} : memref<1x2x8x64xf32, #tpu.memory_space<vmem>>, vector<1x2x1x32xf32>,
    %544 = vector.extract_strided_slice %3 {offsets = [12, 0], sizes = [2, 32], strides = [1, 1]} : vector<16x32xf32> to vector<2x32xf32>
    %545 = vector.extract_strided_slice %3 {offsets = [2, 0], sizes = [2, 32], strides = [1, 1]} : vector<16x32xf32> to vector<2x32xf32>
    %546 = vector.extract_strided_slice %14 {offsets = [12, 0], sizes = [2, 128], strides = [1, 1]} : vector<16x256xf32> to vector<2x128xf32>
    %cst_130 = arith.constant dense<0.000000e+00> : vector<2x128xf32>
    %547 = tpu.matmul %518, %7, %cst_130 {dimension_numbers = #tpu.dot_dimension_numbers<[1], [0], [0], [1], [0, 0, 1, 1], [], []>} : vector<2x32xf32>, vector<32x128xf32>, vector<2x128xf32> -> vector<2x128xf32>
    %548 = arith.addf %546, %547 : vector<2x128xf32>
    %549 = vector.extract_strided_slice %14 {offsets = [2, 128], sizes = [2, 128], strides = [1, 1]} : vector<16x256xf32> to vector<2x128xf32>
    %cst_131 = arith.constant dense<0.000000e+00> : vector<2x128xf32>
    %550 = tpu.matmul %528, %9, %cst_131 {dimension_numbers = #tpu.dot_dimension_numbers<[1], [0], [0], [1], [0, 0, 1, 1], [], []>} : vector<2x32xf32>, vector<32x128xf32>, vector<2x128xf32> -> vector<2x128xf32>
    %551 = arith.addf %549, %550 : vector<2x128xf32>
    %552 = vector.extract_strided_slice %548 {offsets = [0, 0], sizes = [2, 32], strides = [1, 1]} : vector<2x128xf32> to vector<2x32xf32>
    %553 = arith.negf %552 : vector<2x32xf32>
    %554 = math.exp %553 : vector<2x32xf32>
    %cst_132 = arith.constant 1.000000e+00 : f32
    %555 = vector.broadcast %cst_132 : f32 to vector<2x32xf32>
    %556 = arith.addf %555, %554 : vector<2x32xf32>
    %557 = arith.divf %555, %556 : vector<2x32xf32>
    %558 = vector.extract_strided_slice %548 {offsets = [0, 32], sizes = [2, 32], strides = [1, 1]} : vector<2x128xf32> to vector<2x32xf32>
    %559 = arith.negf %558 : vector<2x32xf32>
    %560 = math.exp %559 : vector<2x32xf32>
    %cst_133 = arith.constant 1.000000e+00 : f32
    %561 = vector.broadcast %cst_133 : f32 to vector<2x32xf32>
    %562 = arith.addf %561, %560 : vector<2x32xf32>
    %563 = arith.divf %561, %562 : vector<2x32xf32>
    %564 = vector.extract_strided_slice %548 {offsets = [0, 64], sizes = [2, 32], strides = [1, 1]} : vector<2x128xf32> to vector<2x32xf32>
    %565 = math.tanh %564 : vector<2x32xf32>
    %566 = vector.extract_strided_slice %548 {offsets = [0, 96], sizes = [2, 32], strides = [1, 1]} : vector<2x128xf32> to vector<2x32xf32>
    %567 = arith.negf %566 : vector<2x32xf32>
    %568 = math.exp %567 : vector<2x32xf32>
    %cst_134 = arith.constant 1.000000e+00 : f32
    %569 = vector.broadcast %cst_134 : f32 to vector<2x32xf32>
    %570 = arith.addf %569, %568 : vector<2x32xf32>
    %571 = arith.divf %569, %570 : vector<2x32xf32>
    %572 = arith.mulf %563, %523 : vector<2x32xf32>
    %573 = arith.mulf %557, %565 : vector<2x32xf32>
    %574 = arith.addf %572, %573 : vector<2x32xf32>
    %575 = math.tanh %574 : vector<2x32xf32>
    %576 = arith.mulf %571, %575 : vector<2x32xf32>
    %577 = vector.extract_strided_slice %551 {offsets = [0, 0], sizes = [2, 32], strides = [1, 1]} : vector<2x128xf32> to vector<2x32xf32>
    %578 = arith.negf %577 : vector<2x32xf32>
    %579 = math.exp %578 : vector<2x32xf32>
    %cst_135 = arith.constant 1.000000e+00 : f32
    %580 = vector.broadcast %cst_135 : f32 to vector<2x32xf32>
    %581 = arith.addf %580, %579 : vector<2x32xf32>
    %582 = arith.divf %580, %581 : vector<2x32xf32>
    %583 = vector.extract_strided_slice %551 {offsets = [0, 32], sizes = [2, 32], strides = [1, 1]} : vector<2x128xf32> to vector<2x32xf32>
    %584 = arith.negf %583 : vector<2x32xf32>
    %585 = math.exp %584 : vector<2x32xf32>
    %cst_136 = arith.constant 1.000000e+00 : f32
    %586 = vector.broadcast %cst_136 : f32 to vector<2x32xf32>
    %587 = arith.addf %586, %585 : vector<2x32xf32>
    %588 = arith.divf %586, %587 : vector<2x32xf32>
    %589 = vector.extract_strided_slice %551 {offsets = [0, 64], sizes = [2, 32], strides = [1, 1]} : vector<2x128xf32> to vector<2x32xf32>
    %590 = math.tanh %589 : vector<2x32xf32>
    %591 = vector.extract_strided_slice %551 {offsets = [0, 96], sizes = [2, 32], strides = [1, 1]} : vector<2x128xf32> to vector<2x32xf32>
    %592 = arith.negf %591 : vector<2x32xf32>
    %593 = math.exp %592 : vector<2x32xf32>
    %cst_137 = arith.constant 1.000000e+00 : f32
    %594 = vector.broadcast %cst_137 : f32 to vector<2x32xf32>
    %595 = arith.addf %594, %593 : vector<2x32xf32>
    %596 = arith.divf %594, %595 : vector<2x32xf32>
    %597 = arith.mulf %588, %533 : vector<2x32xf32>
    %598 = arith.mulf %582, %590 : vector<2x32xf32>
    %599 = arith.addf %597, %598 : vector<2x32xf32>
    %600 = math.tanh %599 : vector<2x32xf32>
    %601 = arith.mulf %596, %600 : vector<2x32xf32>
    %602 = arith.mulf %544, %576 : vector<2x32xf32>
    %cst_138 = arith.constant 1.000000e+00 : f32
    %603 = vector.broadcast %cst_138 : f32 to vector<2x32xf32>
    %604 = arith.subf %603, %544 : vector<2x32xf32>
    %605 = arith.mulf %604, %518 : vector<2x32xf32>
    %606 = arith.addf %602, %605 : vector<2x32xf32>
    %607 = arith.mulf %544, %574 : vector<2x32xf32>
    %cst_139 = arith.constant 1.000000e+00 : f32
    %608 = vector.broadcast %cst_139 : f32 to vector<2x32xf32>
    %609 = arith.subf %608, %544 : vector<2x32xf32>
    %610 = arith.mulf %609, %523 : vector<2x32xf32>
    %611 = arith.addf %607, %610 : vector<2x32xf32>
    %612 = arith.mulf %545, %601 : vector<2x32xf32>
    %cst_140 = arith.constant 1.000000e+00 : f32
    %613 = vector.broadcast %cst_140 : f32 to vector<2x32xf32>
    %614 = arith.subf %613, %545 : vector<2x32xf32>
    %615 = arith.mulf %614, %528 : vector<2x32xf32>
    %616 = arith.addf %612, %615 : vector<2x32xf32>
    %617 = arith.mulf %545, %599 : vector<2x32xf32>
    %cst_141 = arith.constant 1.000000e+00 : f32
    %618 = vector.broadcast %cst_141 : f32 to vector<2x32xf32>
    %619 = arith.subf %618, %545 : vector<2x32xf32>
    %620 = arith.mulf %619, %533 : vector<2x32xf32>
    %621 = arith.addf %617, %620 : vector<2x32xf32>
    %622 = arith.mulf %606, %544 : vector<2x32xf32>
    %623 = vector.shape_cast %622 : vector<2x32xf32> to vector<2x1x32xf32>
    %c0_142 = arith.constant 0 : index
    %c0_143 = arith.constant 0 : index
    %c6_144 = arith.constant 6 : index
    %c0_145 = arith.constant 0 : index
    %624 = vector.load %arg7[%c0_142, %c0_143, %c6_144, %c0_145] : memref<1x2x8x64xf32, #tpu.memory_space<vmem>>, vector<1x2x1x32xf32>
    %625 = vector.shape_cast %624 : vector<1x2x1x32xf32> to vector<2x1x32xf32>
    %626 = vector.shape_cast %623 : vector<2x1x32xf32> to vector<1x2x1x32xf32>
    tpu.vector_store %arg7[%c0_142, %c0_143, %c6_144, %c0_145], %626 {strides = array<i32>} : memref<1x2x8x64xf32, #tpu.memory_space<vmem>>, vector<1x2x1x32xf32>,
    %627 = arith.mulf %616, %545 : vector<2x32xf32>
    %628 = vector.shape_cast %627 : vector<2x32xf32> to vector<2x1x32xf32>
    %c0_146 = arith.constant 0 : index
    %c0_147 = arith.constant 0 : index
    %c1_148 = arith.constant 1 : index
    %c32_149 = arith.constant 32 : index
    %629 = vector.load %arg7[%c0_146, %c0_147, %c1_148, %c32_149] : memref<1x2x8x64xf32, #tpu.memory_space<vmem>>, vector<1x2x1x32xf32>
    %630 = vector.shape_cast %629 : vector<1x2x1x32xf32> to vector<2x1x32xf32>
    %631 = vector.shape_cast %628 : vector<2x1x32xf32> to vector<1x2x1x32xf32>
    tpu.vector_store %arg7[%c0_146, %c0_147, %c1_148, %c32_149], %631 {strides = array<i32>} : memref<1x2x8x64xf32, #tpu.memory_space<vmem>>, vector<1x2x1x32xf32>,
    %632 = vector.extract_strided_slice %3 {offsets = [14, 0], sizes = [2, 32], strides = [1, 1]} : vector<16x32xf32> to vector<2x32xf32>
    %633 = vector.extract_strided_slice %3 {offsets = [0, 0], sizes = [2, 32], strides = [1, 1]} : vector<16x32xf32> to vector<2x32xf32>
    %634 = vector.extract_strided_slice %14 {offsets = [14, 0], sizes = [2, 128], strides = [1, 1]} : vector<16x256xf32> to vector<2x128xf32>
    %cst_150 = arith.constant dense<0.000000e+00> : vector<2x128xf32>
    %635 = tpu.matmul %606, %7, %cst_150 {dimension_numbers = #tpu.dot_dimension_numbers<[1], [0], [0], [1], [0, 0, 1, 1], [], []>} : vector<2x32xf32>, vector<32x128xf32>, vector<2x128xf32> -> vector<2x128xf32>
    %636 = arith.addf %634, %635 : vector<2x128xf32>
    %637 = vector.extract_strided_slice %14 {offsets = [0, 128], sizes = [2, 128], strides = [1, 1]} : vector<16x256xf32> to vector<2x128xf32>
    %cst_151 = arith.constant dense<0.000000e+00> : vector<2x128xf32>
    %638 = tpu.matmul %616, %9, %cst_151 {dimension_numbers = #tpu.dot_dimension_numbers<[1], [0], [0], [1], [0, 0, 1, 1], [], []>} : vector<2x32xf32>, vector<32x128xf32>, vector<2x128xf32> -> vector<2x128xf32>
    %639 = arith.addf %637, %638 : vector<2x128xf32>
    %640 = vector.extract_strided_slice %636 {offsets = [0, 0], sizes = [2, 32], strides = [1, 1]} : vector<2x128xf32> to vector<2x32xf32>
    %641 = arith.negf %640 : vector<2x32xf32>
    %642 = math.exp %641 : vector<2x32xf32>
    %cst_152 = arith.constant 1.000000e+00 : f32
    %643 = vector.broadcast %cst_152 : f32 to vector<2x32xf32>
    %644 = arith.addf %643, %642 : vector<2x32xf32>
    %645 = arith.divf %643, %644 : vector<2x32xf32>
    %646 = vector.extract_strided_slice %636 {offsets = [0, 32], sizes = [2, 32], strides = [1, 1]} : vector<2x128xf32> to vector<2x32xf32>
    %647 = arith.negf %646 : vector<2x32xf32>
    %648 = math.exp %647 : vector<2x32xf32>
    %cst_153 = arith.constant 1.000000e+00 : f32
    %649 = vector.broadcast %cst_153 : f32 to vector<2x32xf32>
    %650 = arith.addf %649, %648 : vector<2x32xf32>
    %651 = arith.divf %649, %650 : vector<2x32xf32>
    %652 = vector.extract_strided_slice %636 {offsets = [0, 64], sizes = [2, 32], strides = [1, 1]} : vector<2x128xf32> to vector<2x32xf32>
    %653 = math.tanh %652 : vector<2x32xf32>
    %654 = vector.extract_strided_slice %636 {offsets = [0, 96], sizes = [2, 32], strides = [1, 1]} : vector<2x128xf32> to vector<2x32xf32>
    %655 = arith.negf %654 : vector<2x32xf32>
    %656 = math.exp %655 : vector<2x32xf32>
    %cst_154 = arith.constant 1.000000e+00 : f32
    %657 = vector.broadcast %cst_154 : f32 to vector<2x32xf32>
    %658 = arith.addf %657, %656 : vector<2x32xf32>
    %659 = arith.divf %657, %658 : vector<2x32xf32>
    %660 = arith.mulf %651, %611 : vector<2x32xf32>
    %661 = arith.mulf %645, %653 : vector<2x32xf32>
    %662 = arith.addf %660, %661 : vector<2x32xf32>
    %663 = math.tanh %662 : vector<2x32xf32>
    %664 = arith.mulf %659, %663 : vector<2x32xf32>
    %665 = vector.extract_strided_slice %639 {offsets = [0, 0], sizes = [2, 32], strides = [1, 1]} : vector<2x128xf32> to vector<2x32xf32>
    %666 = arith.negf %665 : vector<2x32xf32>
    %667 = math.exp %666 : vector<2x32xf32>
    %cst_155 = arith.constant 1.000000e+00 : f32
    %668 = vector.broadcast %cst_155 : f32 to vector<2x32xf32>
    %669 = arith.addf %668, %667 : vector<2x32xf32>
    %670 = arith.divf %668, %669 : vector<2x32xf32>
    %671 = vector.extract_strided_slice %639 {offsets = [0, 32], sizes = [2, 32], strides = [1, 1]} : vector<2x128xf32> to vector<2x32xf32>
    %672 = arith.negf %671 : vector<2x32xf32>
    %673 = math.exp %672 : vector<2x32xf32>
    %cst_156 = arith.constant 1.000000e+00 : f32
    %674 = vector.broadcast %cst_156 : f32 to vector<2x32xf32>
    %675 = arith.addf %674, %673 : vector<2x32xf32>
    %676 = arith.divf %674, %675 : vector<2x32xf32>
    %677 = vector.extract_strided_slice %639 {offsets = [0, 64], sizes = [2, 32], strides = [1, 1]} : vector<2x128xf32> to vector<2x32xf32>
    %678 = math.tanh %677 : vector<2x32xf32>
    %679 = vector.extract_strided_slice %639 {offsets = [0, 96], sizes = [2, 32], strides = [1, 1]} : vector<2x128xf32> to vector<2x32xf32>
    %680 = arith.negf %679 : vector<2x32xf32>
    %681 = math.exp %680 : vector<2x32xf32>
    %cst_157 = arith.constant 1.000000e+00 : f32
    %682 = vector.broadcast %cst_157 : f32 to vector<2x32xf32>
    %683 = arith.addf %682, %681 : vector<2x32xf32>
    %684 = arith.divf %682, %683 : vector<2x32xf32>
    %685 = arith.mulf %676, %621 : vector<2x32xf32>
    %686 = arith.mulf %670, %678 : vector<2x32xf32>
    %687 = arith.addf %685, %686 : vector<2x32xf32>
    %688 = math.tanh %687 : vector<2x32xf32>
    %689 = arith.mulf %684, %688 : vector<2x32xf32>
    %690 = arith.mulf %632, %664 : vector<2x32xf32>
    %cst_158 = arith.constant 1.000000e+00 : f32
    %691 = vector.broadcast %cst_158 : f32 to vector<2x32xf32>
    %692 = arith.subf %691, %632 : vector<2x32xf32>
    %693 = arith.mulf %692, %606 : vector<2x32xf32>
    %694 = arith.addf %690, %693 : vector<2x32xf32>
    %695 = arith.mulf %633, %689 : vector<2x32xf32>
    %cst_159 = arith.constant 1.000000e+00 : f32
    %696 = vector.broadcast %cst_159 : f32 to vector<2x32xf32>
    %697 = arith.subf %696, %633 : vector<2x32xf32>
    %698 = arith.mulf %697, %616 : vector<2x32xf32>
    %699 = arith.addf %695, %698 : vector<2x32xf32>
    %700 = arith.mulf %694, %632 : vector<2x32xf32>
    %701 = vector.shape_cast %700 : vector<2x32xf32> to vector<2x1x32xf32>
    %c0_160 = arith.constant 0 : index
    %c0_161 = arith.constant 0 : index
    %c7_162 = arith.constant 7 : index
    %c0_163 = arith.constant 0 : index
    %702 = vector.load %arg7[%c0_160, %c0_161, %c7_162, %c0_163] : memref<1x2x8x64xf32, #tpu.memory_space<vmem>>, vector<1x2x1x32xf32>
    %703 = vector.shape_cast %702 : vector<1x2x1x32xf32> to vector<2x1x32xf32>
    %704 = vector.shape_cast %701 : vector<2x1x32xf32> to vector<1x2x1x32xf32>
    tpu.vector_store %arg7[%c0_160, %c0_161, %c7_162, %c0_163], %704 {strides = array<i32>} : memref<1x2x8x64xf32, #tpu.memory_space<vmem>>, vector<1x2x1x32xf32>,
    %705 = arith.mulf %699, %633 : vector<2x32xf32>
    %706 = vector.shape_cast %705 : vector<2x32xf32> to vector<2x1x32xf32>
    %c0_164 = arith.constant 0 : index
    %c0_165 = arith.constant 0 : index
    %c0_166 = arith.constant 0 : index
    %c32_167 = arith.constant 32 : index
    %707 = vector.load %arg7[%c0_164, %c0_165, %c0_166, %c32_167] : memref<1x2x8x64xf32, #tpu.memory_space<vmem>>, vector<1x2x1x32xf32>
    %708 = vector.shape_cast %707 : vector<1x2x1x32xf32> to vector<2x1x32xf32>
    %709 = vector.shape_cast %706 : vector<2x1x32xf32> to vector<1x2x1x32xf32>
    tpu.vector_store %arg7[%c0_164, %c0_165, %c0_166, %c32_167], %709 {strides = array<i32>} : memref<1x2x8x64xf32, #tpu.memory_space<vmem>>, vector<1x2x1x32xf32>,
    return
  }
  func.func @transform_0(%arg0: i32) -> (i32, i32, i32) {
    %c0_i32 = arith.constant 0 : i32
    %c0_i32_0 = arith.constant 0 : i32
    %c0_i32_1 = arith.constant 0 : i32
    return %arg0, %c0_i32, %c0_i32_0 : i32, i32, i32
  }
  func.func @transform_1(%arg0: i32) -> (i32, i32, i32) {
    %c0_i32 = arith.constant 0 : i32
    %c0_i32_0 = arith.constant 0 : i32
    %c0_i32_1 = arith.constant 0 : i32
    return %arg0, %c0_i32, %c0_i32_0 : i32, i32, i32
  }
  func.func @transform_2(%arg0: i32) -> (i32, i32, i32) {
    %c0_i32 = arith.constant 0 : i32
    %c0_i32_0 = arith.constant 0 : i32
    %c0_i32_1 = arith.constant 0 : i32
    return %arg0, %c0_i32, %c0_i32_0 : i32, i32, i32
  }
  func.func @transform_3(%arg0: i32) -> (i32, i32, i32) {
    %c0_i32 = arith.constant 0 : i32
    %c0_i32_0 = arith.constant 0 : i32
    %c0_i32_1 = arith.constant 0 : i32
    return %arg0, %c0_i32, %c0_i32_0 : i32, i32, i32
  }
  func.func @transform_4(%arg0: i32) -> (i32, i32, i32) {
    %c0_i32 = arith.constant 0 : i32
    %c0_i32_0 = arith.constant 0 : i32
    %c0_i32_1 = arith.constant 0 : i32
    return %arg0, %c0_i32, %c0_i32_0 : i32, i32, i32
  }
  func.func @transform_5(%arg0: i32) -> (i32, i32, i32) {
    %c0_i32 = arith.constant 0 : i32
    %c0_i32_0 = arith.constant 0 : i32
    %c0_i32_1 = arith.constant 0 : i32
    return %arg0, %c0_i32, %c0_i32_0 : i32, i32, i32
  }
  func.func @transform_6(%arg0: i32) -> (i32, i32, i32, i32) {
    %c0_i32 = arith.constant 0 : i32
    %c0_i32_0 = arith.constant 0 : i32
    %c0_i32_1 = arith.constant 0 : i32
    %c0_i32_2 = arith.constant 0 : i32
    return %arg0, %c0_i32, %c0_i32_0, %c0_i32_1 : i32, i32, i32, i32
  }
}

</mosaic_0001>

<bundles_post_ra>
// kernel: aoa_forward.3
= control target key start
LH: loop header
LB: loop body
LE: loop exit
PB: predicated region body
PF: predicated region fallthrough
CT: control target
= control target key end

     0   :  { %vm22_vm0 = vcmask 523264   ;;  %s383_s0 = inlined_call_operand.vmem [shape: f32[2,8,64], index: 0, kind: input, shape index: {}]   ;;  %s384_s1 = inlined_call_operand.vmem [shape: f32[2,4,64], index: 1, kind: input, shape index: {}]   ;;  %s385_s2 = inlined_call_operand.vmem [shape: f32[64,3], index: 2, kind: input, shape index: {}]   ;;  %s386_s3 = inlined_call_operand.vmem [shape: f32[1,3], index: 3, kind: input, shape index: {}]   ;;  %s387_s4 = inlined_call_operand.hbm [shape: f32[2,3], index: 4, kind: output, shape index: {}]  }
   0x1   :  { %v20_v0 = vld [vmem:[%s384_s1] sm:$0xf]  ;;  %v21_v1 = vld [vmem:[%s384_s1 + $0x4] sm:$0xf]  ;;  %v332_v3 = vld [vmem:[%s383_s0 + $0x8] sm:$0xff] }
   0x2   :  { %v325_v2 = vld [vmem:[%s383_s0] sm:$0xff]  ;;  %237 = vmatpush.xpose.msk.msra.mxu0 %vm22_vm0, %v20_v0  ;;  %239 = vmatpush.xpose.msk.msra.mxu1 %vm22_vm0, %v21_v1 }
   0x3   :  { %9 = vsyncpa [#allocation3], 0  ;;  %vm75_vm1 = vcmask 31744   ;;  %v289_v40 = vmov 8.0   ;;  %vm195_vm3 = vcmask 1041409   ;;  %s290_s12 = smov [#allocation2]  }
   0x4   :  { %s226_s13 = sshll.u32 %s290_s12, 4  ;;  %s228_s16 = sshll.u32 %s387_s4, 4  ;;  %vm219_vm4 = vcmask 17408   ;;  %s227_s13 = int_to_ptr.vmem [resolvable:$true] %s226_s13  ;;  %s229_s16 = int_to_ptr.hbm [resolvable:$true] %s228_s16 }
   0x5   :  { %238 = vmatmul.msk.f32.vlgmr.msra.gmra.mxu0 %vm22_vm0, %v325_v2  ;;  %240 = vmatmul.msk.f32.vlgmr.msra.gmra.mxu1 %vm22_vm0, %v332_v3 }
  0x82   :  { %v46_v4 = vpop.f32.mrf.mxu0  ;;  %v72_v6 = vpop.f32.mrf.mxu1 }
  0x83   :  { %v76_v5 = vsel %vm75_vm1, %v46_v4, -inf  ;;  %v83_v7 = vsel %vm75_vm1, %v72_v6, -inf }
  0x84   :  { %114 = vmax.xlane.f32.xlu0 %v76_v5  ;;  %v77_v18 = vrot.slane %v76_v5, 4  ;;  %v84_v21 = vrot.slane %v83_v7, 4 }
  0x86   :  { %v78_v19 = vmax.f32 %v76_v5, %v77_v18  ;;  %v85_v23 = vmax.f32 %v83_v7, %v84_v21 }
  0x88   :  { %v79_v20 = vrot.slane %v78_v19, 2  ;;  %v86_v25 = vrot.slane %v85_v23, 2 }
  0x8a   :  { %v80_v22 = vmax.f32 %v78_v19, %v79_v20  ;;  %v87_v27 = vmax.f32 %v85_v23, %v86_v25  ;;  %v188_v25 = vld [vmem:[%s385_s2 + $0x38] sm:$0xff] }
  0x8b   :  { %207 = vmatpush.msra.mxu2 %v188_v25 }
  0x8c   :  { %116 = vmax.xlane.f32.xlu0 %v83_v7  ;;  %v81_v24 = vrot.slane %v80_v22, 1  ;;  %v88_v29 = vrot.slane %v87_v27, 1 }
  0x8e   :  { %v82_v26 = vmax.f32 %v80_v22, %v81_v24  ;;  %v89_v31 = vmax.f32 %v87_v27, %v88_v29  ;;  %v186_v27 = vld [vmem:[%s385_s2 + $0x28] sm:$0xff]  ;;  %v184_v29 = vld [vmem:[%s385_s2 + $0x18] sm:$0xff] }
  0x90   :  { %v90_v28 = vsub.f32 %v46_v4, %v82_v26  ;;  %v91_v32 = vsub.f32 %v72_v6, %v89_v31  ;;  %v187_v26 = vld [vmem:[%s385_s2 + $0x30] sm:$0xff]  ;;  %v182_v31 = vld [vmem:[%s385_s2 + $0x8] sm:$0xff] }
  0x91   :  { %208 = vmatpush.msra.mxu2 %v187_v26 }
  0x92   :  { %v92_v30 = vmul.f32 1.442695, %v90_v28  ;;  %v94_v33 = vmul.f32 1.442695, %v91_v32  ;;  %v185_v28 = vld [vmem:[%s385_s2 + $0x20] sm:$0xff] }
  0x93   :  { %209 = vmatpush.msra.mxu2 %v186_v27  ;;  %v181_v32 = vld [vmem:[%s385_s2] sm:$0xff] }
  0x95   :  { %210 = vmatpush.msra.mxu2 %v185_v28 }
  0x97   :  { %211 = vmatpush.msra.mxu2 %v184_v29 }
  0xf7   :  { %v115_v8 = vpop.xlane.xlu0 %114 }
  0xf8   :  { %v118_v9 = vsub.f32 %v46_v4, %v115_v8 }
  0xfa   :  { %v120_v10 = vmul.f32 1.442695, %v118_v9 }
  0xfc   :  { %245 = vpow2.f32 %v120_v10 }
  0xff   :  { %v117_v11 = vpop.xlane.xlu0 %116 }
 0x100   :  { %v119_v12 = vsub.f32 %v72_v6, %v117_v11 }
 0x102   :  { %v246_v13 = vpop.eup %245  ;;  %v122_v14 = vmul.f32 1.442695, %v119_v12 }
 0x103   :  { %v124_v15 = vsel %vm75_vm1, %v246_v13, 0.0 }
 0x104   :  { %247 = vpow2.f32 %v122_v14  ;;  %125 = vadd.xlane.f32.xlu1 %v124_v15 }
 0x105   :  { %249 = vpow2.f32 %v92_v30  ;;  %v183_v30 = vld [vmem:[%s385_s2 + $0x10] sm:$0xff] }
 0x106   :  { %251 = vpow2.f32 %v94_v33  ;;  %212 = vmatpush.msra.mxu2 %v183_v30 }
 0x107   :  { %253 = vrcp.f32 %v289_v40 }
 0x108   :  { %213 = vmatpush.msra.mxu2 %v182_v31 }
 0x10a   :  { %v248_v16 = vpop.eup %247  ;;  %214 = vmatpush.msra.mxu2 %v181_v32 }
 0x10b   :  { %v127_v17 = vsel %vm75_vm1, %v248_v16, 0.0  ;;  %v250_v34 = vpop.eup %249 }
 0x10c   :  { %128 = vadd.xlane.f32.xlu1 %v127_v17  ;;  %v96_v35 = vsel %vm75_vm1, %v250_v34, 0.0  ;;  %v252_v37 = vpop.eup %251 }
 0x10d   :  { %v97_v36 = vrot.slane %v96_v35, 4  ;;  %v103_v39 = vsel %vm75_vm1, %v252_v37, 0.0  ;;  %v254_v44 = vpop.eup %253 }
 0x10e   :  { %v104_v42 = vrot.slane %v103_v39, 4  ;;  %v149_v47 = vmul.f32 8.0, %v254_v44  ;;  %vm153_vm2 = vweird.f32 %v254_v44 }
 0x10f   :  { %v98_v38 = vadd.f32 %v97_v36, %v96_v35 }
 0x110   :  { %v105_v46 = vadd.f32 %v104_v42, %v103_v39  ;;  %v150_v53 = vsub.f32 1.0, %v149_v47 }
 0x111   :  { %v99_v41 = vrot.slane %v98_v38, 2 }
 0x112   :  { %v106_v48 = vrot.slane %v105_v46, 2  ;;  %v151_v58 = vmul.f32 %v254_v44, %v150_v53 }
 0x113   :  { %v100_v45 = vadd.f32 %v99_v41, %v98_v38 }
 0x114   :  { %v107_v54 = vadd.f32 %v106_v48, %v105_v46  ;;  %v152_v0 = vadd.f32 %v254_v44, %v151_v58 }
 0x115   :  { %v101_v49 = vrot.slane %v100_v45, 1 }
 0x116   :  { %v108_v60 = vrot.slane %v107_v54, 1  ;;  %v154_v9 = vsel %vm153_vm2, %v254_v44, %v152_v0 }
 0x117   :  { %v102_v56 = vadd.f32 %v101_v49, %v100_v45 }
 0x118   :  { %v109_v5 = vadd.f32 %v108_v60, %v107_v54 }
 0x177   :  { %v126_v43 = vpop.xlane.xlu1 %125 }
 0x178   :  { %255 = vrcp.f32 %v126_v43 }
 0x17e   :  { %v256_v50 = vpop.eup %255 }
 0x17f   :  { %v132_v51 = vmul.f32 %v256_v50, %v246_v13  ;;  %v129_v52 = vpop.xlane.xlu1 %128 }
 0x180   :  { %257 = vrcp.f32 %v129_v52 }
 0x181   :  { %v134_v55 = vsel %vm75_vm1, %v132_v51, 0.0  ;;  %259 = vrcp.f32 %v102_v56 }
 0x182   :  { %v135_v57 = vrot.slane %v134_v55, 4  ;;  %261 = vrcp.f32 %v109_v5 }
 0x184   :  { %v136_v59 = vadd.f32 %v135_v57, %v134_v55 }
 0x186   :  { %v258_v61 = vpop.eup %257  ;;  %v137_v62 = vrot.slane %v136_v59, 2 }
 0x187   :  { %v133_v63 = vmul.f32 %v258_v61, %v248_v16  ;;  %v260_v8 = vpop.eup %259 }
 0x188   :  { %v138_v1 = vadd.f32 %v137_v62, %v136_v59  ;;  %v112_v12 = vmul.f32 %v260_v8, %v250_v34  ;;  %v262_v19 = vpop.eup %261 }
 0x189   :  { %v141_v4 = vsel %vm75_vm1, %v133_v63, 0.0  ;;  %v113_v21 = vmul.f32 %v262_v19, %v252_v37 }
 0x18a   :  { %v142_v6 = vrot.slane %v141_v4, 4  ;;  %v139_v7 = vrot.slane %v138_v1, 1 }
 0x18c   :  { %v143_v10 = vadd.f32 %v142_v6, %v141_v4  ;;  %v140_v11 = vadd.f32 %v139_v7, %v138_v1 }
 0x18e   :  { %v155_v13 = vmul.f32 %v154_v9, %v140_v11  ;;  %v144_v14 = vrot.slane %v143_v10, 2 }
 0x190   :  { %v157_v15 = vmul.f32 %v155_v13, %v112_v12  ;;  %v145_v17 = vadd.f32 %v144_v14, %v143_v10 }
 0x192   :  { %v159_v16 = vsel %vm75_vm1, %v157_v15, 0.0  ;;  %v146_v18 = vrot.slane %v145_v17, 1 }
 0x193   :  { %160 = vadd.xlane.f32.xlu2 %v159_v16 }
 0x194   :  { %v147_v20 = vadd.f32 %v146_v18, %v145_v17 }
 0x196   :  { %v156_v22 = vmul.f32 %v154_v9, %v147_v20 }
 0x198   :  { %v158_v23 = vmul.f32 %v156_v22, %v113_v21 }
 0x19a   :  { %v162_v24 = vsel %vm75_vm1, %v158_v23, 0.0 }
 0x19b   :  { %163 = vadd.xlane.f32.xlu2 %v162_v24 }
 0x206   :  { %v161_v33 = vpop.xlane.xlu2 %160 }
 0x207   :  { %v165_v34 = vmul.f32 %v161_v33, %v325_v2 }
 0x209   :  { %v167_v35 = vsel %vm22_vm0, %v165_v34, 0.0 }
 0x20a   :  { %v168_v36 = vrot.slane %v167_v35, 4 }
 0x20c   :  { %v169_v37 = vadd.f32 %v168_v36, %v167_v35 }
 0x20e   :  { %v164_v38 = vpop.xlane.xlu2 %163  ;;  %v170_v40 = vrot.slane %v169_v37, 2 }
 0x20f   :  { %v166_v39 = vmul.f32 %v164_v38, %v332_v3  ;;  %v244_v3 = vld [vmem:[%s386_s3] ss:$0 sm:$0xff] }
 0x210   :  { %v171_v43 = vadd.f32 %v170_v40, %v169_v37 }
 0x211   :  { %v174_v41 = vsel %vm22_vm0, %v166_v39, 0.0 }
 0x212   :  { %v175_v42 = vrot.slane %v174_v41, 4  ;;  %v172_v46 = vrot.slane %v171_v43, 1 }
 0x214   :  { %v176_v44 = vadd.f32 %v175_v42, %v174_v41  ;;  %v173_v49 = vadd.f32 %v172_v46, %v171_v43 }
 0x216   :  { %v177_v45 = vrot.slane %v176_v44, 2 }
 0x218   :  { %v178_v47 = vadd.f32 %v177_v45, %v176_v44 }
 0x21a   :  { %v179_v48 = vrot.slane %v178_v47, 1 }
 0x21c   :  { %v180_v2 = vadd.f32 %v179_v48, %v178_v47 }
 0x21e   :  { %v196_v50 = vsel %vm195_vm3, %v180_v2, %v173_v49 }
 0x21f   :  { %241 = vmatmul.msk.f32.vlgmr.msra.gmra.mxu2 %vm22_vm0, %v196_v50 }
 0x2a2   :  { %v216_v51 = vpop.f32.mrf.mxu2 }
 0x2a3   :  { %v217_v52 = vadd.f32 %v244_v3, %v216_v51 }
 0x2a5   :  { %220 = vst.msk [vmem:[#allocation2] sm:$0x3] %vm219_vm4, %v217_v52 }
 0x2a6   :  { %231 = dma.vmem_to_hbm [thread:$0]  %s227_s13, 32, %s229_s16, [#allocation3]  }
 0x2a7   :  { %287 = dma.done.wait [#allocation3], 32  }
 0x2a8   :  { %288 = vsyncadd [#allocation3], 4294967264 }
 0x2a9   :  { %236 = vsyncpa [#allocation3], 1 }

// kernel: aoa_forward.2
= control target key start
LH: loop header
LB: loop body
LE: loop exit
PB: predicated region body
PF: predicated region fallthrough
CT: control target
= control target key end

     0   :  { %s2337_s21 = smov 0   ;;  %s3004_s0 = inlined_call_operand.vmem [shape: f32[2,16,32], index: 0, kind: input, shape index: {}]   ;;  %s3005_s1 = inlined_call_operand.vmem [shape: f32[2,16,32], index: 1, kind: input, shape index: {}]   ;;  %s3006_s2 = inlined_call_operand.vmem [shape: f32[2,32,256], index: 2, kind: input, shape index: {}]   ;;  %s3007_s3 = inlined_call_operand.vmem [shape: f32[2,32,128], index: 3, kind: input, shape index: {}]   ;;  %s3008_s4 = inlined_call_operand.vmem [shape: f32[2,32,128], index: 4, kind: input, shape index: {}]   ;;  %s3009_s5 = inlined_call_operand.vmem [shape: f32[2,1,256], index: 5, kind: input, shape index: {}]   ;;  %s3010_s6 = inlined_call_operand.vmem [shape: f32[2,2,8,64], index: 6, kind: output, shape index: {}]  }
   0x1 LB: > { %s2088_s22 = sadd.s32 4294967295, %s2296_s21   ;;  %p2092_p0 = scmp.ge.s32.totalorder %s2296_s21, 1  ;;  %s2296_s21 = sphi %s2337_s21, %s16_s21  }
   0x2   : > { %p261_p1 = scmp.lt.s32.totalorder %s2296_s21, 3 }
   0x4   : > { %p262_p2 = pnand %p2092_p0, %p261_p1 }
   0x5   : > { %p315_p3 = scmp.lt.s32.totalorder (!%p262_p2), %s2088_s22, 1  ;;  %s2299_s18 = smov (!%p262_p2), 64  }
   0x6   : > { %265 = sbr.rel (%p262_p2) target bundleno = 5070 (0x13ce), region = 44  ;;  %s2300_s19 = smov (!%p262_p2), 32  }
   0x7   : > { %s2301_s20 = smov (!%p262_p2), 96  }
   0xb   : > { %s3012_s22 = smov (!%p315_p3, %s2088_s22), 1  ;;  %vm375_vm0 = vcmask 261120   ;;  %v2298_v14 = vmov 0.0   ;;  %vm582_vm9 = vcmask 253952  }
   0xc   : > { %s2144_s23 = sshll.u32 %s3012_s22, 6  ;;  %s2145_s24 = sshll.u32 %s3012_s22, 5 }
   0xd   : > { %s2352_s27 = scalar_lea.vmem %s3006_s2, %s2144_s23  ;;  %s339_s30 = scalar_lea.vmem %s3008_s4, %s2145_s24 }
   0xe   : > { %v360_v0 = vld [vmem:[%s2352_s27 + $0x38] sm:$0xff]  ;;  %v358_v1 = vld [vmem:[%s2352_s27 + $0x28] sm:$0xff]  ;;  %s2362_s7 = sshll.u32 %s3012_s22, 4  ;;  %s334_s10 = scalar_lea.vmem %s3007_s3, %s2145_s24  ;;  %v2368_v3 = vld [vmem:[%s339_s30 + $0x10] sm:$0xff] }
   0xf   : > { %v2359_v2 = vld [vmem:[%s339_s30 + $0x18] sm:$0xff]  ;;  %417 = vmatpush.msra.mxu1 %v360_v0  ;;  %v2371_v5 = vld [vmem:[%s339_s30 + $0x8] sm:$0xff]  ;;  %s2377_s13 = scalar_lea.vmem %s3004_s0, %s2362_s7  ;;  %v2383_v8 = vld [vmem:[%s339_s30] sm:$0xff]  ;;  %s2103_s14 = sshll.u32 %s3012_s22, 1 }
  0x10   : > { %464 = vmatpush.msra.mxu3 %v2359_v2  ;;  %v356_v4 = vld [vmem:[%s2352_s27 + $0x18] sm:$0xff]  ;;  %v354_v6 = vld [vmem:[%s2352_s27 + $0x8] sm:$0xff]  ;;  %v2386_v9 = vld [vmem:[%s334_s10 + $0x10] sm:$0xff]  ;;  %s343_s17 = scalar_lea.vmem %s3009_s5, %s2103_s14  ;;  %s2471_s24 = scalar_lea.vmem %s3005_s1, %s2362_s7 }
  0x11   : > { %418 = vmatpush.msra.mxu1 %v358_v1  ;;  %v2381_v7 = vld [vmem:[%s334_s10 + $0x18] sm:$0xff]  ;;  %v359_v10 = vld [vmem:[%s2352_s27 + $0x30] sm:$0xff]  ;;  %v349_v11 = vld [vmem:[%s2377_s13] sm:$0xff] }
  0x12   : > { %465 = vmatpush.msra.mxu3 %v2368_v3  ;;  %443 = vmatpush.msra.mxu2 %v2381_v7  ;;  %v2392_v12 = vld [vmem:[%s334_s10 + $0x8] sm:$0xff]  ;;  %v357_v13 = vld [vmem:[%s2352_s27 + $0x20] sm:$0xff]  ;;  %v355_v16 = vld [vmem:[%s2352_s27 + $0x10] sm:$0xff] }
  0x13   : > { %419 = vmatpush.msra.mxu1 %v356_v4  ;;  %394 = vmatpush.msra.mxu0 %v359_v10  ;;  %v2397_v15 = vld [vmem:[%s334_s10] sm:$0xff]  ;;  %v350_v18 = vld [vmem:[%s2377_s13 + $0x8] sm:$0xff] }
  0x14   : > { %466 = vmatpush.msra.mxu3 %v2371_v5  ;;  %444 = vmatpush.msra.mxu2 %v2386_v9  ;;  %v353_v17 = vld [vmem:[%s2352_s27] sm:$0xff]  ;;  %s2503_s27 = scalar_lea.vmem %s3010_s6, %s2362_s7 }
  0x15   : > { %420 = vmatpush.msra.mxu1 %v354_v6  ;;  %395 = vmatpush.msra.mxu0 %v357_v13  ;;  %v2443_v19 = vld [vmem:[%s343_s17] sm:$0x3] }
  0x16   : > { %467 = vmatpush.msra.mxu3 %v2383_v8  ;;  %2108 = vmatmul.msk.f32.vlgmr.msra.gmra.mxu1 %vm375_vm0, %v349_v11  ;;  %v372_v20 = vperm.slane %v2443_v19, 1  ;;  %v371_v25 = vperm.slane %v2443_v19, 0 }
  0x17   : > { %468 = vmatmul.f32.vlgmr.msra.gmra.mxu3 %v2298_v14  ;;  %445 = vmatpush.msra.mxu2 %v2392_v12 }
  0x18   : > { %646 = vmatpush.msrb.mxu3 %v2359_v2  ;;  %848 = vmatpush.msrb.mxu1 %v2359_v2 }
  0x19   : > { %446 = vmatpush.msra.mxu2 %v2397_v15  ;;  %396 = vmatpush.msra.mxu0 %v355_v16 }
  0x1a   : > { %447 = vmatmul.f32.vlgmr.msra.gmra.mxu2 %v2298_v14  ;;  %647 = vmatpush.msrb.mxu3 %v2368_v3 }
  0x1b   : > { %397 = vmatpush.msra.mxu0 %v353_v17  ;;  %618 = vmatpush.msrb.mxu2 %v2381_v7 }
  0x1c   : > { %2106 = vmatmul.msk.f32.vlgmr.msra.gmra.mxu0 %vm375_vm0, %v349_v11  ;;  %648 = vmatpush.msrb.mxu3 %v2371_v5 }
  0x1d   : > { %619 = vmatpush.msrb.mxu2 %v2386_v9  ;;  %820 = vmatpush.msrb.mxu0 %v2381_v7 }
  0x1e   : > { %2109 = vmatmul.msk.f32.gmra.mxu1 %vm375_vm0, %v350_v18  ;;  %649 = vmatpush.msrb.mxu3 %v2383_v8 }
  0x1f   : > { %620 = vmatpush.msrb.mxu2 %v2392_v12  ;;  %821 = vmatpush.msrb.mxu0 %v2386_v9 }
  0x20   : > { %849 = vmatpush.msrb.mxu1 %v2368_v3  ;;  %1050 = vmatpush.msra.mxu3 %v2359_v2 }
  0x21   : > { %621 = vmatpush.msrb.mxu2 %v2397_v15  ;;  %822 = vmatpush.msrb.mxu0 %v2392_v12 }
  0x22   : > { %850 = vmatpush.msrb.mxu1 %v2371_v5  ;;  %1051 = vmatpush.msra.mxu3 %v2368_v3 }
  0x23   : > { %1022 = vmatpush.msra.mxu2 %v2381_v7  ;;  %823 = vmatpush.msrb.mxu0 %v2397_v15 }
  0x24   : > { %2107 = vmatmul.msk.f32.gmra.mxu0 %vm375_vm0, %v350_v18  ;;  %851 = vmatpush.msrb.mxu1 %v2383_v8 }
  0x25   : > { %1023 = vmatpush.msra.mxu2 %v2386_v9  ;;  %1052 = vmatpush.msra.mxu3 %v2371_v5 }
  0x26   : > { %1216 = vmatpush.msra.mxu0 %v2381_v7  ;;  %1240 = vmatpush.msra.mxu1 %v2359_v2 }
  0x27   : > { %1024 = vmatpush.msra.mxu2 %v2392_v12  ;;  %1053 = vmatpush.msra.mxu3 %v2383_v8 }
  0x28   : > { %1217 = vmatpush.msra.mxu0 %v2386_v9  ;;  %1241 = vmatpush.msra.mxu1 %v2368_v3 }
  0x29   : > { %1025 = vmatpush.msra.mxu2 %v2397_v15 }
  0x2a   : > { %1218 = vmatpush.msra.mxu0 %v2392_v12  ;;  %1242 = vmatpush.msra.mxu1 %v2371_v5 }
  0x2c   : > { %1219 = vmatpush.msra.mxu0 %v2397_v15  ;;  %1243 = vmatpush.msra.mxu1 %v2383_v8 }
  0x93   : > { %v422_v21 = vpop.f32.mrf.mxu1 }
  0x94   : > { %v2446_v22 = vadd.f32 %v422_v21, %v372_v20 }
  0x99   : > { %v399_v27 = vpop.f32.mrf.mxu0 }
  0x9a   : > { %v469_v23 = vpop.f32.mrf.mxu3  ;;  %v2454_v30 = vadd.f32 %v399_v27, %v371_v25 }
  0x9b   : > { %v473_v24 = vrot.slane %v469_v23, 2  ;;  %v425_v26 = vpop.f32.mrf.mxu1  ;;  %v2474_v23 = vld [vmem:[%s2471_s24 + $0x8] sm:$0xff] }
  0x9c   : > { %v2449_v28 = vadd.f32 %v425_v26, %v372_v20  ;;  %v2480_v26 = vld [vmem:[%s2471_s24] sm:$0xff] }
  0x9d   : > { %v448_v31 = vpop.f32.mrf.mxu2 }
  0x9e   : > { %v475_v29 = vadd.f32 %v473_v24, %v2449_v28  ;;  %v451_v32 = vadd.f32 %v448_v31, %v2454_v30  ;;  %v2477_v24 = vsub.f32 1.0, %v2474_v23 }
  0xa0   : > { %2160 = vtanh.f32 %v475_v29  ;;  %v2111_v35 = vmul.f32 -1.442695, %v475_v29  ;;  %v2110_v36 = vmul.f32 -1.442695, %v451_v32  ;;  %v570_v29 = vmul.f32 0.0, %v2477_v24 }
  0xa1   : > { %2162 = vtanh.f32 %v451_v32 }
  0xa2   : > { %2164 = vpow2.f32 %v2111_v35 }
  0xa3   : > { %2166 = vpow2.f32 %v2110_v36 }
  0xa6   : > { %v2161_v33 = vpop.eup %2160 }
  0xa7   : > { %535 = vrot.lane.b32.xlu0 %v2161_v33, %s2299_s18  ;;  %v2163_v34 = vpop.eup %2162  ;;  %v2487_v33 = vsub.f32 1.0, %v2480_v26 }
  0xa8   : > { %v2165_v37 = vpop.eup %2164 }
  0xa9   : > { %v516_v38 = vadd.f32 1.0, %v2165_v37  ;;  %v2167_v39 = vpop.eup %2166  ;;  %v556_v36 = vmul.f32 0.0, %v2487_v33 }
  0xaa   : > { %v479_v40 = vadd.f32 1.0, %v2167_v39 }
  0xab   : > { %2168 = vrcp.f32 %v516_v38  ;;  %v528_v49 = vand.u32 2147483648, %v516_v38  ;;  %vm522_vm2 = vweird.f32 %v516_v38  ;;  %v526_v50 = vand.u32 2147483647, %v516_v38 }
  0xac   : > { %2170 = vrcp.f32 %v479_v40  ;;  %vm485_vm4 = vweird.f32 %v479_v40  ;;  %v491_v54 = vand.u32 2147483648, %v479_v40  ;;  %v489_v56 = vand.u32 2147483647, %v479_v40 }
  0xad   : > { %v529_v53 = vor.u32 1.1754944e-38, %v528_v49  ;;  %vm527_vm6 = vcmp.eq.f32.partialorder %v526_v50, 8.507059e+37 }
  0xae   : > { %v492_v60 = vor.u32 1.1754944e-38, %v491_v54  ;;  %vm490_vm8 = vcmp.eq.f32.partialorder %v489_v56, 8.507059e+37 }
  0xaf   : > { %498 = vrot.lane.b32.xlu0 %v2163_v34, %s2299_s18 }
  0xb1   : > { %v2169_v41 = vpop.eup %2168 }
  0xb2   : > { %v518_v42 = vmul.f32 %v2169_v41, %v516_v38  ;;  %v2171_v43 = vpop.eup %2170  ;;  %vm523_vm1 = vweird.f32 %v2169_v41 }
  0xb3   : > { %v481_v45 = vmul.f32 %v2171_v43, %v479_v40  ;;  %vm524_vm3 = vmor %vm522_vm2, %vm523_vm1  ;;  %vm486_vm5 = vweird.f32 %v2171_v43 }
  0xb4   : > { %v519_v44 = vsub.f32 1.0, %v518_v42  ;;  %vm487_vm7 = vmor %vm485_vm4, %vm486_vm5 }
  0xb5   : > { %v482_v47 = vsub.f32 1.0, %v481_v45 }
  0xb6   : > { %v520_v46 = vmul.f32 %v2169_v41, %v519_v44 }
  0xb7   : > { %v483_v51 = vmul.f32 %v2171_v43, %v482_v47 }
  0xb8   : > { %v521_v48 = vadd.f32 %v2169_v41, %v520_v46 }
  0xb9   : > { %v484_v55 = vadd.f32 %v2171_v43, %v483_v51 }
  0xba   : > { %v525_v52 = vsel %vm524_vm3, %v2169_v41, %v521_v48 }
  0xbb   : > { %v530_v58 = vsel %vm527_vm6, %v529_v53, %v525_v52  ;;  %v488_v61 = vsel %vm487_vm7, %v2171_v43, %v484_v55 }
  0xbc   : > { %v493_v62 = vsel %vm490_vm8, %v492_v60, %v488_v61  ;;  %v533_v1 = vmul.f32 0.0, %v530_v58 }
  0xbd   : > { %v496_v10 = vmul.f32 0.0, %v493_v62 }
 0x119   : > { %v536_v57 = vpop.permute.xlu0 %535 }
 0x11a   : > { %v538_v59 = vmul.f32 %v536_v57, %v530_v58 }
 0x11c   : > { %540 = vrot.lane.b32.xlu1 %v538_v59, %s2300_s19 }
 0x121   : > { %v499_v63 = vpop.permute.xlu0 %498 }
 0x122   : > { %v501_v0 = vmul.f32 %v499_v63, %v493_v62 }
 0x124   : > { %503 = vrot.lane.b32.xlu1 %v501_v0, %s2300_s19 }
 0x18e   : > { %v541_v4 = vpop.permute.xlu1 %540 }
 0x18f   : > { %v543_v6 = vadd.f32 %v541_v4, %v533_v1 }
 0x191   : > { %2172 = vtanh.f32 %v543_v6 }
 0x196   : > { %v504_v11 = vpop.permute.xlu1 %503 }
 0x197   : > { %v2173_v13 = vpop.eup %2172  ;;  %v506_v14 = vadd.f32 %v504_v11, %v496_v10 }
 0x198   : > { %546 = vrot.lane.b32.xlu2 %v2173_v13, %s2299_s18 }
 0x199   : > { %2174 = vtanh.f32 %v506_v14 }
 0x19f   : > { %v2175_v16 = vpop.eup %2174 }
 0x1a0   : > { %509 = vrot.lane.b32.xlu2 %v2175_v16, %s2299_s18 }
 0x1a8   : > { %573 = vrot.lane.b32.xlu2 %v543_v6, %s2301_s20 }
 0x1f2   : > { %v547_v17 = vpop.permute.xlu2 %546 }
 0x1f3   : > { %v549_v18 = vmul.f32 %v547_v17, %v530_v58 }
 0x1f5   : > { %565 = vrot.lane.b32.xlu0 %v549_v18, %s2300_s19 }
 0x1fa   : > { %v510_v20 = vpop.permute.xlu2 %509 }
 0x1fb   : > { %v512_v21 = vmul.f32 %v510_v20, %v493_v62 }
 0x1fd   : > { %551 = vrot.lane.b32.xlu1 %v512_v21, %s2300_s19 }
 0x202   : > { %v574_v46 = vpop.permute.xlu2 %573 }
 0x203   : > { %v576_v49 = vmul.f32 %v574_v46, %v2474_v23 }
 0x205   : > { %559 = vrot.lane.b32.xlu1 %v506_v14, %s2301_s20  ;;  %v2523_v52 = vadd.f32 %v576_v49, %v570_v29 }
 0x207   : > { %v721_v55 = vrot.slane %v2523_v52, 2 }
 0x267   : > { %v566_v27 = vpop.permute.xlu0 %565 }
 0x268   : > { %v568_v31 = vmul.f32 %v566_v27, %v2474_v23 }
 0x26a   : > { %v2484_v32 = vadd.f32 %v570_v29, %v568_v31 }
 0x26c   : > { %v585_v34 = vmul.f32 %v2484_v32, %v2474_v23  ;;  %v631_v35 = vrot.slane %v2484_v32, 6 }
 0x26e   : > { %587 = vst [vmem:[#allocation1] sm:$0xff] %v585_v34  ;;  %2113 = vmatmul.msk.f32.vlgmr.msrb.gmra.mxu3 %vm375_vm0, %v631_v35 }
 0x26f   : > { %v552_v37 = vpop.permute.xlu1 %551  ;;  %1435 = vmatpush.msrb.mxu3 %v2359_v2 }
 0x270   : > { %v554_v38 = vmul.f32 %v552_v37, %v2480_v26 }
 0x271   : > { %1436 = vmatpush.msrb.mxu3 %v2368_v3 }
 0x272   : > { %v2497_v39 = vadd.f32 %v556_v36, %v554_v38 }
 0x273   : > { %1437 = vmatpush.msrb.mxu3 %v2371_v5 }
 0x274   : > { %v578_v40 = vmul.f32 %v2497_v39, %v2480_v26  ;;  %2112 = vmatmul.msk.f32.vlgmr.msrb.gmra.mxu2 %vm375_vm0, %v2497_v39 }
 0x275   : > { %1407 = vmatpush.msrb.mxu2 %v2381_v7  ;;  %1438 = vmatpush.msrb.mxu3 %v2383_v8 }
 0x276   : > { %v580_v41 = vrot.slane %v578_v40, 1  ;;  %583 = vst.msk [vmem:[%s2503_s27] sm:$0x1] %vm582_vm9, %v578_v40 }
 0x277   : > { %1408 = vmatpush.msrb.mxu2 %v2386_v9  ;;  %v560_v51 = vpop.permute.xlu1 %559 }
 0x278   : > { %584 = vst.msk [vmem:[%s2503_s27 + $0x8] sm:$0x1] %vm582_vm9, %v580_v41  ;;  %v562_v53 = vmul.f32 %v560_v51, %v2480_v26 }
 0x279   : > { %1409 = vmatpush.msrb.mxu2 %v2392_v12 }
 0x27a   : > { %v2528_v56 = vadd.f32 %v562_v53, %v556_v36 }
 0x27b   : > { %1410 = vmatpush.msrb.mxu2 %v2397_v15 }
 0x27c   : > { %v679_v57 = vrot.slane %v2528_v56, 6 }
 0x2f1   : > { %v651_v42 = vpop.f32.mrf.mxu3 }
 0x2f2   : > { %v655_v43 = vrot.slane %v651_v42, 4 }
 0x2f4   : > { %v657_v44 = vadd.f32 %v655_v43, %v2449_v28 }
 0x2f6   : > { %2176 = vtanh.f32 %v657_v44  ;;  %v2115_v61 = vmul.f32 -1.442695, %v657_v44 }
 0x2f7   : > { %v623_v45 = vpop.f32.mrf.mxu2 }
 0x2f8   : > { %v627_v47 = vrot.slane %v623_v45, 6 }
 0x2fa   : > { %v629_v48 = vadd.f32 %v627_v47, %v2454_v30 }
 0x2fc   : > { %v2177_v50 = vpop.eup %2176  ;;  %2178 = vtanh.f32 %v629_v48  ;;  %v2114_v58 = vmul.f32 -1.442695, %v629_v48 }
 0x2fd   : > { %727 = vrot.lane.b32.xlu0 %v2177_v50, %s2299_s18 }
 0x2fe   : > { %2180 = vpow2.f32 %v2114_v58 }
 0x302   : > { %v2179_v54 = vpop.eup %2178 }
 0x303   : > { %685 = vrot.lane.b32.xlu2 %v2179_v54, %s2299_s18 }
 0x304   : > { %v2181_v59 = vpop.eup %2180 }
 0x305   : > { %722 = vrot.lane.b32.xlu0 %v721_v55, %s2300_s19  ;;  %v661_v60 = vadd.f32 1.0, %v2181_v59 }
 0x307   : > { %2182 = vrcp.f32 %v661_v60  ;;  %v673_v11 = vand.u32 2147483648, %v661_v60  ;;  %vm667_vm11 = vweird.f32 %v661_v60  ;;  %v671_v13 = vand.u32 2147483647, %v661_v60 }
 0x308   : > { %2184 = vpow2.f32 %v2115_v61  ;;  %v747_v61 = vrot.slane %v2497_v39, 6 }
 0x309   : > { %v674_v17 = vor.u32 1.1754944e-38, %v673_v11  ;;  %vm672_vm13 = vcmp.eq.f32.partialorder %v671_v13, 8.507059e+37  ;;  %v2555_v11 = vld [vmem:[#allocation1 + $0x7] ss:$9 sm:$0xff] }
 0x30b   : > { %680 = vrot.lane.b32.xlu2 %v679_v57, %s2300_s19 }
 0x30d   : > { %v2183_v62 = vpop.eup %2182 }
 0x30e   : > { %v663_v63 = vmul.f32 %v2183_v62, %v661_v60  ;;  %v2185_v0 = vpop.eup %2184  ;;  %vm668_vm10 = vweird.f32 %v2183_v62 }
 0x30f   : > { %v703_v4 = vadd.f32 1.0, %v2185_v0  ;;  %vm669_vm12 = vmor %vm667_vm11, %vm668_vm10 }
 0x310   : > { %v664_v1 = vsub.f32 1.0, %v663_v63  ;;  %v749_v63 = vmul.f32 %v747_v61, %v2487_v33 }
 0x311   : > { %2186 = vrcp.f32 %v703_v4  ;;  %v715_v35 = vand.u32 2147483648, %v703_v4  ;;  %vm709_vm15 = vweird.f32 %v703_v4  ;;  %v713_v36 = vand.u32 2147483647, %v703_v4 }
 0x312   : > { %v665_v6 = vmul.f32 %v2183_v62, %v664_v1 }
 0x313   : > { %v716_v38 = vor.u32 1.1754944e-38, %v715_v35  ;;  %vm714_vm2 = vcmp.eq.f32.partialorder %v713_v36, 8.507059e+37 }
 0x314   : > { %v666_v10 = vadd.f32 %v2183_v62, %v665_v6 }
 0x316   : > { %v670_v16 = vsel %vm669_vm12, %v2183_v62, %v666_v10  ;;  %v2553_v10 = vld [vmem:[#allocation1 + $0x6] ss:$9 sm:$0xff] }
 0x317   : > { %v2187_v14 = vpop.eup %2186  ;;  %v675_v20 = vsel %vm672_vm13, %v674_v17, %v670_v16 }
 0x318   : > { %v705_v18 = vmul.f32 %v2187_v14, %v703_v4  ;;  %vm710_vm14 = vweird.f32 %v2187_v14 }
 0x319   : > { %vm711_vm1 = vmor %vm709_vm15, %vm710_vm14 }
 0x31a   : > { %v706_v29 = vsub.f32 1.0, %v705_v18 }
 0x31c   : > { %v707_v31 = vmul.f32 %v2187_v14, %v706_v29 }
 0x31e   : > { %v708_v34 = vadd.f32 %v2187_v14, %v707_v31 }
 0x320   : > { %v712_v37 = vsel %vm711_vm1, %v2187_v14, %v708_v34  ;;  %v764_v14 = vrot.slane %v2484_v32, 2  ;;  %v2579_v32 = vpop.f32.mrf.mxu0 }
 0x321   : > { %v717_v41 = vsel %vm714_vm2, %v716_v38, %v712_v37  ;;  %v757_v38 = vmul.f32 %v679_v57, %v2487_v33  ;;  %v774_v57 = vmul.f32 %v721_v55, %v2477_v24 }
 0x322   : > { %v766_v17 = vmul.f32 %v764_v14, %v2477_v24 }
 0x35d   : > { %v686_v21 = vpop.permute.xlu2 %685 }
 0x35e   : > { %v688_v27 = vmul.f32 %v686_v21, %v675_v20 }
 0x360   : > { %690 = vrot.lane.b32.xlu0 %v688_v27, %s2300_s19 }
 0x365   : > { %v681_v44 = vpop.permute.xlu2 %680 }
 0x366   : > { %v683_v45 = vmul.f32 %v681_v44, %v675_v20 }
 0x36f   : > { %v728_v40 = vpop.permute.xlu0 %727 }
 0x370   : > { %v730_v42 = vmul.f32 %v728_v40, %v717_v41 }
 0x372   : > { %732 = vrot.lane.b32.xlu1 %v730_v42, %s2300_s19 }
 0x377   : > { %v723_v43 = vpop.permute.xlu0 %722 }
 0x378   : > { %v725_v49 = vmul.f32 %v723_v43, %v717_v41 }
 0x3d2   : > { %v691_v46 = vpop.permute.xlu0 %690 }
 0x3d3   : > { %v693_v47 = vadd.f32 %v691_v46, %v683_v45 }
 0x3d5   : > { %2188 = vtanh.f32 %v693_v47 }
 0x3db   : > { %v2189_v48 = vpop.eup %2188 }
 0x3dc   : > { %696 = vrot.lane.b32.xlu2 %v2189_v48, %s2299_s18 }
 0x3e4   : > { %v733_v50 = vpop.permute.xlu1 %732 }
 0x3e5   : > { %v735_v51 = vadd.f32 %v733_v50, %v725_v49 }
 0x3e7   : > { %2190 = vtanh.f32 %v735_v51  ;;  %769 = vrot.lane.b32.xlu2 %v735_v51, %s2301_s20 }
 0x3ed   : > { %v2191_v53 = vpop.eup %2190 }
 0x3ee   : > { %738 = vrot.lane.b32.xlu1 %v2191_v53, %s2299_s18 }
 0x436   : > { %v697_v54 = vpop.permute.xlu2 %696 }
 0x437   : > { %v699_v58 = vmul.f32 %v697_v54, %v675_v20 }
 0x439   : > { %743 = vrot.lane.b32.xlu1 %v699_v58, %s2300_s19 }
 0x441   : > { %752 = vrot.lane.b32.xlu1 %v693_v47, %s2301_s20  ;;  %v770_v45 = vpop.permute.xlu2 %769 }
 0x442   : > { %v772_v46 = vmul.f32 %v770_v45, %v2474_v23 }
 0x444   : > { %v2599_v47 = vadd.f32 %v774_v57, %v772_v46 }
 0x446   : > { %v923_v49 = vrot.slane %v2599_v47, 2 }
 0x460   : > { %v739_v59 = vpop.permute.xlu1 %738 }
 0x461   : > { %v741_v60 = vmul.f32 %v739_v59, %v717_v41 }
 0x463   : > { %760 = vrot.lane.b32.xlu0 %v741_v60, %s2300_s19 }
 0x4ab   : > { %v744_v62 = vpop.permute.xlu1 %743 }
 0x4ac   : > { %v746_v0 = vmul.f32 %v744_v62, %v2480_v26 }
 0x4ae   : > { %v2548_v1 = vadd.f32 %v749_v63, %v746_v0 }
 0x4b0   : > { %v776_v4 = vmul.f32 %v2548_v1, %v2480_v26  ;;  %v805_v6 = vrot.slane %v2548_v1, 2 }
 0x4b2   : > { %778 = vst [vmem:[#allocation1] sm:$0xff] %v776_v4  ;;  %2116 = vmatmul.msk.f32.vlgmr.msrb.gmra.mxu0 %vm375_vm0, %v805_v6 }
 0x4b3   : > { %1609 = vmatpush.msrb.mxu0 %v2381_v7  ;;  %v753_v35 = vpop.permute.xlu1 %752 }
 0x4b4   : > { %v755_v36 = vmul.f32 %v753_v35, %v2480_v26 }
 0x4b5   : > { %1610 = vmatpush.msrb.mxu0 %v2386_v9 }
 0x4b6   : > { %v2587_v40 = vadd.f32 %v757_v38, %v755_v36 }
 0x4b7   : > { %1611 = vmatpush.msrb.mxu0 %v2392_v12 }
 0x4b8   : > { %v881_v41 = vrot.slane %v2587_v40, 6 }
 0x4b9   : > { %v780_v39 = vld [vmem:[#allocation1 + $0x2] ss:$9 sm:$0xff]  ;;  %1612 = vmatpush.msrb.mxu0 %v2397_v15 }
 0x4ba   : > { %v782_v13 = vld [vmem:[#allocation1 + $0x3] ss:$9 sm:$0xff]  ;;  %785 = vst.msk [vmem:[%s2503_s27 + $0x1] sm:$0x1] %vm582_vm9, %v780_v39 }
 0x4bb   : > { %786 = vst.msk [vmem:[%s2503_s27 + $0x9] sm:$0x1] %vm582_vm9, %v782_v13 }
 0x4d5   : > { %v761_v16 = vpop.permute.xlu0 %760 }
 0x4d6   : > { %v763_v18 = vmul.f32 %v761_v16, %v2474_v23 }
 0x4d8   : > { %v2569_v20 = vadd.f32 %v766_v17, %v763_v18 }
 0x4da   : > { %v787_v21 = vmul.f32 %v2569_v20, %v2474_v23  ;;  %v833_v27 = vrot.slane %v2569_v20, 4 }
 0x4dc   : > { %789 = vst [vmem:[#allocation1] sm:$0xff] %v787_v21  ;;  %2117 = vmatmul.msk.f32.vlgmr.msrb.gmra.mxu1 %vm375_vm0, %v833_v27 }
 0x4dd   : > { %1637 = vmatpush.msrb.mxu1 %v2359_v2 }
 0x4df   : > { %1638 = vmatpush.msrb.mxu1 %v2368_v3 }
 0x4e1   : > { %1639 = vmatpush.msrb.mxu1 %v2371_v5 }
 0x4e3   : > { %1640 = vmatpush.msrb.mxu1 %v2383_v8 }
 0x52f   : > { %v825_v29 = vpop.f32.mrf.mxu0 }
 0x530   : > { %v829_v31 = vrot.slane %v825_v29, 4 }
 0x532   : > { %v831_v34 = vadd.f32 %v829_v31, %v2454_v30 }
 0x534   : > { %2192 = vtanh.f32 %v831_v34  ;;  %v2118_v48 = vmul.f32 -1.442695, %v831_v34 }
 0x53a   : > { %v2193_v37 = vpop.eup %2192 }
 0x53b   : > { %887 = vrot.lane.b32.xlu2 %v2193_v37, %s2299_s18 }
 0x543   : > { %882 = vrot.lane.b32.xlu2 %v881_v41, %s2300_s19 }
 0x559   : > { %v853_v42 = vpop.f32.mrf.mxu1 }
 0x55a   : > { %v857_v43 = vrot.slane %v853_v42, 6 }
 0x55c   : > { %v859_v44 = vadd.f32 %v857_v43, %v2449_v28 }
 0x55e   : > { %2194 = vtanh.f32 %v859_v44  ;;  %v2119_v6 = vmul.f32 -1.442695, %v859_v44 }
 0x55f   : > { %2196 = vpow2.f32 %v2118_v48 }
 0x564   : > { %v2195_v56 = vpop.eup %2194 }
 0x565   : > { %929 = vrot.lane.b32.xlu0 %v2195_v56, %s2299_s18  ;;  %v2197_v50 = vpop.eup %2196 }
 0x566   : > { %v863_v51 = vadd.f32 1.0, %v2197_v50 }
 0x568   : > { %2198 = vrcp.f32 %v863_v51  ;;  %v875_v59 = vand.u32 2147483648, %v863_v51  ;;  %vm869_vm4 = vweird.f32 %v863_v51  ;;  %v873_v60 = vand.u32 2147483647, %v863_v51 }
 0x569   : > { %2200 = vpow2.f32 %v2119_v6 }
 0x56a   : > { %v876_v62 = vor.u32 1.1754944e-38, %v875_v59  ;;  %vm874_vm6 = vcmp.eq.f32.partialorder %v873_v60, 8.507059e+37 }
 0x56d   : > { %924 = vrot.lane.b32.xlu0 %v923_v49, %s2300_s19 }
 0x56e   : > { %v2199_v53 = vpop.eup %2198 }
 0x56f   : > { %v865_v54 = vmul.f32 %v2199_v53, %v863_v51  ;;  %vm870_vm3 = vweird.f32 %v2199_v53  ;;  %v2201_v39 = vpop.eup %2200 }
 0x570   : > { %vm871_vm5 = vmor %vm869_vm4, %vm870_vm3  ;;  %v905_v13 = vadd.f32 1.0, %v2201_v39  ;;  %v966_v39 = vrot.slane %v2569_v20, 2 }
 0x571   : > { %v866_v58 = vsub.f32 1.0, %v865_v54 }
 0x572   : > { %2202 = vrcp.f32 %v905_v13  ;;  %v917_v27 = vand.u32 2147483648, %v905_v13  ;;  %vm911_vm8 = vweird.f32 %v905_v13  ;;  %v915_v29 = vand.u32 2147483647, %v905_v13 }
 0x573   : > { %v867_v52 = vmul.f32 %v2199_v53, %v866_v58 }
 0x574   : > { %v918_v34 = vor.u32 1.1754944e-38, %v917_v27  ;;  %vm916_vm11 = vcmp.eq.f32.partialorder %v915_v29, 8.507059e+37  ;;  %v959_v29 = vmul.f32 %v881_v41, %v2487_v33 }
 0x575   : > { %v868_v55 = vadd.f32 %v2199_v53, %v867_v52  ;;  %v949_v52 = vrot.slane %v2548_v1, 6 }
 0x577   : > { %v872_v61 = vsel %vm871_vm5, %v2199_v53, %v868_v55  ;;  %v951_v59 = vmul.f32 %v949_v52, %v2487_v33 }
 0x578   : > { %v877_v63 = vsel %vm874_vm6, %v876_v62, %v872_v61  ;;  %v2203_v14 = vpop.eup %2202 }
 0x579   : > { %v907_v16 = vmul.f32 %v2203_v14, %v905_v13  ;;  %vm912_vm7 = vweird.f32 %v2203_v14 }
 0x57a   : > { %vm913_vm10 = vmor %vm911_vm8, %vm912_vm7 }
 0x57b   : > { %v908_v17 = vsub.f32 1.0, %v907_v16 }
 0x57d   : > { %v909_v18 = vmul.f32 %v2203_v14, %v908_v17 }
 0x57f   : > { %v910_v21 = vadd.f32 %v2203_v14, %v909_v18 }
 0x581   : > { %v914_v31 = vsel %vm913_vm10, %v2203_v14, %v910_v21  ;;  %v968_v14 = vmul.f32 %v966_v39, %v2477_v24 }
 0x582   : > { %v919_v36 = vsel %vm916_vm11, %v918_v34, %v914_v31 }
 0x595   : > { %v888_v0 = vpop.permute.xlu2 %887 }
 0x596   : > { %v890_v4 = vmul.f32 %v888_v0, %v877_v63  ;;  %v2621_v0 = vld [vmem:[#allocation1 + $0x4] ss:$9 sm:$0xff] }
 0x598   : > { %892 = vrot.lane.b32.xlu0 %v890_v4, %s2300_s19  ;;  %v2623_v4 = vld [vmem:[#allocation1 + $0x5] ss:$9 sm:$0xff] }
 0x59d   : > { %v883_v42 = vpop.permute.xlu2 %882 }
 0x59e   : > { %v885_v43 = vmul.f32 %v883_v42, %v877_v63  ;;  %v976_v42 = vmul.f32 %v923_v49, %v2477_v24 }
 0x5d7   : > { %v930_v35 = vpop.permute.xlu0 %929 }
 0x5d8   : > { %v932_v37 = vmul.f32 %v930_v35, %v919_v36 }
 0x5da   : > { %934 = vrot.lane.b32.xlu1 %v932_v37, %s2300_s19 }
 0x5df   : > { %v925_v38 = vpop.permute.xlu0 %924 }
 0x5e0   : > { %v927_v56 = vmul.f32 %v925_v38, %v919_v36 }
 0x60a   : > { %v893_v44 = vpop.permute.xlu0 %892 }
 0x60b   : > { %v895_v45 = vadd.f32 %v893_v44, %v885_v43 }
 0x60d   : > { %2204 = vtanh.f32 %v895_v45 }
 0x613   : > { %v2205_v46 = vpop.eup %2204 }
 0x614   : > { %898 = vrot.lane.b32.xlu2 %v2205_v46, %s2299_s18 }
 0x64c   : > { %v935_v57 = vpop.permute.xlu1 %934 }
 0x64d   : > { %v937_v48 = vadd.f32 %v935_v57, %v927_v56 }
 0x64f   : > { %2206 = vtanh.f32 %v937_v48  ;;  %971 = vrot.lane.b32.xlu2 %v937_v48, %s2301_s20 }
 0x655   : > { %v2207_v50 = vpop.eup %2206 }
 0x656   : > { %940 = vrot.lane.b32.xlu1 %v2207_v50, %s2299_s18 }
 0x66e   : > { %v899_v51 = vpop.permute.xlu2 %898 }
 0x66f   : > { %v901_v53 = vmul.f32 %v899_v51, %v877_v63 }
 0x671   : > { %945 = vrot.lane.b32.xlu1 %v901_v53, %s2300_s19 }
 0x679   : > { %954 = vrot.lane.b32.xlu1 %v895_v45, %s2301_s20 }
 0x6a9   : > { %v972_v35 = vpop.permute.xlu2 %971 }
 0x6c8   : > { %v941_v54 = vpop.permute.xlu1 %940 }
 0x6c9   : > { %v943_v58 = vmul.f32 %v941_v54, %v919_v36  ;;  %v974_v36 = vmul.f32 %v972_v35, %v2474_v23 }
 0x6cb   : > { %962 = vrot.lane.b32.xlu0 %v943_v58, %s2300_s19  ;;  %v2667_v43 = vadd.f32 %v976_v42, %v974_v36 }
 0x6cd   : > { %v1122_v45 = vrot.slane %v2667_v43, 2 }
 0x6e3   : > { %v946_v55 = vpop.permute.xlu1 %945 }
 0x6e4   : > { %v948_v60 = vmul.f32 %v946_v55, %v2480_v26 }
 0x6e6   : > { %v2616_v61 = vadd.f32 %v951_v59, %v948_v60 }
 0x6e8   : > { %v978_v62 = vmul.f32 %v2616_v61, %v2480_v26  ;;  %v1007_v63 = vrot.slane %v2616_v61, 4 }
 0x6ea   : > { %2120 = vmatmul.msk.f32.vlgmr.msra.gmra.mxu2 %vm375_vm0, %v1007_v63  ;;  %980 = vst [vmem:[#allocation1] sm:$0xff] %v978_v62 }
 0x6eb   : > { %1811 = vmatpush.msra.mxu2 %v2381_v7  ;;  %v955_v18 = vpop.permute.xlu1 %954 }
 0x6ec   : > { %v957_v21 = vmul.f32 %v955_v18, %v2480_v26 }
 0x6ed   : > { %1812 = vmatpush.msra.mxu2 %v2386_v9 }
 0x6ef   : > { %1813 = vmatpush.msra.mxu2 %v2392_v12 }
 0x6f1   : > { %1814 = vmatpush.msra.mxu2 %v2397_v15  ;;  %v982_v1 = vld [vmem:[#allocation1 + $0x4] ss:$9 sm:$0xff] }
 0x6f2   : > { %v984_v6 = vld [vmem:[#allocation1 + $0x5] ss:$9 sm:$0xff]  ;;  %987 = vst.msk [vmem:[%s2503_s27 + $0x2] sm:$0x1] %vm582_vm9, %v982_v1 }
 0x6f3   : > { %988 = vst.msk [vmem:[%s2503_s27 + $0xa] sm:$0x1] %vm582_vm9, %v984_v6 }
 0x73d   : > { %v963_v13 = vpop.permute.xlu0 %962 }
 0x73e   : > { %v965_v16 = vmul.f32 %v963_v13, %v2474_v23 }
 0x740   : > { %v2637_v7 = vadd.f32 %v968_v14, %v965_v16 }
 0x742   : > { %v989_v9 = vmul.f32 %v2637_v7, %v2474_v23  ;;  %v1035_v12 = vrot.slane %v2637_v7, 2 }
 0x744   : > { %2121 = vmatmul.msk.f32.vlgmr.msra.gmra.mxu3 %vm375_vm0, %v1035_v12  ;;  %991 = vst [vmem:[#allocation1] sm:$0xff] %v989_v9 }
 0x745   : > { %1839 = vmatpush.msra.mxu3 %v2359_v2  ;;  %v2655_v2 = vadd.f32 %v959_v29, %v957_v21 }
 0x747   : > { %1840 = vmatpush.msra.mxu3 %v2368_v3  ;;  %v1080_v3 = vrot.slane %v2655_v2, 6 }
 0x749   : > { %1841 = vmatpush.msra.mxu3 %v2371_v5 }
 0x74b   : > { %1842 = vmatpush.msra.mxu3 %v2383_v8 }
 0x76d   : > { %v1027_v15 = vpop.f32.mrf.mxu2 }
 0x76e   : > { %v1031_v20 = vrot.slane %v1027_v15, 2 }
 0x770   : > { %v1033_v17 = vadd.f32 %v1031_v20, %v2454_v30 }
 0x772   : > { %2208 = vtanh.f32 %v1033_v17  ;;  %v2122_v5 = vmul.f32 -1.442695, %v1033_v17 }
 0x774   : > { %2210 = vpow2.f32 %v2122_v5 }
 0x778   : > { %v2209_v27 = vpop.eup %2208 }
 0x779   : > { %1086 = vrot.lane.b32.xlu2 %v2209_v27, %s2299_s18 }
 0x77a   : > { %v2211_v8 = vpop.eup %2210 }
 0x77b   : > { %v1062_v30 = vadd.f32 1.0, %v2211_v8 }
 0x77d   : > { %2212 = vrcp.f32 %v1062_v30  ;;  %vm1068_vm13 = vweird.f32 %v1062_v30  ;;  %v1072_v56 = vand.u32 2147483647, %v1062_v30 }
 0x77f   : > { %vm1073_vm15 = vcmp.eq.f32.partialorder %v1072_v56, 8.507059e+37 }
 0x781   : > { %1081 = vrot.lane.b32.xlu2 %v1080_v3, %s2300_s19 }
 0x783   : > { %v2213_v34 = vpop.eup %2212 }
 0x784   : > { %v1064_v41 = vmul.f32 %v2213_v34, %v1062_v30  ;;  %vm1069_vm12 = vweird.f32 %v2213_v34 }
 0x785   : > { %vm1070_vm14 = vmor %vm1068_vm13, %vm1069_vm12 }
 0x786   : > { %v1065_v37 = vsub.f32 1.0, %v1064_v41 }
 0x788   : > { %v1066_v44 = vmul.f32 %v2213_v34, %v1065_v37 }
 0x78a   : > { %v1067_v46 = vadd.f32 %v2213_v34, %v1066_v44  ;;  %v2689_v44 = vld [vmem:[#allocation1 + $0x2] ss:$9 sm:$0xff] }
 0x78c   : > { %v1071_v57 = vsel %vm1070_vm14, %v2213_v34, %v1067_v46  ;;  %v2691_v46 = vld [vmem:[#allocation1 + $0x3] ss:$9 sm:$0xff] }
 0x7c7   : > { %v1055_v31 = vpop.f32.mrf.mxu3 }
 0x7c8   : > { %v1058_v40 = vadd.f32 %v1055_v31, %v2449_v28  ;;  %v1074_v28 = vand.u32 2147483648, %v1062_v30 }
 0x7ca   : > { %2214 = vtanh.f32 %v1058_v40  ;;  %v1075_v47 = vor.u32 1.1754944e-38, %v1074_v28  ;;  %v2123_v51 = vmul.f32 -1.442695, %v1058_v40  ;;  %v1148_v40 = vrot.slane %v2616_v61, 6 }
 0x7cc   : > { %v1076_v48 = vsel %vm1073_vm15, %v1075_v47, %v1071_v57  ;;  %2216 = vpow2.f32 %v2123_v51  ;;  %v1150_v35 = vmul.f32 %v1148_v40, %v2487_v33  ;;  %v1166_v57 = vmul.f32 %v1035_v12, %v2477_v24 }
 0x7d0   : > { %v2215_v38 = vpop.eup %2214 }
 0x7d1   : > { %1128 = vrot.lane.b32.xlu0 %v2215_v38, %s2299_s18 }
 0x7d2   : > { %v2217_v53 = vpop.eup %2216 }
 0x7d3   : > { %v1087_v49 = vpop.permute.xlu2 %1086  ;;  %v1104_v54 = vadd.f32 1.0, %v2217_v53 }
 0x7d4   : > { %v1089_v50 = vmul.f32 %v1087_v49, %v1076_v48 }
 0x7d5   : > { %2218 = vrcp.f32 %v1104_v54  ;;  %v1116_v62 = vand.u32 2147483648, %v1104_v54  ;;  %vm1110_vm2 = vweird.f32 %v1104_v54  ;;  %v1114_v63 = vand.u32 2147483647, %v1104_v54 }
 0x7d7   : > { %v1117_v6 = vor.u32 1.1754944e-38, %v1116_v62  ;;  %vm1115_vm4 = vcmp.eq.f32.partialorder %v1114_v63, 8.507059e+37 }
 0x7d9   : > { %1123 = vrot.lane.b32.xlu0 %v1122_v45, %s2300_s19 }
 0x7db   : > { %v2219_v58 = vpop.eup %2218  ;;  %v1082_v9 = vpop.permute.xlu2 %1081 }
 0x7dc   : > { %v1106_v52 = vmul.f32 %v2219_v58, %v1104_v54  ;;  %vm1111_vm1 = vweird.f32 %v2219_v58  ;;  %v1084_v15 = vmul.f32 %v1082_v9, %v1076_v48  ;;  %v1158_v54 = vmul.f32 %v1080_v3, %v2487_v33 }
 0x7dd   : > { %vm1112_vm3 = vmor %vm1110_vm2, %vm1111_vm1 }
 0x7de   : > { %v1107_v55 = vsub.f32 1.0, %v1106_v52 }
 0x7e0   : > { %v1108_v59 = vmul.f32 %v2219_v58, %v1107_v55 }
 0x7e1   : > { %1091 = vrot.lane.b32.xlu0 %v1089_v50, %s2300_s19 }
 0x7e2   : > { %v1109_v60 = vadd.f32 %v2219_v58, %v1108_v59 }
 0x7e4   : > { %v1113_v1 = vsel %vm1112_vm3, %v2219_v58, %v1109_v60 }
 0x7e5   : > { %v1118_v13 = vsel %vm1115_vm4, %v1117_v6, %v1113_v1 }
 0x843   : > { %v1129_v39 = vpop.permute.xlu0 %1128 }
 0x844   : > { %v1131_v14 = vmul.f32 %v1129_v39, %v1118_v13  ;;  %v1174_v39 = vmul.f32 %v1122_v45, %v2477_v24 }
 0x846   : > { %1133 = vrot.lane.b32.xlu1 %v1131_v14, %s2300_s19 }
 0x84b   : > { %v1124_v16 = vpop.permute.xlu0 %1123 }
 0x84c   : > { %v1126_v21 = vmul.f32 %v1124_v16, %v1118_v13 }
 0x853   : > { %v1092_v20 = vpop.permute.xlu0 %1091 }
 0x854   : > { %v1094_v17 = vadd.f32 %v1092_v20, %v1084_v15 }
 0x856   : > { %2220 = vtanh.f32 %v1094_v17 }
 0x85c   : > { %v2221_v18 = vpop.eup %2220 }
 0x85d   : > { %1097 = vrot.lane.b32.xlu2 %v2221_v18, %s2299_s18 }
 0x8b7   : > { %v1098_v8 = vpop.permute.xlu2 %1097 }
 0x8b8   : > { %v1134_v27 = vpop.permute.xlu1 %1133  ;;  %v1100_v30 = vmul.f32 %v1098_v8, %v1076_v48  ;;  %v2711_v48 = vadd.f32 %v2579_v32, %v371_v25 }
 0x8b9   : > { %v1136_v29 = vadd.f32 %v1134_v27, %v1126_v21 }
 0x8bb   : > { %2222 = vtanh.f32 %v1136_v29  ;;  %1169 = vrot.lane.b32.xlu2 %v1136_v29, %s2301_s20 }
 0x8c1   : > { %v2223_v5 = vpop.eup %2222 }
 0x8c2   : > { %1139 = vrot.lane.b32.xlu1 %v2223_v5, %s2299_s18 }
 0x8ca   : > { %1144 = vrot.lane.b32.xlu1 %v1100_v30, %s2300_s19 }
 0x8d2   : > { %1153 = vrot.lane.b32.xlu1 %v1094_v17, %s2301_s20 }
 0x915   : > { %v1170_v62 = vpop.permute.xlu2 %1169 }
 0x916   : > { %v1172_v63 = vmul.f32 %v1170_v62, %v2474_v23 }
 0x934   : > { %v1140_v31 = vpop.permute.xlu1 %1139 }
 0x935   : > { %v1142_v34 = vmul.f32 %v1140_v31, %v1118_v13  ;;  %v2731_v13 = vadd.f32 %v1174_v39, %v1172_v63 }
 0x937   : > { %1161 = vrot.lane.b32.xlu0 %v1142_v34, %s2300_s19  ;;  %v1315_v16 = vrot.slane %v2731_v13, 2 }
 0x93c   : > { %v1145_v41 = vpop.permute.xlu1 %1144 }
 0x93d   : > { %v1147_v36 = vmul.f32 %v1145_v41, %v2480_v26 }
 0x93f   : > { %v2684_v37 = vadd.f32 %v1150_v35, %v1147_v36 }
 0x941   : > { %v1176_v38 = vmul.f32 %v2684_v37, %v2480_v26  ;;  %v1201_v42 = vrot.slane %v2684_v37, 6 }
 0x943   : > { %2124 = vmatmul.msk.f32.vlgmr.msra.gmra.mxu0 %vm375_vm0, %v1201_v42  ;;  %1178 = vst [vmem:[#allocation1] sm:$0xff] %v1176_v38 }
 0x944   : > { %v1154_v53 = vpop.permute.xlu1 %1153 }
 0x945   : > { %v1156_v7 = vmul.f32 %v1154_v53, %v2480_v26 }
 0x947   : > { %v2719_v58 = vadd.f32 %v1158_v54, %v1156_v7 }
 0x949   : > { %v1273_v19 = vrot.slane %v2719_v58, 6 }
 0x94a   : > { %v1180_v61 = vld [vmem:[#allocation1 + $0x6] ss:$9 sm:$0xff] }
 0x94b   : > { %v1182_v28 = vld [vmem:[#allocation1 + $0x7] ss:$9 sm:$0xff]  ;;  %1185 = vst.msk [vmem:[%s2503_s27 + $0x3] sm:$0x1] %vm582_vm9, %v1180_v61 }
 0x94c   : > { %1186 = vst.msk [vmem:[%s2503_s27 + $0xb] sm:$0x1] %vm582_vm9, %v1182_v28 }
 0x9a9   : > { %v1162_v56 = vpop.permute.xlu0 %1161 }
 0x9aa   : > { %v1164_v47 = vmul.f32 %v1162_v56, %v2474_v23 }
 0x9ac   : > { %v2704_v49 = vadd.f32 %v1166_v57, %v1164_v47 }
 0x9ae   : > { %2125 = vmatmul.msk.f32.vlgmr.msra.gmra.mxu1 %vm375_vm0, %v2704_v49 }
 0x9c0   : > { %v1221_v50 = vpop.f32.mrf.mxu0 }
 0x9c1   : > { %v1224_v51 = vadd.f32 %v1221_v50, %v2711_v48 }
 0x9c3   : > { %2224 = vtanh.f32 %v1224_v51  ;;  %v2126_v25 = vmul.f32 -1.442695, %v1224_v51 }
 0x9c5   : > { %2226 = vpow2.f32 %v2126_v25 }
 0x9c9   : > { %v2225_v12 = vpop.eup %2224 }
 0x9ca   : > { %1279 = vrot.lane.b32.xlu2 %v2225_v12, %s2299_s18 }
 0x9cb   : > { %v2227_v32 = vpop.eup %2226 }
 0x9cc   : > { %v1255_v52 = vadd.f32 1.0, %v2227_v32 }
 0x9ce   : > { %2228 = vrcp.f32 %v1255_v52  ;;  %v1267_v15 = vand.u32 2147483648, %v1255_v52  ;;  %vm1261_vm6 = vweird.f32 %v1255_v52  ;;  %v1265_v20 = vand.u32 2147483647, %v1255_v52 }
 0x9d0   : > { %v1268_v43 = vor.u32 1.1754944e-38, %v1267_v15  ;;  %vm1266_vm8 = vcmp.eq.f32.partialorder %v1265_v20, 8.507059e+37 }
 0x9d2   : > { %1274 = vrot.lane.b32.xlu2 %v1273_v19, %s2300_s19 }
 0x9d4   : > { %v2229_v60 = vpop.eup %2228 }
 0x9d5   : > { %v1257_v3 = vmul.f32 %v2229_v60, %v1255_v52  ;;  %vm1262_vm5 = vweird.f32 %v2229_v60 }
 0x9d6   : > { %vm1263_vm7 = vmor %vm1261_vm6, %vm1262_vm5 }
 0x9d7   : > { %v1258_v1 = vsub.f32 1.0, %v1257_v3  ;;  %v1342_v3 = vmul.f32 %v1201_v42, %v2477_v24 }
 0x9d9   : > { %v1259_v14 = vmul.f32 %v2229_v60, %v1258_v1  ;;  %v1357_v1 = vrot.slane %v2704_v49, 2 }
 0x9db   : > { %v1260_v9 = vadd.f32 %v2229_v60, %v1259_v14  ;;  %v1359_v39 = vmul.f32 %v1357_v1, %v2487_v33 }
 0x9dd   : > { %v1264_v17 = vsel %vm1263_vm7, %v2229_v60, %v1260_v9 }
 0x9de   : > { %v1269_v18 = vsel %vm1266_vm8, %v1268_v43, %v1264_v17 }
 0xa24   : > { %v1280_v45 = vpop.permute.xlu2 %1279 }
 0xa25   : > { %v1282_v21 = vmul.f32 %v1280_v45, %v1269_v18 }
 0xa2b   : > { %v1245_v55 = vpop.f32.mrf.mxu1 }
 0xa2c   : > { %v1249_v59 = vrot.slane %v1245_v55, 2  ;;  %v1275_v47 = vpop.permute.xlu2 %1274 }
 0xa2d   : > { %v1277_v50 = vmul.f32 %v1275_v47, %v1269_v18 }
 0xa2e   : > { %v1251_v2 = vadd.f32 %v1249_v59, %v2446_v22 }
 0xa30   : > { %2230 = vtanh.f32 %v1251_v2  ;;  %v2127_v27 = vmul.f32 -1.442695, %v1251_v2 }
 0xa32   : > { %2232 = vpow2.f32 %v2127_v27 }
 0xa36   : > { %v2231_v6 = vpop.eup %2230 }
 0xa37   : > { %1321 = vrot.lane.b32.xlu0 %v2231_v6, %s2299_s18 }
 0xa38   : > { %v2233_v29 = vpop.eup %2232 }
 0xa39   : > { %v1297_v5 = vadd.f32 1.0, %v2233_v29 }
 0xa3b   : > { %2234 = vrcp.f32 %v1297_v5  ;;  %v1309_v41 = vand.u32 2147483648, %v1297_v5  ;;  %vm1303_vm11 = vweird.f32 %v1297_v5  ;;  %v1307_v35 = vand.u32 2147483647, %v1297_v5 }
 0xa3d   : > { %v1310_v38 = vor.u32 1.1754944e-38, %v1309_v41  ;;  %vm1308_vm13 = vcmp.eq.f32.partialorder %v1307_v35, 8.507059e+37 }
 0xa3f   : > { %1316 = vrot.lane.b32.xlu0 %v1315_v16, %s2300_s19 }
 0xa41   : > { %v2235_v8 = vpop.eup %2234 }
 0xa42   : > { %v1299_v30 = vmul.f32 %v2235_v8, %v1297_v5  ;;  %vm1304_vm10 = vweird.f32 %v2235_v8 }
 0xa43   : > { %vm1305_vm12 = vmor %vm1303_vm11, %vm1304_vm10 }
 0xa44   : > { %v1300_v31 = vsub.f32 1.0, %v1299_v30 }
 0xa46   : > { %v1301_v34 = vmul.f32 %v2235_v8, %v1300_v31 }
 0xa47   : > { %1284 = vrot.lane.b32.xlu0 %v1282_v21, %s2300_s19  ;;  %v1350_v21 = vmul.f32 %v1273_v19, %v2477_v24 }
 0xa48   : > { %v1302_v40 = vadd.f32 %v2235_v8, %v1301_v34 }
 0xa4a   : > { %v1306_v36 = vsel %vm1305_vm12, %v2235_v8, %v1302_v40 }
 0xa4b   : > { %v1311_v28 = vsel %vm1308_vm13, %v1310_v38, %v1306_v36  ;;  %v1367_v38 = vmul.f32 %v1315_v16, %v2487_v33 }
 0xaa9   : > { %v1322_v61 = vpop.permute.xlu0 %1321 }
 0xaaa   : > { %v1324_v56 = vmul.f32 %v1322_v61, %v1311_v28 }
 0xaac   : > { %1326 = vrot.lane.b32.xlu1 %v1324_v56, %s2300_s19 }
 0xab1   : > { %v1317_v57 = vpop.permute.xlu0 %1316 }
 0xab2   : > { %v1319_v12 = vmul.f32 %v1317_v57, %v1311_v28 }
 0xab9   : > { %v1285_v51 = vpop.permute.xlu0 %1284 }
 0xaba   : > { %v1287_v53 = vadd.f32 %v1285_v51, %v1277_v50 }
 0xabc   : > { %2236 = vtanh.f32 %v1287_v53 }
 0xac2   : > { %v2237_v7 = vpop.eup %2236 }
 0xac3   : > { %1290 = vrot.lane.b32.xlu2 %v2237_v7, %s2299_s18 }
 0xb1d   : > { %v1291_v52 = vpop.permute.xlu2 %1290 }
 0xb1e   : > { %v1327_v54 = vpop.permute.xlu1 %1326  ;;  %v1293_v55 = vmul.f32 %v1291_v52, %v1269_v18 }
 0xb1f   : > { %v1329_v25 = vadd.f32 %v1327_v54, %v1319_v12 }
 0xb21   : > { %2238 = vtanh.f32 %v1329_v25  ;;  %1362 = vrot.lane.b32.xlu2 %v1329_v25, %s2301_s20 }
 0xb27   : > { %v2239_v32 = vpop.eup %2238 }
 0xb28   : > { %1332 = vrot.lane.b32.xlu1 %v2239_v32, %s2299_s18 }
 0xb30   : > { %1337 = vrot.lane.b32.xlu1 %v1293_v55, %s2300_s19 }
 0xb38   : > { %1345 = vrot.lane.b32.xlu1 %v1287_v53, %s2301_s20 }
 0xb7b   : > { %v1363_v40 = vpop.permute.xlu2 %1362 }
 0xb7c   : > { %v1365_v41 = vmul.f32 %v1363_v40, %v2480_v26 }
 0xb7e   : > { %v2780_v61 = vadd.f32 %v1367_v38, %v1365_v41 }
 0xb80   : > { %v1510_v56 = vrot.slane %v2780_v61, 2 }
 0xb9a   : > { %v1333_v59 = vpop.permute.xlu1 %1332 }
 0xb9b   : > { %v1335_v60 = vmul.f32 %v1333_v59, %v1311_v28 }
 0xb9d   : > { %1353 = vrot.lane.b32.xlu0 %v1335_v60, %s2300_s19 }
 0xba2   : > { %v1338_v2 = vpop.permute.xlu1 %1337 }
 0xba3   : > { %v1340_v62 = vmul.f32 %v1338_v2, %v2474_v23 }
 0xba5   : > { %v2749_v63 = vadd.f32 %v1342_v3, %v1340_v62 }
 0xba7   : > { %2128 = vmatmul.msk.f32.vlgmr.msrb.gmra.mxu2 %vm375_vm0, %v2749_v63 }
 0xbaa   : > { %v1346_v43 = vpop.permute.xlu1 %1345 }
 0xbab   : > { %v1348_v45 = vmul.f32 %v1346_v43, %v2474_v23 }
 0xbad   : > { %v2768_v27 = vadd.f32 %v1350_v21, %v1348_v45 }
 0xbaf   : > { %v1468_v29 = vrot.slane %v2768_v27, 6 }
 0xc0f   : > { %v1354_v6 = vpop.permute.xlu0 %1353 }
 0xc10   : > { %v1356_v14 = vmul.f32 %v1354_v6, %v2480_v26 }
 0xc12   : > { %v2756_v9 = vadd.f32 %v1359_v39, %v1356_v14 }
 0xc14   : > { %v1375_v37 = vmul.f32 %v2756_v9, %v2480_v26  ;;  %v1420_v42 = vrot.slane %v2756_v9, 6 }
 0xc16   : > { %2129 = vmatmul.msk.f32.vlgmr.msrb.gmra.mxu3 %vm375_vm0, %v1420_v42  ;;  %1377 = vst [vmem:[#allocation1] sm:$0xff] %v1375_v37 }
 0xc1d   : > { %v2805_v38 = vld [vmem:[#allocation1 + $0x6] ss:$9 sm:$0xff] }
 0xc2a   : > { %v1412_v15 = vpop.f32.mrf.mxu2 }
 0xc2b   : > { %v1416_v20 = vrot.slane %v1412_v15, 6 }
 0xc2d   : > { %v1418_v17 = vadd.f32 %v1416_v20, %v2711_v48 }
 0xc2f   : > { %2240 = vtanh.f32 %v1418_v17  ;;  %v2130_v5 = vmul.f32 -1.442695, %v1418_v17 }
 0xc31   : > { %2242 = vpow2.f32 %v2130_v5 }
 0xc35   : > { %v2241_v18 = vpop.eup %2240 }
 0xc36   : > { %1474 = vrot.lane.b32.xlu2 %v2241_v18, %s2299_s18 }
 0xc37   : > { %v2243_v8 = vpop.eup %2242 }
 0xc38   : > { %v1450_v30 = vadd.f32 1.0, %v2243_v8 }
 0xc3a   : > { %2244 = vrcp.f32 %v1450_v30  ;;  %v1462_v47 = vand.u32 2147483648, %v1450_v30  ;;  %vm1456_vm15 = vweird.f32 %v1450_v30  ;;  %v1460_v50 = vand.u32 2147483647, %v1450_v30 }
 0xc3c   : > { %v1463_v13 = vor.u32 1.1754944e-38, %v1462_v47  ;;  %vm1461_vm2 = vcmp.eq.f32.partialorder %v1460_v50, 8.507059e+37 }
 0xc3e   : > { %1469 = vrot.lane.b32.xlu2 %v1468_v29, %s2300_s19 }
 0xc40   : > { %v2245_v34 = vpop.eup %2244 }
 0xc41   : > { %v1452_v19 = vmul.f32 %v2245_v34, %v1450_v30  ;;  %vm1457_vm14 = vweird.f32 %v2245_v34 }
 0xc42   : > { %vm1458_vm1 = vmor %vm1456_vm15, %vm1457_vm14 }
 0xc43   : > { %v1453_v35 = vsub.f32 1.0, %v1452_v19  ;;  %v2797_v19 = vld [vmem:[%s2471_s24 + $0x8] sm:$0xff] }
 0xc45   : > { %v1454_v28 = vmul.f32 %v2245_v34, %v1453_v35 }
 0xc47   : > { %v1455_v57 = vadd.f32 %v2245_v34, %v1454_v28  ;;  %v2807_v28 = vld [vmem:[#allocation1 + $0x7] ss:$9 sm:$0xff] }
 0xc49   : > { %v1459_v26 = vsel %vm1458_vm1, %v2245_v34, %v1455_v57  ;;  %v1553_v57 = vrot.slane %v2756_v9, 2 }
 0xc4a   : > { %v1464_v51 = vsel %vm1461_vm2, %v1463_v13, %v1459_v26  ;;  %v2813_v26 = vld [vmem:[%s2471_s24] sm:$0xff] }
 0xc4b   : > { %v1555_v50 = vmul.f32 %v1553_v57, %v2487_v33 }
 0xc90   : > { %v1475_v16 = vpop.permute.xlu2 %1474 }
 0xc91   : > { %v1477_v53 = vmul.f32 %v1475_v16, %v1464_v51 }
 0xc98   : > { %v1470_v37 = vpop.permute.xlu2 %1469 }
 0xc99   : > { %v1440_v23 = vpop.f32.mrf.mxu3  ;;  %v1472_v42 = vmul.f32 %v1470_v37, %v1464_v51 }
 0xc9a   : > { %v1444_v31 = vrot.slane %v1440_v23, 4 }
 0xc9c   : > { %v1446_v58 = vadd.f32 %v1444_v31, %v2446_v22  ;;  %v1536_v31 = vrot.slane %v2749_v63, 6 }
 0xc9e   : > { %2246 = vtanh.f32 %v1446_v58  ;;  %v2131_v7 = vmul.f32 -1.442695, %v1446_v58  ;;  %v1538_v58 = vmul.f32 %v1536_v31, %v2477_v24 }
 0xca0   : > { %2248 = vpow2.f32 %v2131_v7 }
 0xca4   : > { %v2247_v36 = vpop.eup %2246 }
 0xca5   : > { %1516 = vrot.lane.b32.xlu0 %v2247_v36, %s2299_s18 }
 0xca6   : > { %v2249_v12 = vpop.eup %2248 }
 0xca7   : > { %v1492_v54 = vadd.f32 1.0, %v2249_v12 }
 0xca9   : > { %2250 = vrcp.f32 %v1492_v54  ;;  %v1504_v60 = vand.u32 2147483648, %v1492_v54  ;;  %vm1498_vm4 = vweird.f32 %v1492_v54  ;;  %v1502_v2 = vand.u32 2147483647, %v1492_v54 }
 0xcab   : > { %v1505_v62 = vor.u32 1.1754944e-38, %v1504_v60  ;;  %vm1503_vm6 = vcmp.eq.f32.partialorder %v1502_v2, 8.507059e+37 }
 0xcad   : > { %1511 = vrot.lane.b32.xlu0 %v1510_v56, %s2300_s19 }
 0xcaf   : > { %v2251_v25 = vpop.eup %2250 }
 0xcb0   : > { %v1494_v32 = vmul.f32 %v2251_v25, %v1492_v54  ;;  %vm1499_vm3 = vweird.f32 %v2251_v25 }
 0xcb1   : > { %vm1500_vm5 = vmor %vm1498_vm4, %vm1499_vm3 }
 0xcb2   : > { %v1495_v52 = vsub.f32 1.0, %v1494_v32 }
 0xcb4   : > { %v1496_v55 = vmul.f32 %v2251_v25, %v1495_v52 }
 0xcb5   : > { %1479 = vrot.lane.b32.xlu0 %v1477_v53, %s2300_s19 }
 0xcb6   : > { %v1497_v59 = vadd.f32 %v2251_v25, %v1496_v55 }
 0xcb8   : > { %v1501_v3 = vsel %vm1500_vm5, %v2251_v25, %v1497_v59  ;;  %v1546_v59 = vmul.f32 %v1468_v29, %v2477_v24 }
 0xcb9   : > { %v1506_v6 = vsel %vm1503_vm6, %v1505_v62, %v1501_v3 }
 0xd17   : > { %v1517_v1 = vpop.permute.xlu0 %1516 }
 0xd18   : > { %v1519_v39 = vmul.f32 %v1517_v1, %v1506_v6 }
 0xd1a   : > { %1521 = vrot.lane.b32.xlu1 %v1519_v39, %s2300_s19 }
 0xd1f   : > { %v1512_v14 = vpop.permute.xlu0 %1511 }
 0xd20   : > { %v1514_v43 = vmul.f32 %v1512_v14, %v1506_v6 }
 0xd27   : > { %v1480_v15 = vpop.permute.xlu0 %1479 }
 0xd28   : > { %v1482_v20 = vadd.f32 %v1480_v15, %v1472_v42 }
 0xd2a   : > { %2252 = vtanh.f32 %v1482_v20 }
 0xd30   : > { %v2253_v17 = vpop.eup %2252 }
 0xd31   : > { %1485 = vrot.lane.b32.xlu2 %v2253_v17, %s2299_s18  ;;  %v1563_v17 = vmul.f32 %v1510_v56, %v2487_v33 }
 0xd8b   : > { %v1486_v5 = vpop.permute.xlu2 %1485 }
 0xd8c   : > { %v1522_v45 = vpop.permute.xlu1 %1521  ;;  %v1488_v8 = vmul.f32 %v1486_v5, %v1464_v51 }
 0xd8d   : > { %v1524_v18 = vadd.f32 %v1522_v45, %v1514_v43 }
 0xd8f   : > { %2254 = vtanh.f32 %v1524_v18  ;;  %1558 = vrot.lane.b32.xlu2 %v1524_v18, %s2301_s20 }
 0xd95   : > { %v2255_v21 = vpop.eup %2254 }
 0xd96   : > { %1527 = vrot.lane.b32.xlu1 %v2255_v21, %s2299_s18 }
 0xd9e   : > { %1532 = vrot.lane.b32.xlu1 %v1488_v8, %s2300_s19 }
 0xda6   : > { %1541 = vrot.lane.b32.xlu1 %v1482_v20, %s2301_s20 }
 0xde9   : > { %v1559_v37 = vpop.permute.xlu2 %1558 }
 0xdea   : > { %v1561_v42 = vmul.f32 %v2813_v26, %v1559_v37 }
 0xdec   : > { %v2844_v43 = vadd.f32 %v1563_v17, %v1561_v42 }
 0xdee   : > { %v1712_v18 = vrot.slane %v2844_v43, 2 }
 0xe08   : > { %v1528_v30 = vpop.permute.xlu1 %1527 }
 0xe09   : > { %v1530_v23 = vmul.f32 %v1528_v30, %v1506_v6 }
 0xe0b   : > { %1549 = vrot.lane.b32.xlu0 %v1530_v23, %s2300_s19 }
 0xe10   : > { %v1533_v34 = vpop.permute.xlu1 %1532 }
 0xe11   : > { %v1535_v40 = vmul.f32 %v2797_v19, %v1533_v34 }
 0xe13   : > { %v2800_v41 = vadd.f32 %v1538_v58, %v1535_v40 }
 0xe15   : > { %v1565_v35 = vmul.f32 %v2797_v19, %v2800_v41  ;;  %v1594_v36 = vrot.slane %v2800_v41, 2 }
 0xe17   : > { %2132 = vmatmul.msk.f32.vlgmr.msrb.gmra.mxu0 %vm375_vm0, %v1594_v36  ;;  %1567 = vst [vmem:[#allocation1] sm:$0xff] %v1565_v35 }
 0xe18   : > { %v1542_v32 = vpop.permute.xlu1 %1541 }
 0xe19   : > { %v1544_v52 = vmul.f32 %v2797_v19, %v1542_v32 }
 0xe1b   : > { %v2832_v60 = vadd.f32 %v1546_v59, %v1544_v52 }
 0xe1d   : > { %v1670_v2 = vrot.slane %v2832_v60, 6 }
 0xe1e   : > { %v2821_v7 = vld [vmem:[#allocation1 + $0x2] ss:$9 sm:$0xff] }
 0xe1f   : > { %v2823_v12 = vld [vmem:[#allocation1 + $0x3] ss:$9 sm:$0xff] }
 0xe7d   : > { %v1550_v47 = vpop.permute.xlu0 %1549 }
 0xe7e   : > { %v1552_v13 = vmul.f32 %v2813_v26, %v1550_v47 }
 0xe80   : > { %v2816_v16 = vadd.f32 %v1555_v50, %v1552_v13 }
 0xe82   : > { %v1576_v51 = vmul.f32 %v2813_v26, %v2816_v16  ;;  %v1622_v53 = vrot.slane %v2816_v16, 4 }
 0xe84   : > { %2133 = vmatmul.msk.f32.vlgmr.msrb.gmra.mxu1 %vm375_vm0, %v1622_v53  ;;  %1578 = vst [vmem:[#allocation1] sm:$0xff] %v1576_v51 }
 0xe94   : > { %v1614_v9 = vpop.f32.mrf.mxu0 }
 0xe95   : > { %v1618_v54 = vrot.slane %v1614_v9, 4 }
 0xe97   : > { %v1620_v25 = vadd.f32 %v1618_v54, %v2711_v48 }
 0xe99   : > { %2256 = vtanh.f32 %v1620_v25  ;;  %v2134_v3 = vmul.f32 -1.442695, %v1620_v25 }
 0xe9b   : > { %2258 = vpow2.f32 %v2134_v3 }
 0xe9f   : > { %v2257_v55 = vpop.eup %2256 }
 0xea0   : > { %1676 = vrot.lane.b32.xlu2 %v2257_v55, %s2299_s18 }
 0xea1   : > { %v2259_v62 = vpop.eup %2258 }
 0xea2   : > { %v1652_v1 = vadd.f32 1.0, %v2259_v62 }
 0xea4   : > { %2260 = vrcp.f32 %v1652_v1  ;;  %v1664_v5 = vand.u32 2147483648, %v1652_v1  ;;  %vm1658_vm8 = vweird.f32 %v1652_v1  ;;  %v1662_v8 = vand.u32 2147483647, %v1652_v1 }
 0xea6   : > { %v1665_v61 = vor.u32 1.1754944e-38, %v1664_v5  ;;  %vm1663_vm11 = vcmp.eq.f32.partialorder %v1662_v8, 8.507059e+37 }
 0xea8   : > { %1671 = vrot.lane.b32.xlu2 %v1670_v2, %s2300_s19 }
 0xeaa   : > { %v2261_v14 = vpop.eup %2260 }
 0xeab   : > { %v1654_v29 = vmul.f32 %v2261_v14, %v1652_v1  ;;  %vm1659_vm7 = vweird.f32 %v2261_v14 }
 0xeac   : > { %vm1660_vm10 = vmor %vm1658_vm8, %vm1659_vm7  ;;  %vm600_vm8 = vcmask 516352  }
 0xead   : > { %v1655_v15 = vsub.f32 1.0, %v1654_v29 }
 0xeaf   : > { %v1656_v45 = vmul.f32 %v2261_v14, %v1655_v15 }
 0xeb1   : > { %v1657_v21 = vadd.f32 %v2261_v14, %v1656_v45 }
 0xeb3   : > { %v1661_v30 = vsel %vm1660_vm10, %v2261_v14, %v1657_v21 }
 0xeb4   : > { %v1666_v23 = vsel %vm1663_vm11, %v1665_v61, %v1661_v30  ;;  %v2866_v61 = vld [vmem:[#allocation1 + $0x4] ss:$9 sm:$0xff] }
 0xefa   : > { %v1677_v56 = vpop.permute.xlu2 %1676 }
 0xefb   : > { %v1679_v31 = vmul.f32 %v1677_v56, %v1666_v23  ;;  %v2868_v56 = vld [vmem:[#allocation1 + $0x5] ss:$9 sm:$0xff] }
 0xf01   : > { %v1642_v6 = vpop.f32.mrf.mxu1 }
 0xf02   : > { %v1646_v39 = vrot.slane %v1642_v6, 6  ;;  %v1672_v55 = vpop.permute.xlu2 %1671 }
 0xf03   : > { %v1674_v59 = vmul.f32 %v1672_v55, %v1666_v23 }
 0xf04   : > { %v1648_v27 = vadd.f32 %v1646_v39, %v2446_v22 }
 0xf06   : > { %2262 = vtanh.f32 %v1648_v27  ;;  %v2135_v34 = vmul.f32 -1.442695, %v1648_v27 }
 0xf08   : > { %2264 = vpow2.f32 %v2135_v34 }
 0xf0c   : > { %v2263_v20 = vpop.eup %2262 }
 0xf0d   : > { %1718 = vrot.lane.b32.xlu0 %v2263_v20, %s2299_s18  ;;  %v1738_v20 = vrot.slane %v2800_v41, 6  ;;  %v1755_v41 = vrot.slane %v2816_v16, 2 }
 0xf0e   : > { %v2265_v58 = vpop.eup %2264 }
 0xf0f   : > { %v1694_v40 = vadd.f32 1.0, %v2265_v58  ;;  %v1740_v45 = vmul.f32 %v1738_v20, %v2477_v24 }
 0xf11   : > { %2266 = vrcp.f32 %v1694_v40  ;;  %v1706_v13 = vand.u32 2147483648, %v1694_v40  ;;  %vm1700_vm13 = vweird.f32 %v1694_v40  ;;  %v1704_v51 = vand.u32 2147483647, %v1694_v40 }
 0xf13   : > { %v1707_v9 = vor.u32 1.1754944e-38, %v1706_v13  ;;  %vm1705_vm15 = vcmp.eq.f32.partialorder %v1704_v51, 8.507059e+37 }
 0xf15   : > { %1713 = vrot.lane.b32.xlu0 %v1712_v18, %s2300_s19 }
 0xf17   : > { %v2267_v35 = vpop.eup %2266 }
 0xf18   : > { %v1696_v36 = vmul.f32 %v2267_v35, %v1694_v40  ;;  %vm1701_vm12 = vweird.f32 %v2267_v35 }
 0xf19   : > { %vm1702_vm14 = vmor %vm1700_vm13, %vm1701_vm12 }
 0xf1a   : > { %v1697_v57 = vsub.f32 1.0, %v1696_v36 }
 0xf1c   : > { %v1698_v47 = vmul.f32 %v2267_v35, %v1697_v57 }
 0xf1d   : > { %1681 = vrot.lane.b32.xlu0 %v1679_v31, %s2300_s19  ;;  %v1757_v31 = vmul.f32 %v1755_v41, %v2487_v33 }
 0xf1e   : > { %v1699_v50 = vadd.f32 %v2267_v35, %v1698_v47 }
 0xf20   : > { %v1703_v53 = vsel %vm1702_vm14, %v2267_v35, %v1699_v50 }
 0xf21   : > { %v1708_v25 = vsel %vm1705_vm15, %v1707_v9, %v1703_v53  ;;  %v1748_v9 = vmul.f32 %v1670_v2, %v2477_v24 }
 0xf7f   : > { %v1719_v54 = vpop.permute.xlu0 %1718 }
 0xf80   : > { %v1721_v32 = vmul.f32 %v1719_v54, %v1708_v25 }
 0xf82   : > { %1723 = vrot.lane.b32.xlu1 %v1721_v32, %s2300_s19 }
 0xf87   : > { %v1714_v52 = vpop.permute.xlu0 %1713 }
 0xf88   : > { %v1716_v6 = vmul.f32 %v1714_v52, %v1708_v25 }
 0xf8f   : > { %v1682_v3 = vpop.permute.xlu0 %1681 }
 0xf90   : > { %v1684_v62 = vadd.f32 %v1682_v3, %v1674_v59 }
 0xf92   : > { %2268 = vtanh.f32 %v1684_v62 }
 0xf98   : > { %v2269_v1 = vpop.eup %2268 }
 0xf99   : > { %1687 = vrot.lane.b32.xlu2 %v2269_v1, %s2299_s18 }
 0xff3   : > { %v1688_v29 = vpop.permute.xlu2 %1687 }
 0xff4   : > { %v1724_v39 = vpop.permute.xlu1 %1723  ;;  %v1690_v37 = vmul.f32 %v1688_v29, %v1666_v23 }
 0xff5   : > { %v1726_v14 = vadd.f32 %v1724_v39, %v1716_v6  ;;  %v1765_v39 = vmul.f32 %v1712_v18, %v2487_v33 }
 0xff7   : > { %2270 = vtanh.f32 %v1726_v14  ;;  %1760 = vrot.lane.b32.xlu2 %v1726_v14, %s2301_s20 }
 0xffd   : > { %v2271_v27 = vpop.eup %2270 }
 0xffe   : > { %1729 = vrot.lane.b32.xlu1 %v2271_v27, %s2299_s18 }
0x1006   : > { %1734 = vrot.lane.b32.xlu1 %v1690_v37, %s2300_s19 }
0x100e   : > { %1743 = vrot.lane.b32.xlu1 %v1684_v62, %s2301_s20 }
0x1051   : > { %v1761_v1 = vpop.permute.xlu2 %1760 }
0x1052   : > { %v1763_v60 = vmul.f32 %v2813_v26, %v1761_v1  ;;  %v1383_v1 = vperm.slane %v2807_v28, 0 }
0x1054   : > { %v1766_v14 = vadd.f32 %v1765_v39, %v1763_v60 }
0x1056   : > { %v1911_v29 = vrot.slane %v1766_v14, 2 }
0x1070   : > { %v1730_v42 = vpop.permute.xlu1 %1729 }
0x1071   : > { %v1732_v15 = vmul.f32 %v1730_v42, %v1708_v25 }
0x1073   : > { %1751 = vrot.lane.b32.xlu0 %v1732_v15, %s2300_s19 }
0x1078   : > { %v1735_v17 = vpop.permute.xlu1 %1734 }
0x1079   : > { %v1737_v21 = vmul.f32 %v2797_v19, %v1735_v17 }
0x107b   : > { %v2861_v5 = vadd.f32 %v1740_v45, %v1737_v21 }
0x107d   : > { %v1767_v8 = vmul.f32 %v2797_v19, %v2861_v5  ;;  %v1796_v30 = vrot.slane %v2861_v5, 4 }
0x107f   : > { %2136 = vmatmul.msk.f32.vlgmr.msra.gmra.mxu2 %vm375_vm0, %v1796_v30  ;;  %1769 = vst [vmem:[#allocation1] sm:$0xff] %v1767_v8 }
0x1080   : > { %v1744_v13 = vpop.permute.xlu1 %1743 }
0x1081   : > { %v1746_v51 = vmul.f32 %v2797_v19, %v1744_v13 }
0x1083   : > { %v1749_v54 = vadd.f32 %v1748_v9, %v1746_v51 }
0x1085   : > { %v1869_v25 = vrot.slane %v1749_v54, 6 }
0x1086   : > { %v2879_v36 = vld [vmem:[#allocation1 + $0x4] ss:$9 sm:$0xff] }
0x1087   : > { %v2881_v57 = vld [vmem:[#allocation1 + $0x5] ss:$9 sm:$0xff] }
0x10e5   : > { %v1752_v23 = vpop.permute.xlu0 %1751 }
0x10e6   : > { %v1754_v34 = vmul.f32 %v2813_v26, %v1752_v23 }
0x10e8   : > { %v2874_v58 = vadd.f32 %v1757_v31, %v1754_v34 }
0x10ea   : > { %v1778_v40 = vmul.f32 %v2813_v26, %v2874_v58  ;;  %v1824_v35 = vrot.slane %v2874_v58, 2 }
0x10ec   : > { %2137 = vmatmul.msk.f32.vlgmr.msra.gmra.mxu3 %vm375_vm0, %v1824_v35  ;;  %1780 = vst [vmem:[#allocation1] sm:$0xff] %v1778_v40 }
0x10f3   : > { %v1782_v60 = vld [vmem:[#allocation1 + $0x2] ss:$9 sm:$0xff] }
0x1102   : > { %v1816_v16 = vpop.f32.mrf.mxu2 }
0x1103   : > { %v1820_v47 = vrot.slane %v1816_v16, 2 }
0x1105   : > { %v1822_v50 = vadd.f32 %v1820_v47, %v2711_v48 }
0x1107   : > { %2272 = vtanh.f32 %v1822_v50  ;;  %v2138_v32 = vmul.f32 -1.442695, %v1822_v50 }
0x1109   : > { %2274 = vpow2.f32 %v2138_v32 }
0x110d   : > { %v2273_v53 = vpop.eup %2272 }
0x110e   : > { %1875 = vrot.lane.b32.xlu2 %v2273_v53, %s2299_s18 }
0x110f   : > { %v2275_v52 = vpop.eup %2274 }
0x1110   : > { %v1851_v55 = vadd.f32 1.0, %v2275_v52 }
0x1112   : > { %2276 = vrcp.f32 %v1851_v55  ;;  %v1863_v42 = vand.u32 2147483648, %v1851_v55  ;;  %vm1857_vm1 = vweird.f32 %v1851_v55 }
0x1114   : > { %v1864_v20 = vor.u32 1.1754944e-38, %v1863_v42  ;;  %v794_v42 = vperm.slane %v2621_v0, 0  ;;  %v1584_v0 = vperm.slane %v2868_v56, 0 }
0x1116   : > { %1870 = vrot.lane.b32.xlu2 %v1869_v25, %s2300_s19 }
0x1118   : > { %v2277_v59 = vpop.eup %2276 }
0x1119   : > { %v1853_v62 = vmul.f32 %v2277_v59, %v1851_v55  ;;  %vm1858_vm0 = vweird.f32 %v2277_v59 }
0x111a   : > { %vm1859_vm2 = vmor %vm1857_vm1, %vm1858_vm0 }
0x111b   : > { %v1854_v2 = vsub.f32 1.0, %v1853_v62 }
0x111d   : > { %v1855_v27 = vmul.f32 %v2277_v59, %v1854_v2 }
0x111f   : > { %v1856_v37 = vadd.f32 %v2277_v59, %v1855_v27 }
0x1121   : > { %v1860_v15 = vsel %vm1859_vm2, %v2277_v59, %v1856_v37  ;;  %v795_v59 = vperm.slane %v2623_v4, 0 }
0x1168   : > { %v1876_v17 = vpop.permute.xlu2 %1875 }
0x116f   : > { %v1844_v48 = vpop.f32.mrf.mxu3 }
0x1170   : > { %v1847_v3 = vadd.f32 %v1844_v48, %v2446_v22  ;;  %v1861_v22 = vand.u32 2147483647, %v1851_v55  ;;  %v1871_v54 = vpop.permute.xlu2 %1870  ;;  %v592_v48 = vperm.slane %v2553_v10, 0  ;;  %v1785_v10 = vperm.slane %v1782_v60, 0 }
0x1172   : > { %2278 = vtanh.f32 %v1847_v3  ;;  %vm1862_vm3 = vcmp.eq.f32.partialorder %v1861_v22, 8.507059e+37  ;;  %v2139_v18 = vmul.f32 -1.442695, %v1847_v3  ;;  %v1187_v3 = vmul.f32 %v2797_v19, %v2704_v49 }
0x1173   : > { %v1865_v45 = vsel %vm1862_vm3, %v1864_v20, %v1860_v15 }
0x1174   : > { %v1878_v43 = vmul.f32 %v1876_v17, %v1865_v45  ;;  %2280 = vpow2.f32 %v2139_v18  ;;  %v1873_v25 = vmul.f32 %v1871_v54, %v1865_v45  ;;  %v1190_v62 = vperm.slane %v1187_v3, 0 }
0x1175   : > { %v593_v18 = vperm.slane %v2555_v11, 0 }
0x1178   : > { %v2279_v6 = vpop.eup %2278 }
0x1179   : > { %1917 = vrot.lane.b32.xlu0 %v2279_v6, %s2299_s18 }
0x117a   : > { %v2281_v21 = vpop.eup %2280 }
0x117b   : > { %v1893_v8 = vadd.f32 1.0, %v2281_v21 }
0x117d   : > { %2282 = vrcp.f32 %v1893_v8  ;;  %v1905_v40 = vand.u32 2147483648, %v1893_v8  ;;  %vm1899_vm5 = vweird.f32 %v1893_v8  ;;  %v1903_v16 = vand.u32 2147483647, %v1893_v8 }
0x117f   : > { %v1906_v50 = vor.u32 1.1754944e-38, %v1905_v40  ;;  %vm1904_vm7 = vcmp.eq.f32.partialorder %v1903_v16, 8.507059e+37 }
0x1181   : > { %1912 = vrot.lane.b32.xlu0 %v1911_v29, %s2300_s19  ;;  %v2924_v29 = vmul.f32 %v2797_v19, %v2749_v63  ;;  %v1382_v63 = vperm.slane %v2805_v38, 0 }
0x1183   : > { %v2283_v30 = vpop.eup %2282 }
0x1184   : > { %v1895_v41 = vmul.f32 %v2283_v30, %v1893_v8  ;;  %vm1900_vm4 = vweird.f32 %v2283_v30  ;;  %v1784_v8 = vld [vmem:[#allocation1 + $0x3] ss:$9 sm:$0xff] }
0x1185   : > { %vm1901_vm6 = vmor %vm1899_vm5, %vm1900_vm4 }
0x1186   : > { %v1896_v23 = vsub.f32 1.0, %v1895_v41 }
0x1188   : > { %v1897_v31 = vmul.f32 %v2283_v30, %v1896_v23 }
0x1189   : > { %1880 = vrot.lane.b32.xlu0 %v1878_v43, %s2300_s19 }
0x118a   : > { %v1898_v34 = vadd.f32 %v2283_v30, %v1897_v31  ;;  %v1786_v31 = vperm.slane %v1784_v8, 0 }
0x118c   : > { %v1902_v47 = vsel %vm1901_vm6, %v2283_v30, %v1898_v34 }
0x118d   : > { %v1907_v51 = vsel %vm1904_vm7, %v1906_v50, %v1902_v47 }
0x11eb   : > { %v1918_v13 = vpop.permute.xlu0 %1917 }
0x11ec   : > { %v1920_v53 = vmul.f32 %v1918_v13, %v1907_v51 }
0x11ee   : > { %1922 = vrot.lane.b32.xlu1 %v1920_v53, %s2300_s19 }
0x11f3   : > { %v1913_v9 = vpop.permute.xlu0 %1912 }
0x11f4   : > { %v1915_v4 = vmul.f32 %v1913_v9, %v1907_v51 }
0x11fb   : > { %v1881_v32 = vpop.permute.xlu0 %1880 }
0x11fc   : > { %v1883_v52 = vadd.f32 %v1881_v32, %v1873_v25 }
0x11fe   : > { %2284 = vtanh.f32 %v1883_v52 }
0x1204   : > { %v2285_v55 = vpop.eup %2284 }
0x1205   : > { %1886 = vrot.lane.b32.xlu2 %v2285_v55, %s2299_s18 }
0x120d   : > { %594 = vrot.lane.b32.xlu2 %v592_v48, %s2300_s19 }
0x1215   : > { %798 = vrot.lane.b32.xlu2 %v795_v59, %s2300_s19 }
0x121d   : > { %1192 = vrot.lane.b32.xlu2 %v1190_v62, %s2300_s19 }
0x1225   : > { %1386 = vrot.lane.b32.xlu2 %v1383_v1, %s2300_s19 }
0x122d   : > { %1787 = vrot.lane.b32.xlu2 %v1785_v10, %s2300_s19 }
0x125f   : > { %v1887_v2 = vpop.permute.xlu2 %1886 }
0x1260   : > { %v1923_v6 = vpop.permute.xlu1 %1922  ;;  %v1889_v27 = vmul.f32 %v1887_v2, %v1865_v45 }
0x1261   : > { %v1925_v39 = vadd.f32 %v1923_v6, %v1915_v4 }
0x1263   : > { %2286 = vtanh.f32 %v1925_v39 }
0x1267   : > { %v595_v49 = vpop.permute.xlu2 %594 }
0x1268   : > { %601 = vst.msk [vmem:[%s2503_s27 + $0x7] sm:$0x1] %vm600_vm8, %v595_v49 }
0x1269   : > { %v2287_v28 = vpop.eup %2286 }
0x126a   : > { %1928 = vrot.lane.b32.xlu1 %v2287_v28, %s2299_s18 }
0x126f   : > { %v799_v14 = vpop.permute.xlu2 %798 }
0x1270   : > { %803 = vst.msk [vmem:[%s2503_s27 + $0xe] sm:$0x1] %vm600_vm8, %v799_v14 }
0x1271   : > { %1777 = vst.msk [vmem:[%s2503_s27 + $0xe] sm:$0x1] %vm582_vm9, %v2881_v57  ;;  %v997_v57 = vperm.slane %v2691_v46, 0  ;;  %v1937_v46 = vrot.slane %v2861_v5, 6  ;;  %v996_v5 = vperm.slane %v2689_v44, 0 }
0x1272   : > { %1933 = vrot.lane.b32.xlu1 %v1889_v27, %s2300_s19 }
0x1273   : > { %v1939_v43 = vmul.f32 %v1937_v46, %v2477_v24  ;;  %v1189_v24 = vrot.slane %v1187_v3, 1 }
0x1277   : > { %v1193_v37 = vpop.permute.xlu2 %1192 }
0x1278   : > { %1198 = vst.msk [vmem:[%s2503_s27 + $0x4] sm:$0x1] %vm600_vm8, %v1193_v37 }
0x1279   : > { %1373 = vst.msk [vmem:[%s2503_s27 + $0x4] sm:$0x1] %vm582_vm9, %v2924_v29 }
0x127a   : > { %796 = vrot.lane.b32.xlu1 %v794_v42, %s2300_s19 }
0x127f   : > { %v1387_v22 = vpop.permute.xlu2 %1386 }
0x1280   : > { %1391 = vst.msk [vmem:[%s2503_s27 + $0xb] sm:$0x1] %vm600_vm8, %v1387_v22 }
0x1282   : > { %1000 = vrot.lane.b32.xlu1 %v997_v57, %s2300_s19 }
0x1287   : > { %v1788_v15 = vpop.permute.xlu2 %1787 }
0x1288   : > { %1793 = vst.msk [vmem:[%s2503_s27 + $0x1] sm:$0x1] %vm600_vm8, %v1788_v15 }
0x128a   : > { %1384 = vrot.lane.b32.xlu1 %v1382_v63, %s2300_s19 }
0x1292   : > { %1587 = vrot.lane.b32.xlu1 %v1584_v0, %s2300_s19 }
0x12dc   : > { %v1929_v20 = vpop.permute.xlu1 %1928 }
0x12dd   : > { %v1931_v17 = vmul.f32 %v1929_v20, %v1907_v51 }
0x12df   : > { %1942 = vrot.lane.b32.xlu0 %v1931_v17, %s2300_s19 }
0x12e4   : > { %v1934_v45 = vpop.permute.xlu1 %1933 }
0x12e5   : > { %v1936_v38 = vmul.f32 %v2797_v19, %v1934_v45 }
0x12e7   : > { %v1940_v56 = vadd.f32 %v1939_v43, %v1936_v38  ;;  %596 = vrot.lane.b32.xlu0 %v593_v18, %s2300_s19 }
0x12e9   : > { %v1949_v21 = vmul.f32 %v2797_v19, %v1940_v56  ;;  %v1191_v19 = vperm.slane %v1189_v24, 0 }
0x12eb   : > { %1951 = vst [vmem:[#allocation1] sm:$0xff] %v1949_v21 }
0x12ec   : > { %v797_v30 = vpop.permute.xlu1 %796 }
0x12ed   : > { %802 = vst.msk [vmem:[%s2503_s27 + $0x6] sm:$0x1] %vm600_vm8, %v797_v30 }
0x12ee   : > { %1776 = vst.msk [vmem:[%s2503_s27 + $0x6] sm:$0x1] %vm582_vm9, %v2879_v36  ;;  %v1583_v36 = vperm.slane %v2866_v61, 0 }
0x12ef   : > { %998 = vrot.lane.b32.xlu0 %v996_v5, %s2300_s19 }
0x12f2   : > { %v1953_v11 = vld [vmem:[#allocation1 + $0x6] ss:$9 sm:$0xff] }
0x12f3   : > { %1958 = vst.msk [vmem:[%s2503_s27 + $0x7] sm:$0x1] %vm582_vm9, %v1953_v11  ;;  %v1955_v51 = vld [vmem:[#allocation1 + $0x7] ss:$9 sm:$0xff] }
0x12f4   : > { %v1001_v41 = vpop.permute.xlu1 %1000 }
0x12f5   : > { %1005 = vst.msk [vmem:[%s2503_s27 + $0xd] sm:$0x1] %vm600_vm8, %v1001_v41 }
0x12f6   : > { %1575 = vst.msk [vmem:[%s2503_s27 + $0xd] sm:$0x1] %vm582_vm9, %v2823_v12  ;;  %v1947_v12 = vmul.f32 %v1824_v35, %v2487_v33 }
0x12f7   : > { %1194 = vrot.lane.b32.xlu0 %v1191_v19, %s2300_s19 }
0x12fc   : > { %v1385_v44 = vpop.permute.xlu1 %1384 }
0x12fd   : > { %1390 = vst.msk [vmem:[%s2503_s27 + $0x3] sm:$0x1] %vm600_vm8, %v1385_v44 }
0x12ff   : > { %1585 = vrot.lane.b32.xlu0 %v1583_v36, %s2300_s19 }
0x1304   : > { %v1588_v23 = vpop.permute.xlu1 %1587 }
0x1305   : > { %1592 = vst.msk [vmem:[%s2503_s27 + $0xa] sm:$0x1] %vm600_vm8, %v1588_v23 }
0x1307   : > { %1789 = vrot.lane.b32.xlu0 %v1786_v31, %s2300_s19 }
0x1351   : > { %v1943_v34 = vpop.permute.xlu0 %1942 }
0x1352   : > { %v1945_v40 = vmul.f32 %v2813_v26, %v1943_v34 }
0x1354   : > { %v1948_v16 = vadd.f32 %v1947_v12, %v1945_v40 }
0x1356   : > { %v1960_v61 = vmul.f32 %v2813_v26, %v1948_v16  ;;  %v1371_v26 = vrot.slane %v2924_v29, 1 }
0x1358   : > { %v1963_v47 = vperm.slane %v1960_v61, 0  ;;  %v1962_v50 = vrot.slane %v1960_v61, 1 }
0x1359   : > { %v597_v13 = vpop.permute.xlu0 %596 }
0x135a   : > { %602 = vst.msk [vmem:[%s2503_s27 + $0xf] sm:$0x1] %vm600_vm8, %v597_v13  ;;  %1965 = vrot.lane.b32.xlu1 %v1963_v47, %s2300_s19  ;;  %v1964_v58 = vperm.slane %v1962_v50, 0 }
0x135b   : > { %1959 = vst.msk [vmem:[%s2503_s27 + $0xf] sm:$0x1] %vm582_vm9, %v1955_v51 }
0x135c   : > { %1967 = vrot.lane.b32.xlu2 %v1964_v58, %s2300_s19 }
0x1361   : > { %v999_v33 = vpop.permute.xlu0 %998 }
0x1362   : > { %1004 = vst.msk [vmem:[%s2503_s27 + $0x5] sm:$0x1] %vm600_vm8, %v999_v33 }
0x1363   : > { %1574 = vst.msk [vmem:[%s2503_s27 + $0x5] sm:$0x1] %vm582_vm9, %v2821_v7 }
0x1369   : > { %v1195_v35 = vpop.permute.xlu0 %1194 }
0x136a   : > { %1199 = vst.msk [vmem:[%s2503_s27 + $0xc] sm:$0x1] %vm600_vm8, %v1195_v35 }
0x136b   : > { %1374 = vst.msk [vmem:[%s2503_s27 + $0xc] sm:$0x1] %vm582_vm9, %v1371_v26 }
0x1371   : > { %v1586_v53 = vpop.permute.xlu0 %1585 }
0x1372   : > { %1591 = vst.msk [vmem:[%s2503_s27 + $0x2] sm:$0x1] %vm600_vm8, %v1586_v53 }
0x1379   : > { %v1790_v9 = vpop.permute.xlu0 %1789 }
0x137a   : > { %1794 = vst.msk [vmem:[%s2503_s27 + $0x9] sm:$0x1] %vm600_vm8, %v1790_v9 }
0x13b6   : > { %v1968_v54 = vpop.permute.xlu2 %1967 }
0x13b7   : > { %1972 = vst.msk [vmem:[%s2503_s27 + $0x8] sm:$0x1] %vm600_vm8, %v1968_v54 }
0x13cc   : > { %v1966_v25 = vpop.permute.xlu1 %1965 }
0x13cd   : > { %1971 = vst.msk [vmem:[%s2503_s27] sm:$0x1] %vm600_vm8, %v1966_v25 }
0x13ce PF: > { %s16_s21 = sadd.s32 1, %s2296_s21  }
0x13cf   : > { %p13_p4 = scmp.ge.s32.totalorder %s16_s21, 4  }
0x13d1   :  { %15 = sbr.rel (!%p13_p4) target bundleno = 1 (0x1), region = 113 }

</bundles_post_ra>
